<compile_context>
chip_gen: v6e
topology: v6e:2x2x1
jax: 0.10.0
libtpu: 0.0.40
codegen_flags: <defaults>
</compile_context>

<pallas_src>
import functools

import jax
import jax.numpy as jnp
from jax.experimental import pallas as pl
from jax.experimental.pallas import tpu as pltpu

_CP = 128      # lane-padded channel width
_K1 = 32       # conv1 im2col contraction per pool tap (25 taps zero-padded to 32)
_F1P = 64      # fc1 output width (50 padded to 64)
_H1R = 160     # per-image h1 scratch rows: 144 used + 16 zero pad (max shift 52 + 96 = 148)


# ------------------------------ fused kernel --------------------------------


def _fused_forward_kernel(p_ref, w1_ref, b1_ref, w2_ref, b2_ref,
                          wf1_ref, bf1_ref, wf2_ref, bf2_ref,
                          out_ref, h1_ref, *, bb):
    """SmallConv forward for a block of `bb` images (grid iterates over batch blocks)."""
    # ---------- conv1: one lane-dense matmul + 2x2 max-pool + bias + relu ----------
    # patch lanes = (pool tap q = pi*2+pj)*32 + (im2col tap k = di*5+dj); rows = io*12+jo.
    # w1 is block-diagonal [128, 512]: output lane group q*128.. holds the conv value at
    # pool tap q, so pooling is an elementwise max of 4 aligned 128-lane groups.
    p = p_ref[...].reshape(bb * 144, _CP)                                    # bf16
    c1 = jnp.dot(p, w1_ref[...], preferred_element_type=jnp.float32)         # [bb*144, 512]
    pooled1 = jnp.maximum(jnp.maximum(c1[:, 0:_CP], c1[:, _CP:2 * _CP]),
                          jnp.maximum(c1[:, 2 * _CP:3 * _CP], c1[:, 3 * _CP:4 * _CP]))
    h1 = jnp.maximum(pooled1 + b1_ref[...], 0.0).astype(jnp.bfloat16)        # [bb*144, 128]

    # Persist per-image [144,128] activations (row = io*12 + jo) in a bf16 scratch padded
    # to _H1R rows; pad rows are zeroed so the shifted reads below are in-bounds and
    # finite (they only feed conv2 rows that the pooling discards).
    for b in range(bb):
        h1_ref[b, 0:144, :] = h1[b * 144:(b + 1) * 144, :]
        h1_ref[b, 144:_H1R, :] = jnp.zeros((_H1R - 144, _CP), jnp.bfloat16)

    # ---------- conv2: single deep-K matmul over the 25 shifted-row views ----------
    # conv2 output (i, j) for tap (di, dj) reads h1 row (i+di)*12 + (j+dj)
    # = (i*12 + j) + shift — a uniform row shift per tap.  Lane-concatenating the 25
    # shifted [96,128] views gives a [96, 3200] im2col block per image; accumulation
    # over taps then happens inside the MXU.
    lhs_parts = []
    for b in range(bb):
        taps = []
        for t in range(25):
            shift = (t // 5) * 12 + (t % 5)
            taps.append(h1_ref[b, shift:shift + 96, :])
        lhs_parts.append(jnp.concatenate(taps, axis=1))                      # [96, 3200] bf16
    lhs2 = jnp.concatenate(lhs_parts, axis=0) if bb > 1 else lhs_parts[0]    # [bb*96, 3200]
    out2 = jnp.dot(lhs2, w2_ref[...], preferred_element_type=jnp.float32)    # [bb*96, 128]

    # ---------- conv2 2x2 max-pool (vectorised) + bias + relu ----------
    # out2 row (per image) = i*12 + j; only j <= 7 is a real conv2 output, the rest is
    # finite junk that the :4 slice below discards.
    out2 = out2.reshape(bb, 4, 2, 6, 2, _CP)                 # (b, io, i_in, jo6, j_in, c)
    pooled2 = jnp.max(out2[:, :, :, :4, :, :], axis=(2, 4))                  # [bb, 4, 4, 128]
    h2 = jnp.maximum(pooled2 + b2_ref[...], 0.0)                             # f32

    # ---------- fc1: single [bb, 2048] x [2048, 64] matmul ----------
    # Flatten (io, jo, c) -> lane = (io*4 + jo)*128 + c; the packed weight maps that to
    # PyTorch's CHW view(-1, 320) order.
    h2_flat = h2.reshape(bb, 16 * _CP).astype(jnp.bfloat16)                  # [bb, 2048]
    y1 = jnp.dot(h2_flat, wf1_ref[...], preferred_element_type=jnp.float32)  # [bb, 64]
    y1 = jnp.maximum(y1 + bf1_ref[...], 0.0).astype(jnp.bfloat16)

    # ---------- fc2 + log_softmax masked to the 10 real classes ----------
    y2 = jnp.dot(y1, wf2_ref[...], preferred_element_type=jnp.float32) + bf2_ref[...]
    lane = jax.lax.broadcasted_iota(jnp.int32, (bb, _CP), 1)
    valid = lane < 10
    masked = jnp.where(valid, y2, -jnp.inf)
    m = jnp.max(masked, axis=-1, keepdims=True)
    z = masked - m
    lse = jnp.log(jnp.sum(jnp.exp(z), axis=-1, keepdims=True))
    out_ref[...] = jnp.where(valid, z - lse, 0.0).reshape(bb, 1, _CP)        # lane-dense store


# --------------------------- wrapper / weight prep ---------------------------


def prepare_params(params):
    """One-time packing of SmallConv weights into lane-padded bf16 matrices."""
    w1, b1, w2, b2, fc1w, fc1b, fc2w, fc2b = params
    f32, bf16 = jnp.float32, jnp.bfloat16

    # conv1: block-diagonal [128, 512]; block q maps input lanes q*32+k -> lanes q*128+co.
    w1k = w1.reshape(10, 25).T                                   # [k, co]
    w1m = jnp.zeros((_CP, 4 * _CP), f32)
    for q in range(4):
        w1m = w1m.at[q * _K1:q * _K1 + 25, q * _CP:q * _CP + 10].set(w1k)
    w1m = w1m.astype(bf16)
    b1p = jnp.zeros((1, _CP), f32).at[0, :10].set(b1)

    # conv2: flat deep-K weight [3200, 128]; row t*128 + ci -> col co.
    w2t = jnp.transpose(w2, (2, 3, 1, 0)).reshape(25, 10, 20)    # [t, ci, co]
    w2m = (jnp.zeros((25, _CP, _CP), f32).at[:, :10, :20].set(w2t)
           .reshape(25 * _CP, _CP).astype(bf16))
    b2p = jnp.zeros((1, _CP), f32).at[0, :20].set(b2)

    # fc1: flat deep-K weight [2048, 64]; row r*128 + c maps PyTorch feature c*16 + r
    # (view(-1, 320) flattens (c, h, w), r = io*4 + jo).
    f1 = jnp.transpose(fc1w.reshape(50, 20, 16), (2, 1, 0))      # [r, c, n]
    wf1 = (jnp.zeros((16, _CP, _F1P), f32).at[:, :20, :50].set(f1)
           .reshape(16 * _CP, _F1P).astype(bf16))
    bf1 = jnp.zeros((1, _F1P), f32).at[0, :50].set(fc1b)

    # fc2: [64, 128].
    wf2 = jnp.zeros((_F1P, _CP), f32).at[:50, :10].set(fc2w.T).astype(bf16)
    bf2 = jnp.zeros((1, _CP), f32).at[0, :10].set(fc2b)
    return (w1m, b1p, w2m, b2p, wf1, bf1, wf2, bf2)


def _conv1_patches(x_nchw):
    """Lane-dense conv1 im2col: [B, 144, 128], lane = (pool tap q)*32 + (im2col tap k)."""
    B = x_nchw.shape[0]
    x = x_nchw.reshape(B, 28, 28)
    taps = jnp.stack([x[:, di:di + 24, dj:dj + 24]
                      for di in range(5) for dj in range(5)], axis=-1)   # [B, 24, 24, 25]
    t = taps.reshape(B, 12, 2, 12, 2, 25)              # (b, io, pi, jo, pj, k)
    t = jnp.transpose(t, (0, 1, 3, 2, 4, 5))           # (b, io, jo, pi, pj, k)
    t = t.reshape(B, 144, 4, 25)
    t = jnp.pad(t, ((0, 0), (0, 0), (0, 0), (0, _K1 - 25)))
    return t.reshape(B, 144, 4 * _K1).astype(jnp.bfloat16)


@functools.partial(jax.jit, static_argnames=("block_b",))
def small_conv_forward(x_nchw, prepped, block_b=8):
    """Pallas implementation of SmallConv.forward. Input: NCHW [B, 1, 28, 28]."""
    w1m, b1p, w2m, b2p, wf1, bf1, wf2, bf2 = prepped
    B = x_nchw.shape[0]
    # Images per grid step; keep >= 2 grid steps when possible (v7x has 2 TensorCores).
    bb = max(1, min(block_b, B // 2)) if B >= 2 else 1
    n_blocks = pl.cdiv(B, bb)
    b_pad = n_blocks * bb

    patches = _conv1_patches(x_nchw)                              # [B, 144, 128] bf16
    if b_pad != B:
        patches = jnp.pad(patches, ((0, b_pad - B), (0, 0), (0, 0)))

    def full(shape):                                              # grid-invariant weight spec
        return pl.BlockSpec(shape, lambda g: (0, 0))

    grid_spec = pltpu.PrefetchScalarGridSpec(
        num_scalar_prefetch=0,
        grid=(n_blocks,),
        in_specs=[
            pl.BlockSpec((bb, 144, _CP), lambda g: (g, 0, 0)),    # conv1 patches (streamed)
            full((_CP, 4 * _CP)), full((1, _CP)),                 # conv1 weight / bias
            full((25 * _CP, _CP)), full((1, _CP)),                # conv2 weight / bias
            full((16 * _CP, _F1P)), full((1, _F1P)),              # fc1 weight / bias
            full((_F1P, _CP)), full((1, _CP)),                    # fc2 weight / bias
        ],
        out_specs=pl.BlockSpec((bb, 1, _CP), lambda g: (g, 0, 0)),
        scratch_shapes=[pltpu.VMEM((bb, _H1R, _CP), jnp.bfloat16)],   # pooled conv1 acts (bf16)
    )
    out = pl.pallas_call(
        functools.partial(_fused_forward_kernel, bb=bb),
        out_shape=jax.ShapeDtypeStruct((b_pad, 1, _CP), jnp.float32),
        grid_spec=grid_spec,
        compiler_params=pltpu.CompilerParams(
            dimension_semantics=("parallel",),
            vmem_limit_bytes=32 * 1024 * 1024,   # explicit: v5e default scoped limit is 16 MiB
        ),
    )(patches, w1m, b1p, w2m, b2p, wf1, bf1, wf2, bf2)
    return out.reshape(b_pad, _CP)[:B, :10]


# --------------------------- plain-JAX reference ----------------------------


def reference_forward(x_nchw, params):
    w1, b1, w2, b2, fc1w, fc1b, fc2w, fc2b = params

    def conv(x, w, b):
        y = jax.lax.conv_general_dilated(
            x, w, (1, 1), "VALID", dimension_numbers=("NCHW", "OIHW", "NCHW"))
        return y + b.reshape(1, -1, 1, 1)

    def pool(x):
        return jax.lax.reduce_window(
            x, -jnp.inf, jax.lax.max, (1, 1, 2, 2), (1, 1, 2, 2), "VALID")

    h = jnp.maximum(pool(conv(x_nchw, w1, b1)), 0.0)
    h = jnp.maximum(pool(conv(h, w2, b2)), 0.0)
    h = h.reshape(-1, 320)
    h = jnp.maximum(h @ fc1w.T + fc1b, 0.0)
    h = h @ fc2w.T + fc2b
    return jax.nn.log_softmax(h, axis=1)


# ----------------------------------- main -----------------------------------


def _uniform(key, shape, fan_in):
    bound = 1.0 / jnp.sqrt(float(fan_in))
    return jax.random.uniform(key, shape, jnp.float32, -bound, bound)


if __name__ == "__main__":
    key = jax.random.PRNGKey(0)
    ks = jax.random.split(key, 10)

    # Deterministic PyTorch-style uniform(-1/sqrt(fan_in), 1/sqrt(fan_in)) init.
    w1 = _uniform(ks[0], (10, 1, 5, 5), 1 * 5 * 5)
    b1 = _uniform(ks[1], (10,), 1 * 5 * 5)
    w2 = _uniform(ks[2], (20, 10, 5, 5), 10 * 5 * 5)
    b2 = _uniform(ks[3], (20,), 10 * 5 * 5)
    fc1w = _uniform(ks[4], (50, 320), 320)
    fc1b = _uniform(ks[5], (50,), 320)
    fc2w = _uniform(ks[6], (10, 50), 50)
    fc2b = _uniform(ks[7], (10,), 50)
    params = (w1, b1, w2, b2, fc1w, fc1b, fc2w, fc2b)

    prepped = prepare_params(params)          # one-time weight packing (not in hot path)

    # Primary check: MNIST-sized NCHW input, batch=2 (bb=1, 2 grid steps).
    x = jax.random.normal(ks[8], (2, 1, 28, 28), jnp.float32)
    out = jax.block_until_ready(small_conv_forward(x, prepped))
    assert out.shape == (2, 10), out.shape
    # log-softmax sanity: rows exponentiate to ~1.
    assert bool(jnp.all(jnp.abs(jnp.sum(jnp.exp(out), axis=1) - 1.0) < 1e-3))
    ref = reference_forward(x, params)
    assert bool(jnp.allclose(out, ref, atol=1e-1)), "mismatch vs reference (B=2)"

    # Secondary check: exercises the batch-blocked path (bb=2 images per grid step).
    x4 = jax.random.normal(ks[9], (4, 1, 28, 28), jnp.float32)
    out4 = jax.block_until_ready(small_conv_forward(x4, prepped))
    ref4 = reference_forward(x4, params)
    assert out4.shape == (4, 10)
    assert bool(jnp.allclose(out4, ref4, atol=1e-1)), "mismatch vs reference (B=4)"

    print("KERNEL_OK")
</pallas_src>

<mosaic_0001>
module attributes {stable_mosaic.version = 11 : i64} {
  func.func @_fused_forward_kernel(%arg0: i32, %arg1: memref<1x144x128xbf16, #tpu.memory_space<vmem>>, %arg2: memref<128x512xbf16, #tpu.memory_space<vmem>>, %arg3: memref<1x128xf32, #tpu.memory_space<vmem>>, %arg4: memref<3200x128xbf16, #tpu.memory_space<vmem>>, %arg5: memref<1x128xf32, #tpu.memory_space<vmem>>, %arg6: memref<2048x64xbf16, #tpu.memory_space<vmem>>, %arg7: memref<1x64xf32, #tpu.memory_space<vmem>>, %arg8: memref<64x128xbf16, #tpu.memory_space<vmem>>, %arg9: memref<1x128xf32, #tpu.memory_space<vmem>>, %arg10: memref<1x1x128xf32, #tpu.memory_space<vmem>>, %arg11: memref<1x160x128xbf16, #tpu.memory_space<vmem>>) attributes {dimension_semantics = [#tpu.dimension_semantics<parallel>], iteration_bounds = array<i64: 2>, scalar_prefetch = 0 : i64, scratch_operands = 1 : i64, tpu.core_type = #tpu.core_type<tc>, window_params = [{transform_indices = @transform_0, window_bounds = array<i64: 1, 144, 128>}, {pipeline_mode = #tpu.pipeline_mode<synchronous>, transform_indices = @transform_1, window_bounds = array<i64: 128, 512>}, {pipeline_mode = #tpu.pipeline_mode<synchronous>, transform_indices = @transform_2, window_bounds = array<i64: 1, 128>}, {pipeline_mode = #tpu.pipeline_mode<synchronous>, transform_indices = @transform_3, window_bounds = array<i64: 3200, 128>}, {pipeline_mode = #tpu.pipeline_mode<synchronous>, transform_indices = @transform_4, window_bounds = array<i64: 1, 128>}, {pipeline_mode = #tpu.pipeline_mode<synchronous>, transform_indices = @transform_5, window_bounds = array<i64: 2048, 64>}, {pipeline_mode = #tpu.pipeline_mode<synchronous>, transform_indices = @transform_6, window_bounds = array<i64: 1, 64>}, {pipeline_mode = #tpu.pipeline_mode<synchronous>, transform_indices = @transform_7, window_bounds = array<i64: 64, 128>}, {pipeline_mode = #tpu.pipeline_mode<synchronous>, transform_indices = @transform_8, window_bounds = array<i64: 1, 128>}, {transform_indices = @transform_9, window_bounds = array<i64: 1, 1, 128>}]} {
    %c0 = arith.constant 0 : index
    %c0_0 = arith.constant 0 : index
    %c0_1 = arith.constant 0 : index
    %0 = vector.load %arg1[%c0, %c0_0, %c0_1] : memref<1x144x128xbf16, #tpu.memory_space<vmem>>, vector<1x144x128xbf16>
    %1 = vector.shape_cast %0 : vector<1x144x128xbf16> to vector<144x128xbf16>
    %c0_2 = arith.constant 0 : index
    %c0_3 = arith.constant 0 : index
    %2 = vector.load %arg2[%c0_2, %c0_3] : memref<128x512xbf16, #tpu.memory_space<vmem>>, vector<128x512xbf16>
    %cst = arith.constant dense<0.000000e+00> : vector<144x512xf32>
    %3 = tpu.matmul %1, %2, %cst {dimension_numbers = #tpu.dot_dimension_numbers<[1], [0], [0], [1], [0, 0, 1, 1], [], []>} : vector<144x128xbf16>, vector<128x512xbf16>, vector<144x512xf32> -> vector<144x512xf32>
    %4 = vector.extract_strided_slice %3 {offsets = [0, 0], sizes = [144, 128], strides = [1, 1]} : vector<144x512xf32> to vector<144x128xf32>
    %5 = vector.extract_strided_slice %3 {offsets = [0, 128], sizes = [144, 128], strides = [1, 1]} : vector<144x512xf32> to vector<144x128xf32>
    %6 = arith.maximumf %4, %5 : vector<144x128xf32>
    %7 = vector.extract_strided_slice %3 {offsets = [0, 256], sizes = [144, 128], strides = [1, 1]} : vector<144x512xf32> to vector<144x128xf32>
    %8 = vector.extract_strided_slice %3 {offsets = [0, 384], sizes = [144, 128], strides = [1, 1]} : vector<144x512xf32> to vector<144x128xf32>
    %9 = arith.maximumf %7, %8 : vector<144x128xf32>
    %10 = arith.maximumf %6, %9 : vector<144x128xf32>
    %c0_4 = arith.constant 0 : index
    %c0_5 = arith.constant 0 : index
    %11 = vector.load %arg3[%c0_4, %c0_5] : memref<1x128xf32, #tpu.memory_space<vmem>>, vector<1x128xf32>
    %12 = vector.broadcast %11 : vector<1x128xf32> to vector<144x128xf32>
    %13 = arith.addf %10, %12 : vector<144x128xf32>
    %cst_6 = arith.constant 0.000000e+00 : f32
    %14 = vector.broadcast %cst_6 : f32 to vector<144x128xf32>
    %15 = arith.maximumf %13, %14 : vector<144x128xf32>
    %16 = arith.truncf %15 : vector<144x128xf32> to vector<144x128xbf16>
    %c0_7 = arith.constant 0 : index
    %c0_8 = arith.constant 0 : index
    %c0_9 = arith.constant 0 : index
    %17 = vector.load %arg11[%c0_7, %c0_8, %c0_9] : memref<1x160x128xbf16, #tpu.memory_space<vmem>>, vector<1x144x128xbf16>
    %18 = vector.shape_cast %17 : vector<1x144x128xbf16> to vector<144x128xbf16>
    %19 = vector.shape_cast %16 : vector<144x128xbf16> to vector<1x144x128xbf16>
    tpu.vector_store %arg11[%c0_7, %c0_8, %c0_9], %19 {strides = array<i32>} : memref<1x160x128xbf16, #tpu.memory_space<vmem>>, vector<1x144x128xbf16>,
    %cst_10 = arith.constant 0.000000e+00 : bf16
    %20 = vector.broadcast %cst_10 : bf16 to vector<16x128xbf16>
    %c0_11 = arith.constant 0 : index
    %c144 = arith.constant 144 : index
    %c0_12 = arith.constant 0 : index
    %21 = vector.load %arg11[%c0_11, %c144, %c0_12] : memref<1x160x128xbf16, #tpu.memory_space<vmem>>, vector<1x16x128xbf16>
    %22 = vector.shape_cast %21 : vector<1x16x128xbf16> to vector<16x128xbf16>
    %23 = vector.shape_cast %20 : vector<16x128xbf16> to vector<1x16x128xbf16>
    tpu.vector_store %arg11[%c0_11, %c144, %c0_12], %23 {strides = array<i32>} : memref<1x160x128xbf16, #tpu.memory_space<vmem>>, vector<1x16x128xbf16>,
    %c0_13 = arith.constant 0 : index
    %c0_14 = arith.constant 0 : index
    %c0_15 = arith.constant 0 : index
    %24 = vector.load %arg11[%c0_13, %c0_14, %c0_15] : memref<1x160x128xbf16, #tpu.memory_space<vmem>>, vector<1x96x128xbf16>
    %25 = vector.shape_cast %24 : vector<1x96x128xbf16> to vector<96x128xbf16>
    %c0_16 = arith.constant 0 : index
    %c1 = arith.constant 1 : index
    %c0_17 = arith.constant 0 : index
    %26 = vector.load %arg11[%c0_16, %c1, %c0_17] : memref<1x160x128xbf16, #tpu.memory_space<vmem>>, vector<1x96x128xbf16>
    %27 = vector.shape_cast %26 : vector<1x96x128xbf16> to vector<96x128xbf16>
    %c0_18 = arith.constant 0 : index
    %c2 = arith.constant 2 : index
    %c0_19 = arith.constant 0 : index
    %28 = vector.load %arg11[%c0_18, %c2, %c0_19] : memref<1x160x128xbf16, #tpu.memory_space<vmem>>, vector<1x96x128xbf16>
    %29 = vector.shape_cast %28 : vector<1x96x128xbf16> to vector<96x128xbf16>
    %c0_20 = arith.constant 0 : index
    %c3 = arith.constant 3 : index
    %c0_21 = arith.constant 0 : index
    %30 = vector.load %arg11[%c0_20, %c3, %c0_21] : memref<1x160x128xbf16, #tpu.memory_space<vmem>>, vector<1x96x128xbf16>
    %31 = vector.shape_cast %30 : vector<1x96x128xbf16> to vector<96x128xbf16>
    %c0_22 = arith.constant 0 : index
    %c4 = arith.constant 4 : index
    %c0_23 = arith.constant 0 : index
    %32 = vector.load %arg11[%c0_22, %c4, %c0_23] : memref<1x160x128xbf16, #tpu.memory_space<vmem>>, vector<1x96x128xbf16>
    %33 = vector.shape_cast %32 : vector<1x96x128xbf16> to vector<96x128xbf16>
    %c0_24 = arith.constant 0 : index
    %c12 = arith.constant 12 : index
    %c0_25 = arith.constant 0 : index
    %34 = vector.load %arg11[%c0_24, %c12, %c0_25] : memref<1x160x128xbf16, #tpu.memory_space<vmem>>, vector<1x96x128xbf16>
    %35 = vector.shape_cast %34 : vector<1x96x128xbf16> to vector<96x128xbf16>
    %c0_26 = arith.constant 0 : index
    %c13 = arith.constant 13 : index
    %c0_27 = arith.constant 0 : index
    %36 = vector.load %arg11[%c0_26, %c13, %c0_27] : memref<1x160x128xbf16, #tpu.memory_space<vmem>>, vector<1x96x128xbf16>
    %37 = vector.shape_cast %36 : vector<1x96x128xbf16> to vector<96x128xbf16>
    %c0_28 = arith.constant 0 : index
    %c14 = arith.constant 14 : index
    %c0_29 = arith.constant 0 : index
    %38 = vector.load %arg11[%c0_28, %c14, %c0_29] : memref<1x160x128xbf16, #tpu.memory_space<vmem>>, vector<1x96x128xbf16>
    %39 = vector.shape_cast %38 : vector<1x96x128xbf16> to vector<96x128xbf16>
    %c0_30 = arith.constant 0 : index
    %c15 = arith.constant 15 : index
    %c0_31 = arith.constant 0 : index
    %40 = vector.load %arg11[%c0_30, %c15, %c0_31] : memref<1x160x128xbf16, #tpu.memory_space<vmem>>, vector<1x96x128xbf16>
    %41 = vector.shape_cast %40 : vector<1x96x128xbf16> to vector<96x128xbf16>
    %c0_32 = arith.constant 0 : index
    %c16 = arith.constant 16 : index
    %c0_33 = arith.constant 0 : index
    %42 = vector.load %arg11[%c0_32, %c16, %c0_33] : memref<1x160x128xbf16, #tpu.memory_space<vmem>>, vector<1x96x128xbf16>
    %43 = vector.shape_cast %42 : vector<1x96x128xbf16> to vector<96x128xbf16>
    %c0_34 = arith.constant 0 : index
    %c24 = arith.constant 24 : index
    %c0_35 = arith.constant 0 : index
    %44 = vector.load %arg11[%c0_34, %c24, %c0_35] : memref<1x160x128xbf16, #tpu.memory_space<vmem>>, vector<1x96x128xbf16>
    %45 = vector.shape_cast %44 : vector<1x96x128xbf16> to vector<96x128xbf16>
    %c0_36 = arith.constant 0 : index
    %c25 = arith.constant 25 : index
    %c0_37 = arith.constant 0 : index
    %46 = vector.load %arg11[%c0_36, %c25, %c0_37] : memref<1x160x128xbf16, #tpu.memory_space<vmem>>, vector<1x96x128xbf16>
    %47 = vector.shape_cast %46 : vector<1x96x128xbf16> to vector<96x128xbf16>
    %c0_38 = arith.constant 0 : index
    %c26 = arith.constant 26 : index
    %c0_39 = arith.constant 0 : index
    %48 = vector.load %arg11[%c0_38, %c26, %c0_39] : memref<1x160x128xbf16, #tpu.memory_space<vmem>>, vector<1x96x128xbf16>
    %49 = vector.shape_cast %48 : vector<1x96x128xbf16> to vector<96x128xbf16>
    %c0_40 = arith.constant 0 : index
    %c27 = arith.constant 27 : index
    %c0_41 = arith.constant 0 : index
    %50 = vector.load %arg11[%c0_40, %c27, %c0_41] : memref<1x160x128xbf16, #tpu.memory_space<vmem>>, vector<1x96x128xbf16>
    %51 = vector.shape_cast %50 : vector<1x96x128xbf16> to vector<96x128xbf16>
    %c0_42 = arith.constant 0 : index
    %c28 = arith.constant 28 : index
    %c0_43 = arith.constant 0 : index
    %52 = vector.load %arg11[%c0_42, %c28, %c0_43] : memref<1x160x128xbf16, #tpu.memory_space<vmem>>, vector<1x96x128xbf16>
    %53 = vector.shape_cast %52 : vector<1x96x128xbf16> to vector<96x128xbf16>
    %c0_44 = arith.constant 0 : index
    %c36 = arith.constant 36 : index
    %c0_45 = arith.constant 0 : index
    %54 = vector.load %arg11[%c0_44, %c36, %c0_45] : memref<1x160x128xbf16, #tpu.memory_space<vmem>>, vector<1x96x128xbf16>
    %55 = vector.shape_cast %54 : vector<1x96x128xbf16> to vector<96x128xbf16>
    %c0_46 = arith.constant 0 : index
    %c37 = arith.constant 37 : index
    %c0_47 = arith.constant 0 : index
    %56 = vector.load %arg11[%c0_46, %c37, %c0_47] : memref<1x160x128xbf16, #tpu.memory_space<vmem>>, vector<1x96x128xbf16>
    %57 = vector.shape_cast %56 : vector<1x96x128xbf16> to vector<96x128xbf16>
    %c0_48 = arith.constant 0 : index
    %c38 = arith.constant 38 : index
    %c0_49 = arith.constant 0 : index
    %58 = vector.load %arg11[%c0_48, %c38, %c0_49] : memref<1x160x128xbf16, #tpu.memory_space<vmem>>, vector<1x96x128xbf16>
    %59 = vector.shape_cast %58 : vector<1x96x128xbf16> to vector<96x128xbf16>
    %c0_50 = arith.constant 0 : index
    %c39 = arith.constant 39 : index
    %c0_51 = arith.constant 0 : index
    %60 = vector.load %arg11[%c0_50, %c39, %c0_51] : memref<1x160x128xbf16, #tpu.memory_space<vmem>>, vector<1x96x128xbf16>
    %61 = vector.shape_cast %60 : vector<1x96x128xbf16> to vector<96x128xbf16>
    %c0_52 = arith.constant 0 : index
    %c40 = arith.constant 40 : index
    %c0_53 = arith.constant 0 : index
    %62 = vector.load %arg11[%c0_52, %c40, %c0_53] : memref<1x160x128xbf16, #tpu.memory_space<vmem>>, vector<1x96x128xbf16>
    %63 = vector.shape_cast %62 : vector<1x96x128xbf16> to vector<96x128xbf16>
    %c0_54 = arith.constant 0 : index
    %c48 = arith.constant 48 : index
    %c0_55 = arith.constant 0 : index
    %64 = vector.load %arg11[%c0_54, %c48, %c0_55] : memref<1x160x128xbf16, #tpu.memory_space<vmem>>, vector<1x96x128xbf16>
    %65 = vector.shape_cast %64 : vector<1x96x128xbf16> to vector<96x128xbf16>
    %c0_56 = arith.constant 0 : index
    %c49 = arith.constant 49 : index
    %c0_57 = arith.constant 0 : index
    %66 = vector.load %arg11[%c0_56, %c49, %c0_57] : memref<1x160x128xbf16, #tpu.memory_space<vmem>>, vector<1x96x128xbf16>
    %67 = vector.shape_cast %66 : vector<1x96x128xbf16> to vector<96x128xbf16>
    %c0_58 = arith.constant 0 : index
    %c50 = arith.constant 50 : index
    %c0_59 = arith.constant 0 : index
    %68 = vector.load %arg11[%c0_58, %c50, %c0_59] : memref<1x160x128xbf16, #tpu.memory_space<vmem>>, vector<1x96x128xbf16>
    %69 = vector.shape_cast %68 : vector<1x96x128xbf16> to vector<96x128xbf16>
    %c0_60 = arith.constant 0 : index
    %c51 = arith.constant 51 : index
    %c0_61 = arith.constant 0 : index
    %70 = vector.load %arg11[%c0_60, %c51, %c0_61] : memref<1x160x128xbf16, #tpu.memory_space<vmem>>, vector<1x96x128xbf16>
    %71 = vector.shape_cast %70 : vector<1x96x128xbf16> to vector<96x128xbf16>
    %c0_62 = arith.constant 0 : index
    %c52 = arith.constant 52 : index
    %c0_63 = arith.constant 0 : index
    %72 = vector.load %arg11[%c0_62, %c52, %c0_63] : memref<1x160x128xbf16, #tpu.memory_space<vmem>>, vector<1x96x128xbf16>
    %73 = vector.shape_cast %72 : vector<1x96x128xbf16> to vector<96x128xbf16>
    %74 = tpu.concatenate %25, %27, %29, %31, %33, %35, %37, %39, %41, %43, %45, %47, %49, %51, %53, %55 in 1 : vector<96x128xbf16>, vector<96x128xbf16>, vector<96x128xbf16>, vector<96x128xbf16>, vector<96x128xbf16>, vector<96x128xbf16>, vector<96x128xbf16>, vector<96x128xbf16>, vector<96x128xbf16>, vector<96x128xbf16>, vector<96x128xbf16>, vector<96x128xbf16>, vector<96x128xbf16>, vector<96x128xbf16>, vector<96x128xbf16>, vector<96x128xbf16> -> vector<96x2048xbf16>
    %75 = tpu.concatenate %57, %59, %61, %63, %65, %67, %69, %71, %73 in 1 : vector<96x128xbf16>, vector<96x128xbf16>, vector<96x128xbf16>, vector<96x128xbf16>, vector<96x128xbf16>, vector<96x128xbf16>, vector<96x128xbf16>, vector<96x128xbf16>, vector<96x128xbf16> -> vector<96x1152xbf16>
    %76 = tpu.concatenate %74, %75 in 1 : vector<96x2048xbf16>, vector<96x1152xbf16> -> vector<96x3200xbf16>
    %c0_64 = arith.constant 0 : index
    %c0_65 = arith.constant 0 : index
    %77 = vector.load %arg4[%c0_64, %c0_65] : memref<3200x128xbf16, #tpu.memory_space<vmem>>, vector<3200x128xbf16>
    %cst_66 = arith.constant dense<0.000000e+00> : vector<96x128xf32>
    %78 = tpu.matmul %76, %77, %cst_66 {dimension_numbers = #tpu.dot_dimension_numbers<[1], [0], [0], [1], [0, 0, 1, 1], [], []>} : vector<96x3200xbf16>, vector<3200x128xbf16>, vector<96x128xf32> -> vector<96x128xf32>
    %79 = vector.shape_cast %78 : vector<96x128xf32> to vector<1x4x2x6x2x128xf32>
    %80 = vector.extract_strided_slice %79 {offsets = [0, 0, 0, 0, 0, 0], sizes = [1, 4, 2, 4, 2, 128], strides = [1, 1, 1, 1, 1, 1]} : vector<1x4x2x6x2x128xf32> to vector<1x4x2x4x2x128xf32>
    %cst_67 = arith.constant dense<0xFF800000> : vector<1x4x4x128xf32>
    %81 = vector.multi_reduction <maximumf>, %80, %cst_67 [2, 4] : vector<1x4x2x4x2x128xf32> to vector<1x4x4x128xf32>
    %c0_68 = arith.constant 0 : index
    %c0_69 = arith.constant 0 : index
    %82 = vector.load %arg5[%c0_68, %c0_69] : memref<1x128xf32, #tpu.memory_space<vmem>>, vector<1x128xf32>
    %83 = vector.shape_cast %82 : vector<1x128xf32> to vector<1x1x1x128xf32>
    %84 = vector.broadcast %83 : vector<1x1x1x128xf32> to vector<1x4x4x128xf32>
    %85 = arith.addf %81, %84 : vector<1x4x4x128xf32>
    %cst_70 = arith.constant 0.000000e+00 : f32
    %86 = vector.broadcast %cst_70 : f32 to vector<1x4x4x128xf32>
    %87 = arith.maximumf %85, %86 : vector<1x4x4x128xf32>
    %88 = vector.shape_cast %87 : vector<1x4x4x128xf32> to vector<1x2048xf32>
    %89 = arith.truncf %88 : vector<1x2048xf32> to vector<1x2048xbf16>
    %c0_71 = arith.constant 0 : index
    %c0_72 = arith.constant 0 : index
    %90 = vector.load %arg6[%c0_71, %c0_72] : memref<2048x64xbf16, #tpu.memory_space<vmem>>, vector<2048x64xbf16>
    %cst_73 = arith.constant dense<0.000000e+00> : vector<1x64xf32>
    %91 = tpu.matmul %89, %90, %cst_73 {dimension_numbers = #tpu.dot_dimension_numbers<[1], [0], [0], [1], [0, 0, 1, 1], [], []>} : vector<1x2048xbf16>, vector<2048x64xbf16>, vector<1x64xf32> -> vector<1x64xf32>
    %c0_74 = arith.constant 0 : index
    %c0_75 = arith.constant 0 : index
    %92 = vector.load %arg7[%c0_74, %c0_75] : memref<1x64xf32, #tpu.memory_space<vmem>>, vector<1x64xf32>
    %93 = arith.addf %91, %92 : vector<1x64xf32>
    %cst_76 = arith.constant 0.000000e+00 : f32
    %94 = vector.broadcast %cst_76 : f32 to vector<1x64xf32>
    %95 = arith.maximumf %93, %94 : vector<1x64xf32>
    %96 = arith.truncf %95 : vector<1x64xf32> to vector<1x64xbf16>
    %c0_77 = arith.constant 0 : index
    %c0_78 = arith.constant 0 : index
    %97 = vector.load %arg8[%c0_77, %c0_78] : memref<64x128xbf16, #tpu.memory_space<vmem>>, vector<64x128xbf16>
    %cst_79 = arith.constant dense<0.000000e+00> : vector<1x128xf32>
    %98 = tpu.matmul %96, %97, %cst_79 {dimension_numbers = #tpu.dot_dimension_numbers<[1], [0], [0], [1], [0, 0, 1, 1], [], []>} : vector<1x64xbf16>, vector<64x128xbf16>, vector<1x128xf32> -> vector<1x128xf32>
    %c0_80 = arith.constant 0 : index
    %c0_81 = arith.constant 0 : index
    %99 = vector.load %arg9[%c0_80, %c0_81] : memref<1x128xf32, #tpu.memory_space<vmem>>, vector<1x128xf32>
    %100 = arith.addf %98, %99 : vector<1x128xf32>
    %101 = tpu.iota {dimensions = array<i32: 1>} : vector<1x128xi32>
    %c10_i32 = arith.constant 10 : i32
    %102 = vector.broadcast %c10_i32 : i32 to vector<1x128xi32>
    %103 = arith.cmpi slt, %101, %102 : vector<1x128xi32>
    %cst_82 = arith.constant 0xFF800000 : f32
    %104 = vector.broadcast %cst_82 : f32 to vector<1x128xf32>
    %105 = arith.select %103, %100, %104 : vector<1x128xi1>, vector<1x128xf32>
    %cst_83 = arith.constant dense<0xFF800000> : vector<1xf32>
    %106 = vector.multi_reduction <maximumf>, %105, %cst_83 [1] : vector<1x128xf32> to vector<1xf32>
    %107 = vector.shape_cast %106 : vector<1xf32> to vector<1x1xf32>
    %108 = vector.broadcast %107 : vector<1x1xf32> to vector<1x128xf32>
    %109 = arith.subf %105, %108 : vector<1x128xf32>
    %110 = math.exp %109 : vector<1x128xf32>
    %cst_84 = arith.constant dense<0.000000e+00> : vector<1xf32>
    %111 = vector.multi_reduction <add>, %110, %cst_84 [1] : vector<1x128xf32> to vector<1xf32>
    %112 = vector.shape_cast %111 : vector<1xf32> to vector<1x1xf32>
    %113 = math.log %112 : vector<1x1xf32>
    %114 = vector.broadcast %113 : vector<1x1xf32> to vector<1x128xf32>
    %115 = arith.subf %109, %114 : vector<1x128xf32>
    %cst_85 = arith.constant 0.000000e+00 : f32
    %116 = vector.broadcast %cst_85 : f32 to vector<1x128xf32>
    %117 = arith.select %103, %115, %116 : vector<1x128xi1>, vector<1x128xf32>
    %118 = vector.shape_cast %117 : vector<1x128xf32> to vector<1x1x128xf32>
    %c0_86 = arith.constant 0 : index
    %c0_87 = arith.constant 0 : index
    %c0_88 = arith.constant 0 : index
    %119 = vector.load %arg10[%c0_86, %c0_87, %c0_88] : memref<1x1x128xf32, #tpu.memory_space<vmem>>, vector<1x1x128xf32>
    tpu.vector_store %arg10[%c0_86, %c0_87, %c0_88], %118 {strides = array<i32>} : memref<1x1x128xf32, #tpu.memory_space<vmem>>, vector<1x1x128xf32>,
    return
  }
  func.func @transform_0(%arg0: i32) -> (i32, i32, i32) {
    %c0_i32 = arith.constant 0 : i32
    %c0_i32_0 = arith.constant 0 : i32
    %c0_i32_1 = arith.constant 0 : i32
    return %arg0, %c0_i32, %c0_i32_0 : i32, i32, i32
  }
  func.func @transform_1(%arg0: i32) -> (i32, i32) {
    %c0_i32 = arith.constant 0 : i32
    %c0_i32_0 = arith.constant 0 : i32
    %c0_i32_1 = arith.constant 0 : i32
    return %c0_i32, %c0_i32_0 : i32, i32
  }
  func.func @transform_2(%arg0: i32) -> (i32, i32) {
    %c0_i32 = arith.constant 0 : i32
    %c0_i32_0 = arith.constant 0 : i32
    %c0_i32_1 = arith.constant 0 : i32
    return %c0_i32, %c0_i32_0 : i32, i32
  }
  func.func @transform_3(%arg0: i32) -> (i32, i32) {
    %c0_i32 = arith.constant 0 : i32
    %c0_i32_0 = arith.constant 0 : i32
    %c0_i32_1 = arith.constant 0 : i32
    return %c0_i32, %c0_i32_0 : i32, i32
  }
  func.func @transform_4(%arg0: i32) -> (i32, i32) {
    %c0_i32 = arith.constant 0 : i32
    %c0_i32_0 = arith.constant 0 : i32
    %c0_i32_1 = arith.constant 0 : i32
    return %c0_i32, %c0_i32_0 : i32, i32
  }
  func.func @transform_5(%arg0: i32) -> (i32, i32) {
    %c0_i32 = arith.constant 0 : i32
    %c0_i32_0 = arith.constant 0 : i32
    %c0_i32_1 = arith.constant 0 : i32
    return %c0_i32, %c0_i32_0 : i32, i32
  }
  func.func @transform_6(%arg0: i32) -> (i32, i32) {
    %c0_i32 = arith.constant 0 : i32
    %c0_i32_0 = arith.constant 0 : i32
    %c0_i32_1 = arith.constant 0 : i32
    return %c0_i32, %c0_i32_0 : i32, i32
  }
  func.func @transform_7(%arg0: i32) -> (i32, i32) {
    %c0_i32 = arith.constant 0 : i32
    %c0_i32_0 = arith.constant 0 : i32
    %c0_i32_1 = arith.constant 0 : i32
    return %c0_i32, %c0_i32_0 : i32, i32
  }
  func.func @transform_8(%arg0: i32) -> (i32, i32) {
    %c0_i32 = arith.constant 0 : i32
    %c0_i32_0 = arith.constant 0 : i32
    %c0_i32_1 = arith.constant 0 : i32
    return %c0_i32, %c0_i32_0 : i32, i32
  }
  func.func @transform_9(%arg0: i32) -> (i32, i32, i32) {
    %c0_i32 = arith.constant 0 : i32
    %c0_i32_0 = arith.constant 0 : i32
    %c0_i32_1 = arith.constant 0 : i32
    return %arg0, %c0_i32, %c0_i32_0 : i32, i32, i32
  }
}

</mosaic_0001>

<bundles_post_ra>
// kernel: small_conv_forward.1
= control target key start
LH: loop header
LB: loop body
LE: loop exit
PB: predicated region body
PF: predicated region fallthrough
CT: control target
= control target key end

     0   :  { %14 = vsyncpa [#allocation4], 0  ;;  %s11934_s0 = inlined_call_operand.vmem [shape: bf16[2,144,128], index: 0, kind: input, shape index: {}]   ;;  %s11935_s1 = inlined_call_operand.vmem [shape: bf16[128,512], index: 1, kind: input, shape index: {}]   ;;  %s11936_s2 = inlined_call_operand.vmem [shape: f32[1,128], index: 2, kind: input, shape index: {}]   ;;  %s11937_s3 = inlined_call_operand.vmem [shape: bf16[3200,128], index: 3, kind: input, shape index: {}]   ;;  %s11938_s4 = inlined_call_operand.vmem [shape: f32[1,128], index: 4, kind: input, shape index: {}]   ;;  %s11939_s5 = inlined_call_operand.vmem [shape: bf16[2048,64], index: 5, kind: input, shape index: {}]   ;;  %s11940_s6 = inlined_call_operand.vmem [shape: f32[1,64], index: 6, kind: input, shape index: {}]   ;;  %s11941_s7 = inlined_call_operand.vmem [shape: bf16[64,128], index: 7, kind: input, shape index: {}]   ;;  %s11942_s8 = inlined_call_operand.vmem [shape: f32[1,128], index: 8, kind: input, shape index: {}]   ;;  %s11943_s9 = inlined_call_operand.hbm [shape: f32[2,1,128], index: 9, kind: output, shape index: {}]  }
   0x1   :  { %16 = vsyncpa [#allocation4 + $0x1], 0  ;;  %s9011_s30 = smov 0   ;;  %s9013_s10 = smov 0  }
   0x2   :  { %s9015_s11 = smov 0   ;;  %s9017_s12 = smov 0  }
   0x3 LB: > { %s9032_s13 = sadd.s32 4294967295, %s8954_s12   ;;  %s7001_s14 = sadd.s32 4294967294, %s8954_s12   ;;  %s8954_s12 = sphi %s9017_s12, %s12097_s12   ;;  %s8950_s11 = sphi %s9015_s11, %s12096_s11   ;;  %s8946_s10 = sphi %s9013_s10, %s12095_s10   ;;  %s8942_s30 = sphi %s9011_s30, %s12094_s30  }
   0x4   : > { %s9036_s15 = sadd.s32 1, %s8954_s12   ;;  %s223_s16 = sadd.s32 1, %s8950_s11 }
   0x5   : > { %s220_s17 = ssub.s32 %s8954_s12, %s9036_s15  ;;  %p233_p0 = scmp.ne.s32.totalorder %s8950_s11, %s8946_s10 }
   0x6   : > { %p221_p1 = scmp.eq.s32.totalorder %s220_s17, 0  ;;  %p234_p2 = scmp.eq.s32.totalorder %s9032_s13, 1 }
   0x7   : > { %p239_p3 = scmp.ne.s32.totalorder %s8946_s10, %s8942_s30  ;;  %p240_p4 = scmp.eq.s32.totalorder %s7001_s14, 1 }
   0x8   : > { %s9047_s18 = scalar_select %p221_p1, %s8950_s11, %s223_s16  }
   0x9   : > { %p9049_p5 = por %p234_p2, %p233_p0  ;;  %p9053_p6 = por %p240_p4, %p239_p3 }
   0xa   : > { %p7004_p7 = scmp.ge.s32.totalorder %s8954_s12, 1  ;;  %p290_p8 = scmp.lt.s32.totalorder %s8954_s12, 3 }
   0xc   : > { %p291_p9 = pnand %p7004_p7, %p290_p8 }
   0xe   : > { %294 = sbr.rel (%p291_p9) target bundleno = 1656 (0x678), region = 56 }
  0x13   : > { %v8463_v0 = vld [vmem:[%s11935_s1 + $0xe4] ss:$16 sps:$4 sm:$0xff]   ;;  %v8465_v1 = vld [vmem:[%s11935_s1 + $0xec] ss:$16 sps:$4 sm:$0xff]   ;;  %v8956_v2 = vmov 0   ;;  %p325_p10 = scmp.lt.s32.totalorder %s9032_s13, 1 }
  0x14   : > { %627 = vmatprep.mubr.bf16.mxu0 %v8956_v2  ;;  %1028 = vst [vmem:[#allocation2 + $0x48] sm:$0xf] %v8956_v2  ;;  %750 = vmatprep.mubr.bf16.mxu1 %v8956_v2  ;;  %v8467_v3 = vld [vmem:[%s11935_s1 + $0xe0] ss:$16 sps:$4 sm:$0xff]   ;;  %v8468_v4 = vld [vmem:[%s11935_s1 + $0xe8] ss:$16 sps:$4 sm:$0xff]  }
  0x15   : > { %595 = vmatprep.subr.bf16.mxu0 %v8463_v0  ;;  %718 = vmatprep.subr.bf16.mxu1 %v8465_v1  ;;  %v8469_v5 = vld [vmem:[%s11935_s1 + $0xc4] ss:$16 sps:$4 sm:$0xff]   ;;  %v8471_v6 = vld [vmem:[%s11935_s1 + $0xcc] ss:$16 sps:$4 sm:$0xff]   ;;  %v8473_v7 = vld [vmem:[%s11935_s1 + $0xc0] ss:$16 sps:$4 sm:$0xff]  }
  0x16   : > { %596 = vmatpush1.bf16.msra.mxu0 %v8467_v3  ;;  %719 = vmatpush1.bf16.msra.mxu1 %v8468_v4  ;;  %v8474_v8 = vld [vmem:[%s11935_s1 + $0xc8] ss:$16 sps:$4 sm:$0xff]   ;;  %v8475_v9 = vld [vmem:[%s11935_s1 + $0xa4] ss:$16 sps:$4 sm:$0xff]   ;;  %v8477_v10 = vld [vmem:[%s11935_s1 + $0xac] ss:$16 sps:$4 sm:$0xff]  }
  0x17   : > { %597 = vmatprep.subr.bf16.mxu0 %v8469_v5  ;;  %720 = vmatprep.subr.bf16.mxu1 %v8471_v6  ;;  %v8479_v11 = vld [vmem:[%s11935_s1 + $0xa0] ss:$16 sps:$4 sm:$0xff]   ;;  %v8480_v12 = vld [vmem:[%s11935_s1 + $0xa8] ss:$16 sps:$4 sm:$0xff]   ;;  %v8481_v13 = vld [vmem:[%s11935_s1 + $0x84] ss:$16 sps:$4 sm:$0xff]  }
  0x18   : > { %v8483_v14 = vld [vmem:[%s11935_s1 + $0x8c] ss:$16 sps:$4 sm:$0xff]   ;;  %v8485_v15 = vld [vmem:[%s11935_s1 + $0x80] ss:$16 sps:$4 sm:$0xff]   ;;  %v8486_v16 = vld [vmem:[%s11935_s1 + $0x88] ss:$16 sps:$4 sm:$0xff]  }
  0x19   : > { %v8487_v17 = vld [vmem:[%s11935_s1 + $0x64] ss:$16 sps:$4 sm:$0xff]   ;;  %s326_s16 = scalar_select %p325_p10, %s9032_s13, 1  ;;  %v8489_v18 = vld [vmem:[%s11935_s1 + $0x6c] ss:$16 sps:$4 sm:$0xff]   ;;  %vm1169_vm1 = vcmask 1046528  }
  0x1a   : > { %598 = vmatpush1.bf16.msra.mxu0 %v8473_v7  ;;  %721 = vmatpush1.bf16.msra.mxu1 %v8474_v8  ;;  %v8491_v19 = vld [vmem:[%s11935_s1 + $0x60] ss:$16 sps:$4 sm:$0xff]   ;;  %v8492_v20 = vld [vmem:[%s11935_s1 + $0x68] ss:$16 sps:$4 sm:$0xff]   ;;  %v8493_v21 = vld [vmem:[%s11935_s1 + $0x44] ss:$16 sps:$4 sm:$0xff]  }
  0x1b   : > { %599 = vmatprep.subr.bf16.mxu0 %v8475_v9  ;;  %722 = vmatprep.subr.bf16.mxu1 %v8477_v10  ;;  %s8419_s28 = smul.u32 72, %s326_s16  ;;  %v8495_v22 = vld [vmem:[%s11935_s1 + $0x4c] ss:$16 sps:$4 sm:$0xff]   ;;  %v8497_v23 = vld [vmem:[%s11935_s1 + $0x40] ss:$16 sps:$4 sm:$0xff]   ;;  %vm1239_vm3 = vcmask 1045504  }
  0x1c   : > { %v8498_v24 = vld [vmem:[%s11935_s1 + $0x48] ss:$16 sps:$4 sm:$0xff]   ;;  %v8499_v25 = vld [vmem:[%s11935_s1 + $0x24] ss:$16 sps:$4 sm:$0xff]   ;;  %v8501_v26 = vld [vmem:[%s11935_s1 + $0x2c] ss:$16 sps:$4 sm:$0xff]  }
  0x1d   : > { %s9142_s27 = scalar_lea.vmem %s11934_s0, %s8419_s28  ;;  %v8503_v27 = vld [vmem:[%s11935_s1 + $0x20] ss:$16 sps:$4 sm:$0xff]   ;;  %v8504_v28 = vld [vmem:[%s11935_s1 + $0x28] ss:$16 sps:$4 sm:$0xff]   ;;  %v8505_v29 = vld [vmem:[%s11935_s1 + $0x4] ss:$16 sps:$4 sm:$0xff]  }
  0x1e   : > { %600 = vmatpush1.bf16.msra.mxu0 %v8479_v11  ;;  %723 = vmatpush1.bf16.msra.mxu1 %v8480_v12  ;;  %v8507_v30 = vld [vmem:[%s11935_s1 + $0xc] ss:$16 sps:$4 sm:$0xff]   ;;  %v8509_v31 = vld [vmem:[%s11935_s1] ss:$16 sps:$4 sm:$0xff]   ;;  %v8510_v32 = vld [vmem:[%s11935_s1 + $0x8] ss:$16 sps:$4 sm:$0xff]  }
  0x1f   : > { %601 = vmatprep.subr.bf16.mxu0 %v8481_v13  ;;  %724 = vmatprep.subr.bf16.mxu1 %v8483_v14  ;;  %v8511_v33 = vld [vmem:[%s9142_s27] sm:$0xff]   ;;  %v8520_v34 = vld [vmem:[%s11937_s3 + $0x78] sm:$0xff]   ;;  %v8522_v36 = vld [vmem:[%s11937_s3 + $0x70] sm:$0xff]   ;;  %vm1107_vm0 = vsmask.f32 7424  ;;  %vm1366_vm4 = vcmask 1044480  }
  0x20   : > { %v8521_v35 = vld [vmem:[%s11937_s3 + $0x38] sm:$0xff]   ;;  %v8512_v37 = vld [vmem:[%s9142_s27 + $0x8] sm:$0xff]   ;;  %v8523_v38 = vld [vmem:[%s11937_s3 + $0x30] sm:$0xff]   ;;  %vm1192_vm2 = vsmask.f32 6400  ;;  %vm1694_vm8 = vcmask 1041408  }
  0x21   : > { %v8524_v39 = vld [vmem:[%s11937_s3 + $0x68] sm:$0xff]   ;;  %v8526_v41 = vld [vmem:[%s11937_s3 + $0x60] sm:$0xff]   ;;  %v8513_v43 = vld [vmem:[%s9142_s27 + $0x10] sm:$0xff]   ;;  %vm1294_vm5 = vsmask.f32 5376  ;;  %vm1752_vm9 = vcmask 1040384  }
  0x22   : > { %602 = vmatpush1.bf16.msra.mxu0 %v8485_v15  ;;  %725 = vmatpush1.bf16.msra.mxu1 %v8486_v16  ;;  %v8525_v40 = vld [vmem:[%s11937_s3 + $0x28] sm:$0xff]   ;;  %v8527_v42 = vld [vmem:[%s11937_s3 + $0x20] sm:$0xff]   ;;  %v8514_v44 = vld [vmem:[%s9142_s27 + $0x18] sm:$0xff]   ;;  %vm1631_vm6 = vsmask.f32 2304  ;;  %vm5416_vm12 = vcmask 1041409  }
  0x23   : > { %603 = vmatprep.subr.bf16.mxu0 %v8487_v17  ;;  %726 = vmatprep.subr.bf16.mxu1 %v8489_v18  ;;  %v8515_v45 = vld [vmem:[%s9142_s27 + $0x20] sm:$0xff]   ;;  %v8516_v46 = vld [vmem:[%s9142_s27 + $0x28] sm:$0xff]   ;;  %v8517_v47 = vld [vmem:[%s9142_s27 + $0x30] sm:$0xff]   ;;  %vm1389_vm7 = vsmask.f32 4352  ;;  %vm5419_vm13 = vcmask 1042434  }
  0x24   : > { %v8518_v48 = vld [vmem:[%s9142_s27 + $0x38] sm:$0xff]   ;;  %v8519_v49 = vld [vmem:[%s9142_s27 + $0x40] sm:$0xff]   ;;  %v8534_v54 = vld [vmem:[%s11937_s3 + $0xf0] sm:$0xff]   ;;  %vm1711_vm10 = vsmask.f32 1280  ;;  %vm5422_vm14 = vcmask 1043459  }
  0x25   : > { %v8528_v50 = vld [vmem:[%s11937_s3 + $0x58] sm:$0xff]   ;;  %v8535_v55 = vld [vmem:[%s11937_s3 + $0xb0] sm:$0xff]   ;;  %v8536_v57 = vld [vmem:[%s11937_s3 + $0xe8] sm:$0xff]   ;;  %vm1769_vm11 = vsmask.f32 256  ;;  %s323_s27 = sand.u32 1, %s8946_s10  }
  0x26   : > { %604 = vmatpush1.bf16.msra.mxu0 %v8491_v19  ;;  %727 = vmatpush1.bf16.msra.mxu1 %v8492_v20  ;;  %v8529_v51 = vld [vmem:[%s11937_s3 + $0x18] sm:$0xff]   ;;  %v8532_v56 = vld [vmem:[%s11937_s3 + $0x50] sm:$0xff]   ;;  %v8537_v58 = vld [vmem:[%s11937_s3 + $0xa8] sm:$0xff]   ;;  %s7486_s23 = sshll.u32 %s9032_s13, 4  ;;  %s324_s24 = scalar_lea.vmem [#allocation3], %s323_s27 }
  0x27   : > { %605 = vmatprep.subr.bf16.mxu0 %v8493_v21  ;;  %728 = vmatprep.subr.bf16.mxu1 %v8495_v22  ;;  %v8530_v52 = vld [vmem:[%s11937_s3 + $0xf8] sm:$0xff]   ;;  %v8540_v59 = vld [vmem:[%s11937_s3 + $0xe0] sm:$0xff]   ;;  %v8533_v61 = vld [vmem:[%s11937_s3 + $0x10] sm:$0xff]   ;;  %s6946_s28 = sshll.u32 %s324_s24, 4  ;;  %s11898_s26 = scalar_lea.hbm %s11943_s9, %s7486_s23  ;;  %s6947_s28 = int_to_ptr.vmem [resolvable:$true] %s6946_s28 }
  0x28   : > { %v8531_v53 = vld [vmem:[%s11937_s3 + $0xb8] sm:$0xff]   ;;  %v8541_v60 = vld [vmem:[%s11937_s3 + $0xa0] sm:$0xff]   ;;  %v8545_v0 = vld [vmem:[%s11937_s3 + $0xd0] sm:$0xff]   ;;  %s6934_s29 = scalar_lea.sflag [#allocation4], %s323_s27  ;;  %s8894_s14 = scalar_lea.vmem %s6947_s28, 16 }
  0x29   : > { %v8542_v62 = vld [vmem:[%s11937_s3 + $0xd8] sm:$0xff]   ;;  %v8547_v1 = vld [vmem:[%s11937_s3 + $0x90] sm:$0xff]   ;;  %v8539_v3 = vld [vmem:[%s11937_s3 + $0x8] sm:$0xff]   ;;  %p8895_p11 = scmp.ne.s32.totalorder %s6947_s28, %s8894_s14  ;;  %s8960_s17 = smov [#allocation3]  }
  0x2a   : > { %606 = vmatpush1.bf16.msra.mxu0 %v8497_v23  ;;  %729 = vmatpush1.bf16.msra.mxu1 %v8498_v24  ;;  %v8543_v63 = vld [vmem:[%s11937_s3 + $0x98] sm:$0xff]   ;;  %v8548_v4 = vld [vmem:[%s11937_s3 + $0xc8] sm:$0xff]   ;;  %v8544_v6 = vld [vmem:[%s11937_s3 + $0x40] sm:$0xff]   ;;  %s8898_s13 = sshll.u32 %s8960_s17, 4  ;;  %s8899_s13 = int_to_ptr.vmem [resolvable:$false] %s8898_s13 }
  0x2b   : > { %607 = vmatprep.subr.bf16.mxu0 %v8499_v25  ;;  %730 = vmatprep.subr.bf16.mxu1 %v8501_v26  ;;  %v8549_v5 = vld [vmem:[%s11937_s3 + $0x88] sm:$0xff]   ;;  %v8546_v7 = vld [vmem:[%s11937_s3] sm:$0xff]   ;;  %v8555_v10 = vld [vmem:[%s11937_s3 + $0x178] sm:$0xff]   ;;  %p8896_p12 = pnand %p8895_p11, %p9049_p5  ;;  %s8900_s21 = scalar_lea.vmem %s8899_s13, 32 }
  0x2c   : > { %v8551_v8 = vld [vmem:[%s11937_s3 + $0xc0] sm:$0xff]   ;;  %v8568_v11 = vld [vmem:[%s11937_s3 + $0x1f8] sm:$0xff]   ;;  %vm11512_vm15 = vmpackc.low %vm1752_vm9, %vm1752_vm9  ;;  %p8901_p0 = scmp.lt.s32.totalorder %s6947_s28, %s8899_s13  ;;  %p8902_p1 = scmp.lt.s32.totalorder %s8900_s21, %s8894_s14 }
  0x2d   : > { %v8554_v9 = vld [vmem:[%s11937_s3 + $0x80] sm:$0xff]   ;;  %p8897_p13 = pneg %p8896_p12 }
  0x2e   : > { %608 = vmatpush1.bf16.msra.mxu0 %v8503_v27  ;;  %731 = vmatpush1.bf16.msra.mxu1 %v8504_v28  ;;  %v9295_v21 = vld [vmem:[%s11936_s2] ss:$0 sm:$0xff]  ;;  %p8903_p2 = por %p8902_p1, %p8901_p0 }
  0x2f   : > { %609 = vmatprep.subr.bf16.mxu0 %v8505_v29  ;;  %732 = vmatprep.subr.bf16.mxu1 %v8507_v30 }
  0x30   : > { %p8904_p3 = pnand %p8903_p2, %p8897_p13 }
  0x32   : > { %610 = vmatpush1.bf16.msra.mxu0 %v8509_v31  ;;  %733 = vmatpush1.bf16.msra.mxu1 %v8510_v32 }
  0x33   : > { %7560 = vmatprep.subr.bf16.mxu0 %v8520_v34  ;;  %7612 = vmatprep.subr.bf16.mxu1 %v8530_v52 }
  0x35   : > { %628 = vmatmul.mubr.bf16.vlgmr.msra.gmra.mxu0 %v8511_v33  ;;  %751 = vmatmul.mubr.bf16.vlgmr.msra.gmra.mxu1 %v8511_v33 }
  0x36   : > { %637 = vmatprep.mubr.bf16.mxu0 %v8956_v2  ;;  %760 = vmatprep.mubr.bf16.mxu1 %v8956_v2 }
  0x37   : > { %7561 = vmatpush3.bf16.msra.mxu0 %v8521_v35  ;;  %7613 = vmatpush3.bf16.msra.mxu1 %v8531_v53 }
  0x38   : > { %7562 = vmatprep.subr.bf16.mxu0 %v8522_v36  ;;  %7614 = vmatprep.subr.bf16.mxu1 %v8534_v54 }
  0x3b   : > { %7563 = vmatpush3.bf16.msra.mxu0 %v8523_v38  ;;  %7615 = vmatpush3.bf16.msra.mxu1 %v8535_v55 }
  0x3c   : > { %7564 = vmatprep.subr.bf16.mxu0 %v8524_v39  ;;  %7616 = vmatprep.subr.bf16.mxu1 %v8536_v57 }
  0x3d   : > { %638 = vmatmul.mubr.bf16.gmra.mxu0 %v8512_v37  ;;  %761 = vmatmul.mubr.bf16.gmra.mxu1 %v8512_v37 }
  0x3e   : > { %647 = vmatprep.mubr.bf16.mxu0 %v8956_v2  ;;  %770 = vmatprep.mubr.bf16.mxu1 %v8956_v2 }
  0x3f   : > { %7565 = vmatpush3.bf16.msra.mxu0 %v8525_v40  ;;  %7617 = vmatpush3.bf16.msra.mxu1 %v8537_v58 }
  0x40   : > { %7566 = vmatprep.subr.bf16.mxu0 %v8526_v41  ;;  %7618 = vmatprep.subr.bf16.mxu1 %v8540_v59 }
  0x43   : > { %7567 = vmatpush3.bf16.msra.mxu0 %v8527_v42  ;;  %7619 = vmatpush3.bf16.msra.mxu1 %v8541_v60 }
  0x44   : > { %7568 = vmatprep.subr.bf16.mxu0 %v8528_v50  ;;  %7620 = vmatprep.subr.bf16.mxu1 %v8542_v62 }
  0x45   : > { %648 = vmatmul.mubr.bf16.gmra.mxu0 %v8513_v43  ;;  %771 = vmatmul.mubr.bf16.gmra.mxu1 %v8513_v43 }
  0x46   : > { %657 = vmatprep.mubr.bf16.mxu0 %v8956_v2  ;;  %780 = vmatprep.mubr.bf16.mxu1 %v8956_v2 }
  0x47   : > { %7569 = vmatpush3.bf16.msra.mxu0 %v8529_v51  ;;  %7621 = vmatpush3.bf16.msra.mxu1 %v8543_v63 }
  0x48   : > { %7570 = vmatprep.subr.bf16.mxu0 %v8532_v56  ;;  %7622 = vmatprep.subr.bf16.mxu1 %v8545_v0 }
  0x4b   : > { %7571 = vmatpush3.bf16.msra.mxu0 %v8533_v61  ;;  %7623 = vmatpush3.bf16.msra.mxu1 %v8547_v1 }
  0x4c   : > { %7624 = vmatprep.subr.bf16.mxu1 %v8548_v4 }
  0x4d   : > { %658 = vmatmul.mubr.bf16.gmra.mxu0 %v8514_v44  ;;  %781 = vmatmul.mubr.bf16.gmra.mxu1 %v8514_v44 }
  0x4e   : > { %667 = vmatprep.mubr.bf16.mxu0 %v8956_v2  ;;  %790 = vmatprep.mubr.bf16.mxu1 %v8956_v2 }
  0x4f   : > { %7625 = vmatpush3.bf16.msra.mxu1 %v8549_v5 }
  0x50   : > { %7626 = vmatprep.subr.bf16.mxu1 %v8551_v8 }
  0x53   : > { %7627 = vmatpush3.bf16.msra.mxu1 %v8554_v9 }
  0x54   : > { %7716 = vmatprep.subr.bf16.mxu1 %v8568_v11 }
  0x55   : > { %668 = vmatmul.mubr.bf16.gmra.mxu0 %v8515_v45  ;;  %791 = vmatmul.mubr.bf16.gmra.mxu1 %v8515_v45 }
  0x56   : > { %677 = vmatprep.mubr.bf16.mxu0 %v8956_v2  ;;  %800 = vmatprep.mubr.bf16.mxu1 %v8956_v2 }
  0x5d   : > { %678 = vmatmul.mubr.bf16.gmra.mxu0 %v8516_v46  ;;  %801 = vmatmul.mubr.bf16.gmra.mxu1 %v8516_v46 }
  0x5e   : > { %687 = vmatprep.mubr.bf16.mxu0 %v8956_v2  ;;  %810 = vmatprep.mubr.bf16.mxu1 %v8956_v2 }
  0x65   : > { %688 = vmatmul.mubr.bf16.gmra.mxu0 %v8517_v47  ;;  %811 = vmatmul.mubr.bf16.gmra.mxu1 %v8517_v47 }
  0x66   : > { %697 = vmatprep.mubr.bf16.mxu0 %v8956_v2  ;;  %820 = vmatprep.mubr.bf16.mxu1 %v8956_v2 }
  0x6d   : > { %698 = vmatmul.mubr.bf16.gmra.mxu0 %v8518_v48  ;;  %821 = vmatmul.mubr.bf16.gmra.mxu1 %v8518_v48 }
  0x6e   : > { %707 = vmatprep.mubr.bf16.mxu0 %v8956_v2  ;;  %830 = vmatprep.mubr.bf16.mxu1 %v8956_v2  ;;  %v8538_v2 = vld [vmem:[%s11937_s3 + $0x48] sm:$0xff]  }
  0x6f   : > { %7572 = vmatprep.subr.bf16.mxu0 %v8538_v2 }
  0x70   : > { %7573 = vmatpush3.bf16.msra.mxu0 %v8539_v3 }
  0x71   : > { %7574 = vmatprep.subr.bf16.mxu0 %v8544_v6 }
  0x74   : > { %7575 = vmatpush3.bf16.msra.mxu0 %v8546_v7 }
  0x75   : > { %708 = vmatmul.mubr.bf16.gmra.mxu0 %v8519_v49  ;;  %831 = vmatmul.mubr.bf16.gmra.mxu1 %v8519_v49 }
  0x76   : > { %7664 = vmatprep.subr.bf16.mxu0 %v8555_v10 }
  0xf5   : > { %v629_v12 = vpop.f32.mrf.mxu0  ;;  %v752_v13 = vpop.f32.mrf.mxu1 }
  0xf7   : > { %v631_v14 = vpop.f32.mrf.mxu0  ;;  %v754_v15 = vpop.f32.mrf.mxu1 }
  0xf8   : > { %v841_v16 = vmax.f32 %v629_v12, %v631_v14  ;;  %v859_v17 = vmax.f32 %v752_v13, %v754_v15 }
  0xf9   : > { %v633_v18 = vpop.f32.mrf.mxu0  ;;  %v756_v19 = vpop.f32.mrf.mxu1 }
  0xfa   : > { %v877_v20 = vmax.f32 %v841_v16, %v859_v17 }
  0xfb   : > { %v635_v22 = vpop.f32.mrf.mxu0  ;;  %v758_v23 = vpop.f32.mrf.mxu1 }
  0xfc   : > { %v842_v24 = vmax.f32 %v633_v18, %v635_v22  ;;  %v860_v25 = vmax.f32 %v756_v19, %v758_v23  ;;  %v902_v28 = vadd.f32 %v9295_v21, %v877_v20 }
  0xfd   : > { %v639_v26 = vpop.f32.mrf.mxu0  ;;  %v762_v27 = vpop.f32.mrf.mxu1 }
  0xfe   : > { %v878_v29 = vmax.f32 %v842_v24, %v860_v25  ;;  %v920_v37 = vmax.f32 %v902_v28, 0.0 }
  0xff   : > { %v641_v30 = vpop.f32.mrf.mxu0  ;;  %v764_v31 = vpop.f32.mrf.mxu1 }
 0x100   : > { %v903_v32 = vadd.f32 %v9295_v21, %v878_v29  ;;  %v843_v33 = vmax.f32 %v639_v26, %v641_v30  ;;  %v861_v34 = vmax.f32 %v762_v27, %v764_v31 }
 0x101   : > { %v643_v35 = vpop.f32.mrf.mxu0  ;;  %v766_v36 = vpop.f32.mrf.mxu1 }
 0x102   : > { %v921_v38 = vmax.f32 %v903_v32, 0.0  ;;  %v879_v39 = vmax.f32 %v843_v33, %v861_v34 }
 0x103   : > { %v645_v40 = vpop.f32.mrf.mxu0  ;;  %v768_v41 = vpop.f32.mrf.mxu1 }
 0x104   : > { %v7510_v42 = vpack.c.bf16 %v921_v38, %v920_v37  ;;  %v844_v43 = vmax.f32 %v643_v35, %v645_v40  ;;  %v862_v44 = vmax.f32 %v766_v36, %v768_v41  ;;  %v904_v47 = vadd.f32 %v9295_v21, %v879_v39 }
 0x105   : > { %v649_v45 = vpop.f32.mrf.mxu0  ;;  %v772_v46 = vpop.f32.mrf.mxu1 }
 0x106   : > { %7511 = vst [vmem:[#allocation2] sm:$0xff] %v7510_v42   ;;  %v880_v48 = vmax.f32 %v844_v43, %v862_v44  ;;  %v922_v56 = vmax.f32 %v904_v47, 0.0 }
 0x107   : > { %v651_v49 = vpop.f32.mrf.mxu0  ;;  %v774_v50 = vpop.f32.mrf.mxu1 }
 0x108   : > { %v905_v51 = vadd.f32 %v9295_v21, %v880_v48  ;;  %v845_v52 = vmax.f32 %v649_v45, %v651_v49  ;;  %v863_v53 = vmax.f32 %v772_v46, %v774_v50 }
 0x109   : > { %v653_v54 = vpop.f32.mrf.mxu0  ;;  %v776_v55 = vpop.f32.mrf.mxu1 }
 0x10a   : > { %v923_v57 = vmax.f32 %v905_v51, 0.0  ;;  %v881_v58 = vmax.f32 %v845_v52, %v863_v53 }
 0x10b   : > { %v655_v59 = vpop.f32.mrf.mxu0  ;;  %v778_v60 = vpop.f32.mrf.mxu1 }
 0x10c   : > { %v7515_v61 = vpack.c.bf16 %v923_v57, %v922_v56  ;;  %v846_v62 = vmax.f32 %v653_v54, %v655_v59  ;;  %v864_v63 = vmax.f32 %v776_v55, %v778_v60  ;;  %v906_v0 = vadd.f32 %v9295_v21, %v881_v58 }
 0x10d   : > { %v659_v1 = vpop.f32.mrf.mxu0  ;;  %v782_v2 = vpop.f32.mrf.mxu1  ;;  %v1030_v3 = vld [vmem:[#allocation2] sm:$0xf]  ;;  %v9302_v4 = vld [vmem:[#allocation2 + $0x4] sm:$0xf] }
 0x10e   : > { %7552 = vst [vmem:[#allocation2 + $0x8] sm:$0xff] %v7515_v61   ;;  %v882_v5 = vmax.f32 %v846_v62, %v864_v63  ;;  %v9305_v6 = vcombine.low %v1030_v3, %v9302_v4  ;;  %v1043_v7 = vld [vmem:[#allocation2] sm:$0xe]  ;;  %v924_v13 = vmax.f32 %v906_v0, 0.0  ;;  %v8556_v61 = vld [vmem:[%s11937_s3 + $0x138] sm:$0xff]  }
 0x10f   : > { %v661_v8 = vpop.f32.mrf.mxu0  ;;  %v784_v9 = vpop.f32.mrf.mxu1  ;;  %v9309_v16 = vcombine.low %v1043_v7, %v9302_v4  ;;  %v8559_v7 = vld [vmem:[%s11937_s3 + $0x170] sm:$0xff]  }
 0x110   : > { %v907_v10 = vadd.f32 %v9295_v21, %v882_v5  ;;  %v847_v11 = vmax.f32 %v659_v1, %v661_v8  ;;  %v865_v12 = vmax.f32 %v782_v2, %v784_v9  ;;  %v1111_v19 = vshll.u32 %v9305_v6, 16 }
 0x111   : > { %v663_v14 = vpop.f32.mrf.mxu0  ;;  %v786_v15 = vpop.f32.mrf.mxu1  ;;  %v1194_v31 = vshrl.u32 %v9309_v16, 16  ;;  %v1197_v32 = vshll.u32 %v9309_v16, 16  ;;  %v1109_v35 = vshrl.u32 %v9305_v6, 16  ;;  %v1170_v62 = vrot.slane %v9309_v16, 1 }
 0x112   : > { %v925_v17 = vmax.f32 %v907_v10, 0.0  ;;  %v883_v18 = vmax.f32 %v847_v11, %v865_v12  ;;  %v1113_v36 = vrot.slane %v1111_v19, 1  ;;  %v8569_v12 = vld [vmem:[%s11937_s3 + $0x1b8] sm:$0xff]  }
 0x113   : > { %v665_v20 = vpop.f32.mrf.mxu0  ;;  %v788_v22 = vpop.f32.mrf.mxu1  ;;  %v1196_v47 = vrot.slane %v1194_v31, 1  ;;  %v1199_v48 = vrot.slane %v1197_v32, 2 }
 0x114   : > { %v7520_v23 = vpack.c.bf16 %v925_v17, %v924_v13  ;;  %v848_v24 = vmax.f32 %v663_v14, %v665_v20  ;;  %v866_v25 = vmax.f32 %v786_v15, %v788_v22  ;;  %v908_v26 = vadd.f32 %v9295_v21, %v883_v18  ;;  %v8570_v17 = vld [vmem:[%s11937_s3 + $0x1f0] sm:$0xff]  }
 0x115   : > { %v669_v27 = vpop.f32.mrf.mxu0  ;;  %v792_v28 = vpop.f32.mrf.mxu1  ;;  %v9313_v29 = vld [vmem:[#allocation2 + $0x8] sm:$0xf]  ;;  %v9315_v30 = vld [vmem:[#allocation2 + $0xc] sm:$0xf]  ;;  %v1114_v55 = vor.u32 %v1113_v36, %v1109_v35  ;;  %v1200_v3 = vor.u32 %v1199_v48, %v1196_v47 }
 0x116   : > { %7553 = vst [vmem:[#allocation2 + $0x10] sm:$0xff] %v7520_v23   ;;  %v884_v33 = vmax.f32 %v848_v24, %v866_v25  ;;  %v9321_v34 = vcombine.low %v9313_v29, %v9315_v30  ;;  %v926_v43 = vmax.f32 %v908_v26, 0.0  ;;  %v8572_v35 = vld [vmem:[%s11937_s3 + $0x1b0] sm:$0xff]  }
 0x117   : > { %v671_v37 = vpop.f32.mrf.mxu0  ;;  %v794_v38 = vpop.f32.mrf.mxu1 }
 0x118   : > { %v909_v39 = vadd.f32 %v9295_v21, %v884_v33  ;;  %v849_v40 = vmax.f32 %v669_v27, %v671_v37  ;;  %v867_v41 = vmax.f32 %v792_v28, %v794_v38  ;;  %v1116_v42 = vshll.u32 %v9321_v34, 16  ;;  %v8562_v27 = vld [vmem:[%s11937_s3 + $0x168] sm:$0xff]  }
 0x119   : > { %v673_v44 = vpop.f32.mrf.mxu0  ;;  %v796_v45 = vpop.f32.mrf.mxu1  ;;  %v1120_v46 = vshrl.u32 %v9321_v34, 16  ;;  %v1171_v57 = vrot.slane %v9321_v34, 1 }
 0x11a   : > { %v927_v49 = vmax.f32 %v909_v39, 0.0  ;;  %v885_v50 = vmax.f32 %v849_v40, %v867_v41  ;;  %v1118_v51 = vrot.slane %v1116_v42, 1  ;;  %v1202_v52 = vrot.slane %v1116_v42, 2  ;;  %v8574_v41 = vld [vmem:[%s11937_s3 + $0x1e8] sm:$0xff]  }
 0x11b   : > { %v675_v53 = vpop.f32.mrf.mxu0  ;;  %v798_v54 = vpop.f32.mrf.mxu1  ;;  %v1201_v56 = vrot.slane %v1120_v46, 1  ;;  %v1172_v16 = vsel %vm1169_vm1, %v1170_v62, %v1171_v57  ;;  %v8578_v62 = vld [vmem:[%s11937_s3 + $0x1e0] sm:$0xff]  }
 0x11c   : > { %v7525_v58 = vpack.c.bf16 %v927_v49, %v926_v43  ;;  %v850_v59 = vmax.f32 %v673_v44, %v675_v53  ;;  %v868_v60 = vmax.f32 %v796_v45, %v798_v54  ;;  %v910_v63 = vadd.f32 %v9295_v21, %v885_v50  ;;  %v8563_v45 = vld [vmem:[%s11937_s3 + $0x128] sm:$0xff]   ;;  %v8565_v53 = vld [vmem:[%s11937_s3 + $0x160] sm:$0xff]  }
 0x11d   : > { %v679_v0 = vpop.f32.mrf.mxu0  ;;  %v802_v1 = vpop.f32.mrf.mxu1  ;;  %v1119_v2 = vsel %vm1107_vm0, %v1114_v55, %v1118_v51  ;;  %v9334_v5 = vor.u32 %v1202_v52, %v1201_v56  ;;  %v9339_v8 = vld [vmem:[#allocation2 + $0x10] sm:$0xf]  ;;  %v9341_v9 = vld [vmem:[#allocation2 + $0x14] sm:$0xf]  ;;  %v1122_v38 = vor.u32 %v1120_v46, %v1118_v51  ;;  %v8575_v56 = vld [vmem:[%s11937_s3 + $0x1a8] sm:$0xff]  }
 0x11e   : > { %7554 = vst [vmem:[#allocation2 + $0x18] sm:$0xff] %v7525_v58   ;;  %v886_v10 = vmax.f32 %v850_v59, %v868_v60  ;;  %4014 = vmatprep.mubr.bf16.mxu0 %v1119_v2  ;;  %v9345_v11 = vcombine.low %v9339_v8, %v9341_v9  ;;  %v928_v23 = vmax.f32 %v910_v63, 0.0 }
 0x11f   : > { %4015 = vmatmul.mubr.bf16.vlgmr.msra.gmra.mxu0 %v9305_v6  ;;  %v681_v13 = vpop.f32.mrf.mxu0  ;;  %v804_v14 = vpop.f32.mrf.mxu1  ;;  %v1204_v15 = vsel %vm1192_vm2, %v1200_v3, %v9334_v5  ;;  %v8560_v6 = vld [vmem:[%s11937_s3 + $0x130] sm:$0xff]   ;;  %v8567_v3 = vld [vmem:[%s11937_s3 + $0x120] sm:$0xff]  }
 0x120   : > { %v911_v18 = vadd.f32 %v9295_v21, %v886_v10  ;;  %7665 = vmatpush3.bf16.msra.mxu0 %v8556_v61  ;;  %v851_v19 = vmax.f32 %v679_v0, %v681_v13  ;;  %v869_v20 = vmax.f32 %v802_v1, %v804_v14  ;;  %4095 = vmatprep.mubr.bf16.mxu1 %v1204_v15  ;;  %v1124_v22 = vshll.u32 %v9345_v11, 16 }
 0x121   : > { %4096 = vmatmul.mubr.bf16.vlgmr.msra.gmra.mxu1 %v1172_v16  ;;  %v683_v24 = vpop.f32.mrf.mxu0  ;;  %v806_v25 = vpop.f32.mrf.mxu1  ;;  %7666 = vmatprep.subr.bf16.mxu0 %v8559_v7  ;;  %v1128_v26 = vshrl.u32 %v9345_v11, 16  ;;  %v1173_v40 = vrot.slane %v9345_v11, 1 }
 0x122   : > { %v929_v28 = vmax.f32 %v911_v18, 0.0  ;;  %v887_v31 = vmax.f32 %v851_v19, %v869_v20  ;;  %v1126_v32 = vrot.slane %v1124_v22, 1  ;;  %v1206_v33 = vrot.slane %v1124_v22, 2  ;;  %7717 = vmatpush3.bf16.msra.mxu1 %v8569_v12  ;;  %v8571_v12 = vld [vmem:[%s11937_s3 + $0x158] sm:$0xff]  }
 0x123   : > { %v685_v36 = vpop.f32.mrf.mxu0  ;;  %v808_v37 = vpop.f32.mrf.mxu1  ;;  %v1205_v39 = vrot.slane %v1128_v26, 1  ;;  %7718 = vmatprep.subr.bf16.mxu1 %v8570_v17  ;;  %v1174_v61 = vsel %vm1169_vm1, %v1171_v57, %v1173_v40  ;;  %v8579_v17 = vld [vmem:[%s11937_s3 + $0x1a0] sm:$0xff]  }
 0x124   : > { %v7530_v42 = vpack.c.bf16 %v929_v28, %v928_v23  ;;  %v852_v43 = vmax.f32 %v683_v24, %v685_v36  ;;  %v870_v44 = vmax.f32 %v806_v25, %v808_v37  ;;  %7667 = vmatpush3.bf16.msra.mxu0 %v8560_v6  ;;  %v912_v46 = vadd.f32 %v9295_v21, %v887_v31  ;;  %v8581_v23 = vld [vmem:[%s11937_s3 + $0x1d8] sm:$0xff]  }
 0x125   : > { %v9380_v47 = vld [vmem:[#allocation2 + $0x1c] sm:$0xf]  ;;  %v689_v48 = vpop.f32.mrf.mxu0  ;;  %v812_v49 = vpop.f32.mrf.mxu1  ;;  %v1127_v50 = vsel %vm1107_vm0, %v1122_v38, %v1126_v32  ;;  %v9384_v51 = vor.u32 %v1206_v33, %v1205_v39  ;;  %7668 = vmatprep.subr.bf16.mxu0 %v8562_v27  ;;  %v9386_v52 = vld [vmem:[#allocation2 + $0x18] sm:$0xf]  ;;  %v1130_v20 = vor.u32 %v1128_v26, %v1126_v32  ;;  %v8573_v28 = vld [vmem:[%s11937_s3 + $0x118] sm:$0xff]  }
 0x126   : > { %7555 = vst [vmem:[#allocation2 + $0x20] sm:$0xff] %v7530_v42   ;;  %v888_v54 = vmax.f32 %v852_v43, %v870_v44  ;;  %4022 = vmatprep.mubr.bf16.mxu0 %v1127_v50  ;;  %v9393_v55 = vcombine.low %v9386_v52, %v9380_v47  ;;  %7719 = vmatpush3.bf16.msra.mxu1 %v8572_v35  ;;  %v8576_v38 = vld [vmem:[%s11937_s3 + $0x150] sm:$0xff]   ;;  %v8583_v42 = vld [vmem:[%s11937_s3 + $0x198] sm:$0xff]  }
 0x127   : > { %4023 = vmatmul.mubr.bf16.gmra.mxu0 %v9321_v34  ;;  %v691_v58 = vpop.f32.mrf.mxu0  ;;  %v814_v59 = vpop.f32.mrf.mxu1  ;;  %v1208_v60 = vsel %vm1192_vm2, %v9334_v5, %v9384_v51  ;;  %7720 = vmatprep.subr.bf16.mxu1 %v8574_v41  ;;  %v930_v5 = vmax.f32 %v912_v46, 0.0 }
 0x128   : > { %v913_v63 = vadd.f32 %v9295_v21, %v888_v54  ;;  %v853_v0 = vmax.f32 %v689_v48, %v691_v58  ;;  %v871_v1 = vmax.f32 %v812_v49, %v814_v59  ;;  %4103 = vmatprep.mubr.bf16.mxu1 %v1208_v60  ;;  %7669 = vmatpush3.bf16.msra.mxu0 %v8563_v45  ;;  %v9412_v2 = vshll.u32 %v9393_v55, 16  ;;  %v8585_v48 = vld [vmem:[%s11937_s3 + $0x1d0] sm:$0xff]   ;;  %v8582_v60 = vld [vmem:[%s11937_s3 + $0x148] sm:$0xff]  }
 0x129   : > { %4104 = vmatmul.mubr.bf16.gmra.mxu1 %v1174_v61  ;;  %v693_v57 = vpop.f32.mrf.mxu0  ;;  %v816_v7 = vpop.f32.mrf.mxu1  ;;  %v9418_v10 = vshrl.u32 %v9393_v55, 16  ;;  %7670 = vmatprep.subr.bf16.mxu0 %v8565_v53  ;;  %v9434_v22 = vrot.slane %v9393_v55, 1  ;;  %v8587_v61 = vld [vmem:[%s11937_s3 + $0x190] sm:$0xff]  }
 0x12a   : > { %11986 = vst [vmem:[#allocation6_spill] sm:$0xff] %v9412_v2  ;;  %v931_v13 = vmax.f32 %v913_v63, 0.0  ;;  %v889_v14 = vmax.f32 %v853_v0, %v871_v1  ;;  %v9424_v15 = vrot.slane %v9412_v2, 1  ;;  %v1210_v16 = vrot.slane %v9412_v2, 2  ;;  %7721 = vmatpush3.bf16.msra.mxu1 %v8575_v56 }
 0x12b   : > { %11987 = vst [vmem:[#allocation7_spill] sm:$0xff] %v9418_v10  ;;  %v695_v18 = vpop.f32.mrf.mxu0  ;;  %v818_v19 = vpop.f32.mrf.mxu1  ;;  %v1209_v6 = vrot.slane %v9418_v10, 1  ;;  %7722 = vmatprep.subr.bf16.mxu1 %v8578_v62  ;;  %v1176_v46 = vsel %vm1169_vm1, %v1173_v40, %v9434_v22 }
 0x12c   : > { %11988 = vst [vmem:[#allocation8_spill] sm:$0xff] %v9424_v15  ;;  %v7535_v24 = vpack.c.bf16 %v931_v13, %v930_v5  ;;  %v854_v25 = vmax.f32 %v693_v57, %v695_v18  ;;  %v872_v27 = vmax.f32 %v816_v7, %v818_v19  ;;  %7671 = vmatpush3.bf16.msra.mxu0 %v8567_v3  ;;  %v8593_v3 = vld [vmem:[%s11937_s3 + $0x1c8] sm:$0xff]  }
 0x12d   : > { %v9442_v31 = vld [vmem:[#allocation2 + $0x20] sm:$0xf]  ;;  %v9444_v26 = vld [vmem:[#allocation2 + $0x24] sm:$0xf]  ;;  %v914_v32 = vadd.f32 %v9295_v21, %v889_v14  ;;  %v699_v33 = vpop.f32.mrf.mxu0  ;;  %v822_v35 = vpop.f32.mrf.mxu1  ;;  %v1135_v36 = vsel %vm1107_vm0, %v1130_v20, %v9424_v15  ;;  %v9449_v37 = vor.u32 %v1210_v16, %v1209_v6  ;;  %7672 = vmatprep.subr.bf16.mxu0 %v8571_v12  ;;  %v1138_v7 = vor.u32 %v9418_v10, %v9424_v15 }
 0x12e   : > { %v9456_v39 = vcombine.low %v9442_v31, %v9444_v26  ;;  %7556 = vst [vmem:[#allocation2 + $0x28] sm:$0xff] %v7535_v24   ;;  %v890_v41 = vmax.f32 %v854_v25, %v872_v27  ;;  %4030 = vmatprep.mubr.bf16.mxu0 %v1135_v36  ;;  %7723 = vmatpush3.bf16.msra.mxu1 %v8579_v17  ;;  %v8584_v19 = vld [vmem:[%s11937_s3 + $0x108] sm:$0xff]  }
 0x12f   : > { %4031 = vmatmul.mubr.bf16.gmra.mxu0 %v9345_v11  ;;  %v701_v43 = vpop.f32.mrf.mxu0  ;;  %v824_v44 = vpop.f32.mrf.mxu1  ;;  %v1212_v45 = vsel %vm1192_vm2, %v9384_v51, %v9449_v37  ;;  %7724 = vmatprep.subr.bf16.mxu1 %v8581_v23  ;;  %v8577_v51 = vld [vmem:[%s11937_s3 + $0x110] sm:$0xff]   ;;  %v932_v56 = vmax.f32 %v914_v32, 0.0 }
 0x130   : > { %v915_v49 = vadd.f32 %v9295_v21, %v890_v41  ;;  %v855_v50 = vmax.f32 %v699_v33, %v701_v43  ;;  %v873_v53 = vmax.f32 %v822_v35, %v824_v44  ;;  %4111 = vmatprep.mubr.bf16.mxu1 %v1212_v45  ;;  %v9474_v54 = vshll.u32 %v9456_v39, 16  ;;  %7673 = vmatpush3.bf16.msra.mxu0 %v8573_v28  ;;  %v8589_v28 = vld [vmem:[%s11937_s3 + $0x140] sm:$0xff]   ;;  %v8594_v35 = vld [vmem:[%s11937_s3 + $0x188] sm:$0xff]  }
 0x131   : > { %4112 = vmatmul.mubr.bf16.gmra.mxu1 %v1176_v46  ;;  %v703_v40 = vpop.f32.mrf.mxu0  ;;  %v826_v58 = vpop.f32.mrf.mxu1  ;;  %v9480_v59 = vshrl.u32 %v9456_v39, 16  ;;  %7674 = vmatprep.subr.bf16.mxu0 %v8576_v38  ;;  %v1177_v13 = vrot.slane %v9456_v39, 1  ;;  %v8596_v43 = vld [vmem:[%s11937_s3 + $0x1c0] sm:$0xff]  }
 0x132   : > { %11989 = vst [vmem:[#allocation9_spill] sm:$0xff] %v9474_v54  ;;  %v933_v62 = vmax.f32 %v915_v49, 0.0  ;;  %v891_v63 = vmax.f32 %v855_v50, %v873_v53  ;;  %v1142_v0 = vrot.slane %v9474_v54, 1  ;;  %v1214_v1 = vrot.slane %v9474_v54, 2  ;;  %7725 = vmatpush3.bf16.msra.mxu1 %v8583_v42 }
 0x133   : > { %11990 = vst [vmem:[#allocation10_spill] sm:$0xff] %v9480_v59  ;;  %v705_v5 = vpop.f32.mrf.mxu0  ;;  %v828_v57 = vpop.f32.mrf.mxu1  ;;  %v1213_v12 = vrot.slane %v9480_v59, 1  ;;  %7726 = vmatprep.subr.bf16.mxu1 %v8585_v48  ;;  %v9529_v42 = vsel %vm1169_vm1, %v9434_v22, %v1177_v13 }
 0x134   : > { %v7540_v14 = vpack.c.bf16 %v933_v62, %v932_v56  ;;  %v916_v16 = vadd.f32 %v9295_v21, %v891_v63  ;;  %v856_v17 = vmax.f32 %v703_v40, %v705_v5  ;;  %v874_v18 = vmax.f32 %v826_v58, %v828_v57  ;;  %7675 = vmatpush3.bf16.msra.mxu0 %v8577_v51  ;;  %v8598_v51 = vld [vmem:[%s11937_s3 + $0x278] sm:$0xff]  }
 0x135   : > { %v9501_v20 = vld [vmem:[#allocation2 + $0x28] sm:$0xf]  ;;  %v9503_v6 = vld [vmem:[#allocation2 + $0x2c] sm:$0xf]  ;;  %v709_v23 = vpop.f32.mrf.mxu0  ;;  %v832_v24 = vpop.f32.mrf.mxu1  ;;  %v9506_v25 = vsel %vm1107_vm0, %v1138_v7, %v1142_v0  ;;  %v9508_v27 = vor.u32 %v1214_v1, %v1213_v12  ;;  %7676 = vmatprep.subr.bf16.mxu0 %v8582_v60  ;;  %v8597_v60 = vld [vmem:[%s11937_s3 + $0x180] sm:$0xff]   ;;  %v1146_v63 = vor.u32 %v9480_v59, %v1142_v0 }
 0x136   : > { %v9515_v32 = vcombine.low %v9501_v20, %v9503_v6  ;;  %7557 = vst [vmem:[#allocation2 + $0x30] sm:$0xff] %v7540_v14   ;;  %v892_v33 = vmax.f32 %v856_v17, %v874_v18  ;;  %4038 = vmatprep.mubr.bf16.mxu0 %v9506_v25  ;;  %7727 = vmatpush3.bf16.msra.mxu1 %v8587_v61  ;;  %v934_v44 = vmax.f32 %v916_v16, 0.0  ;;  %v8608_v5 = vld [vmem:[%s11937_s3 + $0x2f8] sm:$0xff]  }
 0x137   : > { %4039 = vmatmul.mubr.bf16.gmra.mxu0 %v9393_v55  ;;  %v711_v36 = vpop.f32.mrf.mxu0  ;;  %v834_v38 = vpop.f32.mrf.mxu1  ;;  %v1216_v41 = vsel %vm1192_vm2, %v9449_v37, %v9508_v27  ;;  %7728 = vmatprep.subr.bf16.mxu1 %v8593_v3  ;;  %v8592_v37 = vld [vmem:[%s11937_s3 + $0x100] sm:$0xff]  }
 0x138   : > { %v917_v45 = vadd.f32 %v9295_v21, %v892_v33  ;;  %v857_v46 = vmax.f32 %v709_v23, %v711_v36  ;;  %v875_v48 = vmax.f32 %v832_v24, %v834_v38  ;;  %4119 = vmatprep.mubr.bf16.mxu1 %v1216_v41  ;;  %7677 = vmatpush3.bf16.msra.mxu0 %v8584_v19  ;;  %v9540_v53 = vshll.u32 %v9515_v32, 16  ;;  %v1046_v24 = vld [vmem:[#allocation2 + $0x4] sm:$0xc] }
 0x139   : > { %4120 = vmatmul.mubr.bf16.gmra.mxu1 %v9529_v42  ;;  %v713_v49 = vpop.f32.mrf.mxu0  ;;  %v836_v50 = vpop.f32.mrf.mxu1  ;;  %7678 = vmatprep.subr.bf16.mxu0 %v8589_v28  ;;  %v9546_v58 = vshrl.u32 %v9515_v32, 16  ;;  %v9564_v18 = vrot.slane %v9515_v32, 1  ;;  %v7076_v41 = vcombine.low %v1046_v24, %v9313_v29 }
 0x13a   : > { %11991 = vst [vmem:[#allocation11_spill] sm:$0xff] %v9540_v53  ;;  %v935_v56 = vmax.f32 %v917_v45, 0.0  ;;  %v893_v40 = vmax.f32 %v857_v46, %v875_v48  ;;  %7729 = vmatpush3.bf16.msra.mxu1 %v8594_v35  ;;  %v1150_v1 = vrot.slane %v9540_v53, 1  ;;  %v1218_v3 = vrot.slane %v9540_v53, 2 }
 0x13b   : > { %11992 = vst [vmem:[#allocation12_spill] sm:$0xff] %v9546_v58  ;;  %v715_v61 = vpop.f32.mrf.mxu0  ;;  %v838_v62 = vpop.f32.mrf.mxu1  ;;  %7730 = vmatprep.subr.bf16.mxu1 %v8596_v43  ;;  %v1217_v0 = vrot.slane %v9546_v58, 1  ;;  %v9570_v35 = vcombine.low %v9315_v30, %v9339_v8 }
 0x13c   : > { %v7545_v57 = vpack.c.bf16 %v935_v56, %v934_v44  ;;  %v918_v7 = vadd.f32 %v9295_v21, %v893_v40  ;;  %v858_v12 = vmax.f32 %v713_v49, %v715_v61  ;;  %v876_v14 = vmax.f32 %v836_v50, %v838_v62  ;;  %7679 = vmatpush3.bf16.msra.mxu0 %v8592_v37  ;;  %v1050_v37 = vld [vmem:[#allocation2 + $0x4] sm:$0x8]  ;;  %v1045_v56 = vld [vmem:[#allocation2] sm:$0xc] }
 0x13d   : > { %v9559_v16 = vsel %vm1107_vm0, %v1146_v63, %v1150_v1  ;;  %7768 = vmatprep.subr.bf16.mxu0 %v8598_v51  ;;  %v1219_v19 = vor.u32 %v1218_v3, %v1217_v0  ;;  %v8586_v23 = vld [vmem:[#allocation2 + $0x30] ss:$0 sps:$4 sm:$0x11]   ;;  %v9581_v44 = vsel %vm1169_vm1, %v1177_v13, %v9564_v18  ;;  %v9587_v45 = vor.u32 %v9546_v58, %v1150_v1  ;;  %v1061_v0 = vld [vmem:[#allocation2 + $0x10] sm:$0x8] }
 0x13e   : > { %7558 = vst [vmem:[#allocation2 + $0x38] sm:$0xff] %v7545_v57   ;;  %v894_v17 = vmax.f32 %v858_v12, %v876_v14  ;;  %4046 = vmatprep.mubr.bf16.mxu0 %v9559_v16  ;;  %7731 = vmatpush3.bf16.msra.mxu1 %v8597_v60  ;;  %v936_v28 = vmax.f32 %v918_v7, 0.0  ;;  %v9574_v38 = vld [vmem:[#allocation2 + $0x30] ss:$0 sps:$4 sm:$0x33]   ;;  %v1273_v48 = vrot.slane %v9570_v35, 2  ;;  %v9591_v13 = vcombine.low %v1050_v37, %v9313_v29 }
 0x13f   : > { %4047 = vmatmul.mubr.bf16.gmra.mxu0 %v9456_v39  ;;  %7820 = vmatprep.subr.bf16.mxu1 %v8608_v5  ;;  %v1220_v36 = vsel %vm1192_vm2, %v9508_v27, %v1219_v19  ;;  %v1222_v30 = vshrl.u32 %v9574_v38, 16  ;;  %v1225_v8 = vshll.u32 %v9574_v38, 16  ;;  %v1272_v51 = vrot.slane %v7076_v41, 2  ;;  %v9848_v59 = vld [vmem:[#allocation2 + $0x34] ss:$0 sps:$4 sm:$0x77]  }
 0x140   : > { %v919_v33 = vadd.f32 %v9295_v21, %v894_v17  ;;  %4127 = vmatprep.mubr.bf16.mxu1 %v1220_v36  ;;  %v1156_v21 = vshll.u32 %v8586_v23, 16  ;;  %v1181_v60 = vrot.slane %v8586_v23, 1  ;;  %v9596_v61 = vshrl.u32 %v9570_v35, 16 }
 0x141   : > { %4128 = vmatmul.mubr.bf16.gmra.mxu1 %v9581_v44  ;;  %v1224_v49 = vrot.slane %v1222_v30, 1  ;;  %v1227_v50 = vrot.slane %v1225_v8, 2  ;;  %v9599_v62 = vshll.u32 %v9570_v35, 16  ;;  %v1368_v1 = vrot.slane %v9570_v35, 3 }
 0x142   : > { %v937_v43 = vmax.f32 %v919_v33, 0.0  ;;  %v1158_v46 = vrot.slane %v1156_v21, 1  ;;  %v1274_v29 = vsel %vm1239_vm3, %v1272_v51, %v1273_v48  ;;  %v9606_v3 = vcombine.low %v9341_v9, %v9386_v52  ;;  %v8602_v21 = vld [vmem:[%s11937_s3 + $0x270] sm:$0xff]  }
 0x143   : > { %v1228_v63 = vor.u32 %v1227_v50, %v1224_v49  ;;  %v1296_v5 = vshrl.u32 %v7076_v41, 16  ;;  %v1299_v57 = vshll.u32 %v7076_v41, 16  ;;  %v1367_v12 = vrot.slane %v9591_v13, 3  ;;  %v8603_v50 = vld [vmem:[%s11937_s3 + $0x230] sm:$0xff]  }
 0x144   : > { %v7550_v27 = vpack.c.bf16 %v937_v43, %v936_v28  ;;  %v1159_v40 = vsel %vm1107_vm0, %v9587_v45, %v1158_v46  ;;  %v7075_v14 = vcombine.low %v1045_v56, %v9302_v4  ;;  %v1182_v17 = vsel %vm1169_vm1, %v9564_v18, %v1181_v60  ;;  %v8600_v43 = vld [vmem:[%s11937_s3 + $0x238] sm:$0xff]   ;;  %v8610_v60 = vld [vmem:[%s11937_s3 + $0x2f0] sm:$0xff]  }
 0x145   : > { %4054 = vmatprep.mubr.bf16.mxu0 %v1159_v40  ;;  %v1229_v7 = vsel %vm1192_vm2, %v1219_v19, %v1228_v63  ;;  %v1306_v23 = vrot.slane %v9596_v61, 2  ;;  %v1309_v24 = vrot.slane %v9599_v62, 3  ;;  %v1369_v52 = vsel %vm1366_vm4, %v1367_v12, %v1368_v1  ;;  %v8609_v56 = vld [vmem:[%s11937_s3 + $0x2b8] sm:$0xff]   ;;  %v8612_v12 = vld [vmem:[%s11937_s3 + $0x2b0] sm:$0xff]  }
 0x146   : > { %7559 = vst [vmem:[#allocation2 + $0x40] sm:$0xff] %v7550_v27   ;;  %4135 = vmatprep.mubr.bf16.mxu1 %v1229_v7  ;;  %v1241_v28 = vrot.slane %v9321_v34, 2  ;;  %v9618_v19 = vrot.slane %v9606_v3, 2  ;;  %v1298_v33 = vrot.slane %v1296_v5, 2  ;;  %v1301_v4 = vrot.slane %v1299_v57, 3 }
 0x147   : > { %4055 = vmatmul.mubr.bf16.gmra.mxu0 %v9515_v32  ;;  %v9621_v36 = vcombine.low %v1061_v0, %v9341_v9  ;;  %v1240_v41 = vrot.slane %v7075_v14, 2  ;;  %v1310_v30 = vor.u32 %v1309_v24, %v1306_v23  ;;  %v9630_v8 = vshrl.u32 %v9606_v3, 16  ;;  %v8605_v14 = vld [vmem:[%s11937_s3 + $0x228] sm:$0xff]  }
 0x148   : > { %4176 = vmatprep.mubr.bf16.mxu0 %v1274_v29  ;;  %v9633_v27 = vshll.u32 %v9606_v3, 16  ;;  %v1370_v9 = vrot.slane %v9606_v3, 3  ;;  %v1276_v37 = vsel %vm1239_vm3, %v1273_v48, %v9618_v19  ;;  %v1302_v49 = vor.u32 %v1301_v4, %v1298_v33  ;;  %v8604_v48 = vld [vmem:[%s11937_s3 + $0x268] sm:$0xff]  }
 0x149   : > { %4136 = vmatmul.mubr.bf16.gmra.mxu1 %v1182_v17  ;;  %11993 = vst [vmem:[#allocation13_spill] sm:$0xff] %v9621_v36  ;;  %v1242_v46 = vsel %vm1239_vm3, %v1240_v41, %v1241_v28  ;;  %v9644_v51 = vcombine.low %v9380_v47, %v9442_v31  ;;  %v1622_v40 = vrot.slane %v9621_v36, 1  ;;  %v1315_v47 = vrot.slane %v9630_v8, 2  ;;  %v8633_v36 = vld [vmem:[%s11937_s3 + $0x280] sm:$0xff]  }
 0x14a   : > { %4257 = vmatprep.mubr.bf16.mxu1 %v1369_v52  ;;  %v1311_v63 = vsel %vm1294_vm5, %v1302_v49, %v1310_v30  ;;  %v1318_v31 = vrot.slane %v9633_v27, 3  ;;  %v1371_v29 = vsel %vm1366_vm4, %v1368_v1, %v1370_v9  ;;  %v1243_v5 = vrot.slane %v9345_v11, 2  ;;  %v8606_v1 = vld [vmem:[%s11937_s3 + $0x260] sm:$0xff]  }
 0x14b   : > { %v1623_v57 = vsel %vm1169_vm1, %v1622_v40, %v9434_v22  ;;  %v1277_v7 = vrot.slane %v9644_v51, 2  ;;  %v8614_v22 = vld [vmem:[%s11937_s3 + $0x2e8] sm:$0xff]   ;;  %v9679_v17 = vshrl.u32 %v9644_v51, 16  ;;  %v9682_v23 = vshll.u32 %v9644_v51, 16 }
 0x14c   : > { %v9676_v0 = vor.u32 %v1318_v31, %v1315_v47  ;;  %v1830_v24 = vshrl.u32 %v1623_v57, 16  ;;  %v1244_v52 = vsel %vm1239_vm3, %v1241_v28, %v1243_v5  ;;  %v1372_v33 = vrot.slane %v9644_v51, 3  ;;  %v8615_v28 = vld [vmem:[%s11937_s3 + $0x2a8] sm:$0xff]   ;;  %v8619_v31 = vld [vmem:[%s11937_s3 + $0x2a0] sm:$0xff]  }
 0x14d   : > { %v9688_v4 = vsel %vm1239_vm3, %v9618_v19, %v1277_v7  ;;  %v9692_v41 = vcombine.low %v9444_v26, %v9501_v20  ;;  %v8618_v26 = vld [vmem:[%s11937_s3 + $0x2e0] sm:$0xff]   ;;  %v9717_v40 = vrot.slane %v9393_v55, 2  ;;  %v1518_v53 = vrot.slane %v9682_v23, 2 }
 0x14e   : > { %11994 = vst [vmem:[#allocation14_spill] sm:$0xff] %v9688_v4  ;;  %v1320_v20 = vsel %vm1294_vm5, %v1310_v30, %v9676_v0  ;;  %v9711_v49 = vrot.slane %v1830_v24, 2  ;;  %v8613_v30 = vld [vmem:[%s11937_s3 + $0x218] sm:$0xff]   ;;  %v1965_v10 = vshll.u32 %v9581_v44, 16 }
 0x14f   : > { %4177 = vmatmul.mubr.bf16.vlgmr.msra.gmra.mxu0 %v1242_v46  ;;  %v1324_v46 = vrot.slane %v9679_v17, 2  ;;  %v11945_v47 = vrot.slane %v9692_v41, 2  ;;  %v1246_v24 = vsel %vm1239_vm3, %v1243_v5, %v9717_v40  ;;  %v8623_v5 = vld [vmem:[%s11937_s3 + $0x248] sm:$0xff]   ;;  %v11999_v54 = vrot.slane %v9692_v41, 2 }
 0x150   : > { %7769 = vmatpush3.bf16.msra.mxu0 %v8600_v43  ;;  %4184 = vmatprep.mubr.bf16.mxu0 %v1276_v37  ;;  %v8607_v43 = vld [vmem:[%s11937_s3 + $0x220] sm:$0xff]   ;;  %v1327_v37 = vrot.slane %v9682_v23, 3 }
 0x151   : > { %7770 = vmatprep.subr.bf16.mxu0 %v8602_v21  ;;  %4258 = vmatmul.mubr.bf16.vlgmr.msra.gmra.mxu1 %v1311_v63  ;;  %v8611_v21 = vld [vmem:[%s11937_s3 + $0x258] sm:$0xff]   ;;  %v1841_v63 = vshll.u32 %v9529_v42, 16 }
 0x152   : > { %4265 = vmatprep.mubr.bf16.mxu1 %v1371_v29  ;;  %7821 = vmatpush3.bf16.msra.mxu1 %v8609_v56  ;;  %v1373_v56 = vsel %vm1366_vm4, %v1370_v9, %v1372_v33  ;;  %v8616_v9 = vld [vmem:[%s11937_s3 + $0x250] sm:$0xff]   ;;  %v8621_v29 = vld [vmem:[%s11937_s3 + $0x2d8] sm:$0xff]  }
 0x153   : > { %7822 = vmatprep.subr.bf16.mxu1 %v8610_v60  ;;  %v1838_v60 = vshrl.u32 %v9529_v42, 16  ;;  %v9738_v42 = vshrl.u32 %v9692_v41, 16 }
 0x154   : > { %7771 = vmatpush3.bf16.msra.mxu0 %v8603_v50  ;;  %v1833_v50 = vshll.u32 %v1623_v57, 16  ;;  %v9735_v57 = vld [vmem:[#allocation2 + $0x30] sm:$0xf] }
 0x155   : > { %7772 = vmatprep.subr.bf16.mxu0 %v8604_v48  ;;  %v1821_v48 = vshrl.u32 %v9506_v25, 16 }
 0x156   : > { %7823 = vmatpush3.bf16.msra.mxu1 %v8612_v12  ;;  %v9741_v12 = vshll.u32 %v9692_v41, 16 }
 0x157   : > { %4185 = vmatmul.mubr.bf16.gmra.mxu0 %v1244_v52  ;;  %7824 = vmatprep.subr.bf16.mxu1 %v8614_v22  ;;  %v11944_v52 = vrot.slane %v9692_v41, 3  ;;  %v1956_v22 = vshll.u32 %v9559_v16, 16 }
 0x158   : > { %4192 = vmatprep.mubr.bf16.mxu0 %v9688_v4  ;;  %7773 = vmatpush3.bf16.msra.mxu0 %v8605_v14  ;;  %v9743_v14 = vor.u32 %v1327_v37, %v1324_v46  ;;  %v8624_v46 = vld [vmem:[%s11937_s3 + $0x298] sm:$0xff]   ;;  %v8626_v37 = vld [vmem:[%s11937_s3 + $0x2d0] sm:$0xff]   ;;  %v1522_v2 = vrot.slane %v9741_v12, 2 }
 0x159   : > { %7774 = vmatprep.subr.bf16.mxu0 %v8606_v1  ;;  %4266 = vmatmul.mubr.bf16.gmra.mxu1 %v1320_v20  ;;  %v9745_v1 = vrot.slane %v1833_v50, 3  ;;  %v9756_v20 = vrot.slane %v1841_v63, 3  ;;  %v9776_v50 = vrot.slane %v1821_v48, 2  ;;  %v8627_v48 = vld [vmem:[%s11937_s3 + $0x290] sm:$0xff]   ;;  %v1514_v63 = vrot.slane %v9633_v27, 2 }
 0x15a   : > { %4273 = vmatprep.mubr.bf16.mxu1 %v1373_v56  ;;  %7825 = vmatpush3.bf16.msra.mxu1 %v8615_v28  ;;  %v9754_v28 = vrot.slane %v1838_v60, 2  ;;  %v1333_v56 = vrot.slane %v9738_v42, 2  ;;  %v1336_v60 = vrot.slane %v9741_v12, 3 }
 0x15b   : > { %7826 = vmatprep.subr.bf16.mxu1 %v8618_v26  ;;  %v9765_v26 = vcombine.low %v9503_v6, %v9735_v57  ;;  %v1513_v6 = vrot.slane %v9630_v8, 1 }
 0x15c   : > { %7775 = vmatpush3.bf16.msra.mxu0 %v8607_v43  ;;  %v8617_v43 = vld [vmem:[%s11937_s3 + $0x210] sm:$0xff]  }
 0x15d   : > { %7776 = vmatprep.subr.bf16.mxu0 %v8611_v21  ;;  %v9761_v21 = vsel %vm1239_vm3, %v1277_v7, %v11945_v47  ;;  %v1329_v7 = vsel %vm1294_vm5, %v9676_v0, %v9743_v14  ;;  %v1375_v0 = vsel %vm1366_vm4, %v1372_v33, %v11944_v52  ;;  %v9808_v33 = vor.u32 %v1514_v63, %v1513_v6  ;;  %v9819_v47 = vld [vmem:[#allocation2 + $0x34] sm:$0xf]  ;;  %v8631_v63 = vld [vmem:[%s11937_s3 + $0x288] sm:$0xff]  }
 0x15e   : > { %11995 = vst [vmem:[#allocation15_spill] sm:$0xff] %v9761_v21  ;;  %7827 = vmatpush3.bf16.msra.mxu1 %v8619_v31  ;;  %v9814_v52 = vshrl.u32 %v9765_v26, 16  ;;  %v9821_v31 = vor.u32 %v1336_v60, %v1333_v56  ;;  %v8620_v6 = vld [vmem:[#allocation2 + $0x34] ss:$0 sps:$4 sm:$0x33]   ;;  %v8629_v56 = vld [vmem:[%s11937_s3 + $0x200] sm:$0xff]  }
 0x15f   : > { %4193 = vmatmul.mubr.bf16.gmra.mxu0 %v1246_v24  ;;  %7828 = vmatprep.subr.bf16.mxu1 %v8621_v29  ;;  %v9800_v29 = vrot.slane %v9765_v26, 2  ;;  %v8628_v24 = vld [vmem:[%s11937_s3 + $0x240] sm:$0xff]   ;;  %v1521_v60 = vrot.slane %v9738_v42, 1 }
 0x160   : > { %4200 = vmatprep.mubr.bf16.mxu0 %v9761_v21  ;;  %7777 = vmatpush3.bf16.msra.mxu0 %v8613_v30  ;;  %v1517_v30 = vrot.slane %v9679_v17, 1  ;;  %v1342_v15 = vrot.slane %v9814_v52, 2  ;;  %v1525_v21 = vrot.slane %v9814_v52, 1 }
 0x161   : > { %7778 = vmatprep.subr.bf16.mxu0 %v8616_v9  ;;  %4274 = vmatmul.mubr.bf16.gmra.mxu1 %v1329_v7  ;;  %v8625_v9 = vld [vmem:[%s11937_s3 + $0x208] sm:$0xff]   ;;  %11996 = vst [vmem:[#allocation16_spill] sm:$0xff] %v9800_v29 }
 0x162   : > { %4281 = vmatprep.mubr.bf16.mxu1 %v1375_v0  ;;  %7829 = vmatpush3.bf16.msra.mxu1 %v8624_v46  ;;  %v8630_v7 = vld [vmem:[%s11937_s3 + $0x2c8] sm:$0xff]   ;;  %v1962_v0 = vshrl.u32 %v9581_v44, 16  ;;  %v9817_v46 = vshll.u32 %v9765_v26, 16 }
 0x163   : > { %7830 = vmatprep.subr.bf16.mxu1 %v8626_v37  ;;  %v1519_v37 = vor.u32 %v1518_v53, %v1517_v30  ;;  %v8634_v53 = vld [vmem:[%s11937_s3 + $0x378] sm:$0xff]   ;;  %v1523_v30 = vor.u32 %v1522_v2, %v1521_v60  ;;  %v1283_v2 = vrot.slane %v8620_v6, 2  ;;  %v12007_v6 = vshll.u32 %v9506_v25, 16 }
 0x164   : > { %7779 = vmatpush3.bf16.msra.mxu0 %v8617_v43  ;;  %v11997_v43 = vrot.slane %v9456_v39, 2  ;;  %v1526_v4 = vrot.slane %v9817_v46, 2 }
 0x165   : > { %7780 = vmatprep.subr.bf16.mxu0 %v8623_v5  ;;  %v8632_v5 = vld [vmem:[%s11937_s3 + $0x2c0] sm:$0xff]   ;;  %v9865_v44 = vsel %vm1192_vm2, %v9808_v33, %v1519_v37  ;;  %v9886_v60 = vsel %vm1192_vm2, %v1519_v37, %v1523_v30  ;;  %v12008_v37 = vshrl.u32 %v9559_v16, 16  ;;  %v1284_v25 = vsel %vm1239_vm3, %v9800_v29, %v1283_v2 }
 0x166   : > { %v9831_v58 = vsel %vm1239_vm3, %v9717_v40, %v11997_v43  ;;  %v9846_v43 = vsel %vm1239_vm3, %v11999_v54, %v9800_v29  ;;  %7831 = vmatpush3.bf16.msra.mxu1 %v8627_v48  ;;  %v1338_v54 = vsel %vm1294_vm5, %v9743_v14, %v9821_v31  ;;  %v1345_v48 = vrot.slane %v9817_v46, 3  ;;  %12005 = vst [vmem:[#allocation21_spill] sm:$0xff] %v9886_v60 }
 0x167   : > { %11998 = vst [vmem:[#allocation17_spill] sm:$0xff] %v9831_v58  ;;  %4201 = vmatmul.mubr.bf16.gmra.mxu0 %v9831_v58  ;;  %12000 = vst [vmem:[#allocation18_spill] sm:$0xff] %v9846_v43  ;;  %7832 = vmatprep.subr.bf16.mxu1 %v8630_v7  ;;  %v12002_v14 = vrot.slane %v9765_v26, 3  ;;  %v9877_v7 = vrot.slane %v9515_v32, 2  ;;  %v9882_v58 = vor.u32 %v1526_v4, %v1525_v21  ;;  %v8642_v4 = vld [vmem:[%s11937_s3 + $0x3f8] sm:$0xff]   ;;  %v1632_v2 = vrot.slane %v9630_v8, 5 }
 0x168   : > { %4208 = vmatprep.mubr.bf16.mxu0 %v9846_v43  ;;  %7781 = vmatpush3.bf16.msra.mxu0 %v8625_v9  ;;  %v9869_v9 = vcombine.low %v9735_v57, %v9819_v47  ;;  %v12003_v43 = vrot.slane %v9692_v41, 3  ;;  %v1349_v57 = vshrl.u32 %v9848_v59, 16 }
 0x169   : > { %7782 = vmatprep.subr.bf16.mxu0 %v8628_v24  ;;  %4282 = vmatmul.mubr.bf16.gmra.mxu1 %v1338_v54  ;;  %12004 = vst [vmem:[#allocation20_spill] sm:$0xff] %v9882_v58  ;;  %v1964_v54 = vrot.slane %v1962_v0, 2  ;;  %v9894_v21 = vsel %vm1192_vm2, %v1523_v30, %v9882_v58  ;;  %v1958_v0 = vrot.slane %v1956_v22, 3  ;;  %v1378_v30 = vrot.slane %v9848_v59, 3 }
 0x16a   : > { %12001 = vst [vmem:[#allocation19_spill] sm:$0xff] %v9869_v9  ;;  %v1377_v24 = vsel %vm1366_vm4, %v12003_v43, %v12002_v14  ;;  %7833 = vmatpush3.bf16.msra.mxu1 %v8631_v63  ;;  %v1967_v43 = vrot.slane %v1965_v10, 3  ;;  %v1352_v14 = vshll.u32 %v9848_v59, 16  ;;  %12006 = vst [vmem:[#allocation22_spill] sm:$0xff] %v9894_v21  ;;  %v1826_v63 = vrot.slane %v12007_v6, 3 }
 0x16b   : > { %4289 = vmatprep.mubr.bf16.mxu1 %v1377_v24  ;;  %7834 = vmatprep.subr.bf16.mxu1 %v8632_v5  ;;  %v1955_v24 = vrot.slane %v12008_v37, 2  ;;  %v1346_v10 = vor.u32 %v1345_v48, %v1342_v15  ;;  %v12009_v5 = vrot.slane %v9456_v39, 2  ;;  %v1251_v58 = vrot.slane %v9574_v38, 2 }
 0x16c   : > { %7783 = vmatpush3.bf16.msra.mxu0 %v8629_v56  ;;  %v1351_v16 = vrot.slane %v1349_v57, 2  ;;  %v1447_v15 = vrot.slane %v9599_v62, 1  ;;  %v1844_v22 = vor.u32 %v9756_v20, %v9754_v28  ;;  %v9915_v48 = vor.u32 %v1967_v43, %v1964_v54 }
 0x16d   : > { %7872 = vmatprep.subr.bf16.mxu0 %v8634_v53  ;;  %v9905_v60 = vsel %vm1239_vm3, %v12009_v5, %v9877_v7  ;;  %v1354_v53 = vrot.slane %v1352_v14, 3  ;;  %v1391_v59 = vshrl.u32 %v9591_v13, 16  ;;  %v1347_v38 = vsel %vm1294_vm5, %v9821_v31, %v1346_v10 }
 0x16e   : > { %7835 = vmatpush3.bf16.msra.mxu1 %v8633_v36  ;;  %v1394_v6 = vshll.u32 %v9591_v13, 16  ;;  %v1633_v57 = vrot.slane %v9633_v27, 6  ;;  %v12010_v36 = vrot.slane %v9765_v26, 3  ;;  %v1449_v20 = vrot.slane %v9633_v27, 1 }
 0x16f   : > { %4209 = vmatmul.mubr.bf16.gmra.mxu0 %v9905_v60  ;;  %7924 = vmatprep.subr.bf16.mxu1 %v8642_v4  ;;  %v1635_v54 = vrot.slane %v9679_v17, 5  ;;  %v1636_v43 = vrot.slane %v9682_v23, 6  ;;  %v1448_v31 = vor.u32 %v1447_v15, %v9596_v61  ;;  %v1398_v13 = vrot.slane %v9596_v61, 3 }
 0x170   : > { %4216 = vmatprep.mubr.bf16.mxu0 %v1284_v25  ;;  %v1379_v28 = vsel %vm1366_vm4, %v12010_v36, %v1378_v30  ;;  %v1399_v14 = vrot.slane %v9599_v62, 4  ;;  %v1634_v4 = vor.u32 %v1633_v57, %v1632_v2  ;;  %v1355_v37 = vor.u32 %v1354_v53, %v1351_v16  ;;  %v9933_v36 = vld [vmem:[#allocation2 + $0x38] sm:$0xf] }
 0x171   : > { %4290 = vmatmul.mubr.bf16.gmra.mxu1 %v1347_v38  ;;  %v1393_v5 = vrot.slane %v1391_v59, 3  ;;  %v1452_v25 = vrot.slane %v9682_v23, 1  ;;  %v1637_v30 = vor.u32 %v1636_v43, %v1635_v54  ;;  %v1396_v38 = vrot.slane %v1394_v6, 4  ;;  %v8635_v43 = vld [vmem:[%s11937_s3 + $0x338] sm:$0xff]  }
 0x172   : > { %4297 = vmatprep.mubr.bf16.mxu1 %v1379_v28  ;;  %v1847_v56 = vshrl.u32 %v1634_v4, 16  ;;  %v1850_v29 = vshll.u32 %v1634_v4, 16  ;;  %v9935_v21 = vor.u32 %v1958_v0, %v1955_v24  ;;  %v1252_v15 = vsel %vm1239_vm3, %v9877_v7, %v1251_v58 }
 0x173   : > { %v1450_v61 = vsel %vm1107_vm0, %v1448_v31, %v1449_v20  ;;  %v9941_v62 = vor.u32 %v1826_v63, %v9776_v50  ;;  %v1638_v16 = vsel %vm1631_vm6, %v1634_v4, %v1637_v30  ;;  %v9944_v53 = vor.u32 %v1399_v14, %v1398_v13 }
 0x174   : > { %v1849_v59 = vrot.slane %v1847_v56, 2  ;;  %v1852_v6 = vrot.slane %v1850_v29, 3  ;;  %v1836_v2 = vor.u32 %v9745_v1, %v9711_v49  ;;  %v1451_v24 = vor.u32 %v1449_v20, %v9630_v8 }
 0x175   : > { %v1855_v58 = vshrl.u32 %v1638_v16, 16  ;;  %v1858_v0 = vshll.u32 %v1638_v16, 16  ;;  %v9953_v50 = vsel %vm1294_vm5, %v9941_v62, %v9935_v21  ;;  %v1356_v63 = vsel %vm1294_vm5, %v1346_v10, %v1355_v37 }
 0x176   : > { %v1402_v57 = vrot.slane %v9630_v8, 3  ;;  %v9959_v29 = vcombine.low %v9819_v47, %v9933_v36  ;;  %v9962_v49 = vsel %vm1294_vm5, %v1836_v2, %v1844_v22  ;;  %v1639_v56 = vrot.slane %v9738_v42, 5 }
 0x177   : > { %4217 = vmatmul.mubr.bf16.gmra.mxu0 %v1252_v15  ;;  %v1860_v1 = vrot.slane %v1858_v0, 3  ;;  %v1640_v28 = vrot.slane %v9741_v12, 6  ;;  %v1397_v20 = vor.u32 %v1396_v38, %v1393_v5  ;;  %v1403_v10 = vrot.slane %v9633_v27, 4  ;;  %v8636_v27 = vld [vmem:[%s11937_s3 + $0x370] sm:$0xff]  }
 0x178   : > { %4338 = vmatprep.mubr.bf16.mxu0 %v9321_v34  ;;  %v1857_v34 = vrot.slane %v1855_v58, 2  ;;  %v1853_v54 = vor.u32 %v1852_v6, %v1849_v59  ;;  %v9968_v8 = vshll.u32 %v9869_v9, 16  ;;  %v9975_v14 = vsel %vm1294_vm5, %v1844_v22, %v9915_v48  ;;  %v8643_v59 = vld [vmem:[%s11937_s3 + $0x3b8] sm:$0xff]   ;;  %v8644_v6 = vld [vmem:[%s11937_s3 + $0x3f0] sm:$0xff]  }
 0x179   : > { %4298 = vmatmul.mubr.bf16.gmra.mxu1 %v1356_v63  ;;  %v1641_v13 = vor.u32 %v1640_v28, %v1639_v56  ;;  %v1643_v4 = vrot.slane %v9814_v52, 5  ;;  %v9982_v37 = vshll.u32 %v9959_v29, 16  ;;  %v9985_v5 = vshrl.u32 %v9959_v29, 16 }
 0x17a   : > { %4419 = vmatprep.mubr.bf16.mxu1 %v1450_v61  ;;  %v1861_v31 = vor.u32 %v1860_v1, %v1857_v34  ;;  %v1598_v38 = vrot.slane %v9968_v8, 1  ;;  %v1644_v15 = vrot.slane %v9817_v46, 6  ;;  %v1401_v22 = vsel %vm1389_vm7, %v1397_v20, %v9944_v53  ;;  %v8637_v61 = vld [vmem:[%s11937_s3 + $0x330] sm:$0xff]   ;;  %v8638_v34 = vld [vmem:[%s11937_s3 + $0x368] sm:$0xff]  }
 0x17b   : > { %v1642_v58 = vsel %vm1631_vm6, %v1637_v30, %v1641_v13  ;;  %v12011_v0 = vrot.slane %v9869_v9, 1  ;;  %v1453_v30 = vsel %vm1107_vm0, %v1451_v24, %v1452_v25 }
 0x17c   : > { %v10002_v2 = vsel %vm1294_vm5, %v1853_v54, %v1861_v31  ;;  %v1971_v1 = vshrl.u32 %v1642_v58, 16  ;;  %v1974_v56 = vshll.u32 %v1642_v58, 16  ;;  %v1599_v28 = vsel %vm1107_vm0, %v9587_v45, %v1598_v38 }
 0x17d   : > { %v1625_v63 = vsel %vm1169_vm1, %v9564_v18, %v12011_v0  ;;  %v2029_v18 = vshrl.u32 %v1599_v28, 16  ;;  %v2032_v20 = vshll.u32 %v1599_v28, 16  ;;  %v1645_v54 = vor.u32 %v1644_v15, %v1643_v4 }
 0x17e   : > { %v1647_v58 = vrot.slane %v9985_v5, 5  ;;  %v1973_v0 = vrot.slane %v1971_v1, 2  ;;  %v1976_v16 = vrot.slane %v1974_v56, 3  ;;  %v10023_v45 = vor.u32 %v1403_v10, %v1402_v57 }
 0x17f   : > { %4339 = vmatmul.mubr.bf16.vlgmr.msra.gmra.mxu0 %v1401_v22  ;;  %v1648_v22 = vrot.slane %v9982_v37, 6  ;;  %v2034_v24 = vrot.slane %v2032_v20, 3  ;;  %v1646_v28 = vsel %vm1631_vm6, %v1641_v13, %v1645_v54  ;;  %v1406_v4 = vrot.slane %v9679_v17, 3  ;;  %v8648_v13 = vld [vmem:[%s11937_s3 + $0x3e8] sm:$0xff]  }
 0x180   : > { %7873 = vmatpush3.bf16.msra.mxu0 %v8635_v43  ;;  %4346 = vmatprep.mubr.bf16.mxu0 %v9345_v11  ;;  %v8639_v11 = vld [vmem:[%s11937_s3 + $0x328] sm:$0xff]   ;;  %v2031_v43 = vrot.slane %v2029_v18, 2  ;;  %v1977_v57 = vor.u32 %v1976_v16, %v1973_v0  ;;  %v2047_v10 = vshrl.u32 %v1646_v28, 16  ;;  %v2050_v15 = vshll.u32 %v1646_v28, 16 }
 0x181   : > { %7874 = vmatprep.subr.bf16.mxu0 %v8636_v27  ;;  %4420 = vmatmul.mubr.bf16.vlgmr.msra.gmra.mxu1 %v9570_v35  ;;  %v8640_v27 = vld [vmem:[%s11937_s3 + $0x360] sm:$0xff]   ;;  %v8646_v35 = vld [vmem:[%s11937_s3 + $0x3b0] sm:$0xff]   ;;  %v1407_v1 = vrot.slane %v9682_v23, 4  ;;  %v2041_v18 = vshll.u32 %v1625_v63, 16  ;;  %v10045_v0 = vor.u32 %v1648_v22, %v1647_v58  ;;  %v12012_v58 = vrot.slane %v9741_v12, 1 }
 0x182   : > { %4427 = vmatprep.mubr.bf16.mxu1 %v1453_v30  ;;  %7925 = vmatpush3.bf16.msra.mxu1 %v8643_v59  ;;  %v10040_v56 = vor.u32 %v2034_v24, %v2031_v43  ;;  %v2038_v30 = vshrl.u32 %v1625_v63, 16  ;;  %v10043_v59 = vsel %vm1294_vm5, %v1861_v31, %v1977_v57  ;;  %v2049_v20 = vrot.slane %v2047_v10, 2  ;;  %v8649_v63 = vld [vmem:[%s11937_s3 + $0x3a8] sm:$0xff]  }
 0x183   : > { %7926 = vmatprep.subr.bf16.mxu1 %v8644_v6  ;;  %v2052_v16 = vrot.slane %v2050_v15, 3  ;;  %v2043_v24 = vrot.slane %v2041_v18, 3  ;;  %v1454_v31 = vor.u32 %v1452_v25, %v9679_v17  ;;  %v8652_v17 = vld [vmem:[%s11937_s3 + $0x3e0] sm:$0xff]   ;;  %v1408_v10 = vor.u32 %v1407_v1, %v1406_v4  ;;  %v8647_v4 = vld [vmem:[%s11937_s3 + $0x318] sm:$0xff]  }
 0x184   : > { %7875 = vmatpush3.bf16.msra.mxu0 %v8637_v61  ;;  %v1405_v61 = vsel %vm1389_vm7, %v9944_v53, %v10023_v45  ;;  %v10053_v6 = vsel %vm1294_vm5, %v9935_v21, %v10040_v56  ;;  %v2040_v43 = vrot.slane %v2038_v30, 2  ;;  %v1650_v53 = vsel %vm1631_vm6, %v1645_v54, %v10045_v0  ;;  %v8641_v21 = vld [vmem:[%s11937_s3 + $0x320] sm:$0xff]   ;;  %v8645_v54 = vld [vmem:[%s11937_s3 + $0x358] sm:$0xff]  }
 0x185   : > { %7876 = vmatprep.subr.bf16.mxu0 %v8638_v34  ;;  %v2053_v34 = vor.u32 %v2052_v16, %v2049_v20  ;;  %v2123_v25 = vshrl.u32 %v1650_v53, 16  ;;  %v2126_v22 = vshll.u32 %v1650_v53, 16  ;;  %v1456_v28 = vsel %vm1107_vm0, %v1454_v31, %v12012_v58  ;;  %v8650_v16 = vld [vmem:[%s11937_s3 + $0x350] sm:$0xff]   ;;  %v8657_v53 = vld [vmem:[%s11937_s3 + $0x398] sm:$0xff]  }
 0x186   : > { %7927 = vmatpush3.bf16.msra.mxu1 %v8646_v35  ;;  %v10070_v23 = vor.u32 %v2043_v24, %v2040_v43  ;;  %v10081_v35 = vld [vmem:[#allocation2 + $0x40] sm:$0xf]  ;;  %v1410_v18 = vrot.slane %v9738_v42, 3  ;;  %v1411_v20 = vrot.slane %v9741_v12, 4  ;;  %v1409_v43 = vsel %vm1389_vm7, %v10023_v45, %v1408_v10  ;;  %v8660_v12 = vld [vmem:[%s11937_s3 + $0x390] sm:$0xff]  }
 0x187   : > { %4347 = vmatmul.mubr.bf16.gmra.mxu0 %v1405_v61  ;;  %7928 = vmatprep.subr.bf16.mxu1 %v8648_v13  ;;  %v2125_v30 = vrot.slane %v2123_v25, 2  ;;  %v8653_v13 = vld [vmem:[%s11937_s3 + $0x3a0] sm:$0xff]   ;;  %v8654_v61 = vld [vmem:[%s11937_s3 + $0x3d8] sm:$0xff]   ;;  %v1458_v24 = vrot.slane %v9817_v46, 1  ;;  %v8659_v25 = vld [vmem:[%s11937_s3 + $0x3d0] sm:$0xff]  }
 0x188   : > { %4354 = vmatprep.mubr.bf16.mxu0 %v9393_v55  ;;  %7877 = vmatpush3.bf16.msra.mxu0 %v8639_v11  ;;  %v10079_v11 = vsel %vm1294_vm5, %v1977_v57, %v2053_v34  ;;  %v10087_v15 = vsel %vm1294_vm5, %v9915_v48, %v10070_v23  ;;  %v10092_v57 = vld [vmem:[#allocation2 + $0x3c] sm:$0xf] }
 0x189   : > { %7878 = vmatprep.subr.bf16.mxu0 %v8640_v27  ;;  %4428 = vmatmul.mubr.bf16.gmra.mxu1 %v9606_v3  ;;  %12013 = vst [vmem:[#allocation23_spill] sm:$0xff] %v10087_v15  ;;  %v2128_v27 = vrot.slane %v2126_v22, 3  ;;  %v7098_v48 = vcombine.low %v10092_v57, %v10081_v35  ;;  %v1412_v22 = vor.u32 %v1411_v20, %v1410_v18  ;;  %v8662_v18 = vld [vmem:[%s11937_s3 + $0x340] sm:$0xff]   ;;  %v8665_v20 = vld [vmem:[%s11937_s3 + $0x3c8] sm:$0xff]  }
 0x18a   : > { %4435 = vmatprep.mubr.bf16.mxu1 %v1456_v28  ;;  %7929 = vmatpush3.bf16.msra.mxu1 %v8649_v63 }
 0x18b   : > { %7930 = vmatprep.subr.bf16.mxu1 %v8652_v17  ;;  %v10097_v1 = vor.u32 %v2128_v27, %v2125_v30  ;;  %v1652_v63 = vshrl.u32 %v7098_v48, 16  ;;  %v12015_v17 = vmov %v12012_v58  ;;  %v8656_v58 = vld [vmem:[%s11937_s3 + $0x348] sm:$0xff]  }
 0x18c   : > { %7879 = vmatpush3.bf16.msra.mxu0 %v8641_v21  ;;  %v1655_v21 = vshll.u32 %v7098_v48, 16  ;;  %v1457_v45 = vor.u32 %v12015_v17, %v9738_v42  ;;  %v8658_v27 = vld [vmem:[%s11937_s3 + $0x308] sm:$0xff]   ;;  %v1415_v48 = vrot.slane %v9817_v46, 4  ;;  %v8668_v17 = vld [vmem:[%s11937_s3 + $0x3c0] sm:$0xff]  }
 0x18d   : > { %7880 = vmatprep.subr.bf16.mxu0 %v8645_v54  ;;  %v10114_v31 = vsel %vm1294_vm5, %v2053_v34, %v10097_v1  ;;  %v8651_v34 = vld [vmem:[%s11937_s3 + $0x310] sm:$0xff]   ;;  %v1654_v28 = vrot.slane %v1652_v63, 5  ;;  %v10157_v63 = vld [vmem:[#allocation2 + $0x3c] ss:$0 sps:$4 sm:$0x11]  }
 0x18e   : > { %12014 = vst [vmem:[#allocation24_spill] sm:$0xff] %v10114_v31  ;;  %7931 = vmatpush3.bf16.msra.mxu1 %v8653_v13  ;;  %v1657_v54 = vrot.slane %v1655_v21, 6  ;;  %v1459_v42 = vsel %vm1107_vm0, %v1457_v45, %v1458_v24  ;;  %v1413_v13 = vsel %vm1389_vm7, %v1408_v10, %v1412_v22  ;;  %v7085_v10 = vcombine.low %v9819_v47, %v9819_v47  ;;  %v8664_v47 = vld [vmem:[%s11937_s3 + $0x300] sm:$0xff]  }
 0x18f   : > { %4355 = vmatmul.mubr.bf16.gmra.mxu0 %v1409_v43  ;;  %7932 = vmatprep.subr.bf16.mxu1 %v8654_v61  ;;  %v1464_v61 = vrot.slane %v9982_v37, 1  ;;  %v1460_v21 = vor.u32 %v1458_v24, %v9814_v52 }
 0x190   : > { %4362 = vmatprep.mubr.bf16.mxu0 %v9456_v39  ;;  %7881 = vmatpush3.bf16.msra.mxu0 %v8647_v4  ;;  %v10137_v30 = vor.u32 %v1657_v54, %v1654_v28  ;;  %v1414_v4 = vrot.slane %v9814_v52, 3  ;;  %v8890_v28 = vld [vmem:[#allocation2 + $0x10] sm:$0xf] }
 0x191   : > { %7882 = vmatprep.subr.bf16.mxu0 %v8650_v16  ;;  %4436 = vmatmul.mubr.bf16.gmra.mxu1 %v9644_v51  ;;  %v8670_v52 = vld [vmem:[%s11937_s3 + $0x478] sm:$0xff]   ;;  %v1465_v24 = vsel %vm1107_vm0, %v1460_v21, %v1464_v61 }
 0x192   : > { %4443 = vmatprep.mubr.bf16.mxu1 %v1459_v42  ;;  %7933 = vmatpush3.bf16.msra.mxu1 %v8657_v53  ;;  %v1659_v16 = vsel %vm1631_vm6, %v10045_v0, %v10137_v30  ;;  %v8666_v53 = vld [vmem:[%s11937_s3 + $0x388] sm:$0xff]   ;;  %v1054_v0 = vld [vmem:[#allocation2 + $0xc] sm:$0xe]  ;;  %v1419_v42 = vshrl.u32 %v7085_v10, 16 }
 0x193   : > { %7934 = vmatprep.subr.bf16.mxu1 %v8659_v25  ;;  %v2199_v43 = vshrl.u32 %v1659_v16, 16  ;;  %v2202_v46 = vshll.u32 %v1659_v16, 16  ;;  %v1416_v25 = vor.u32 %v1415_v48, %v1414_v4  ;;  %v7089_v54 = vcombine.low %v1054_v0, %v8890_v28  ;;  %v8679_v4 = vld [vmem:[%s11937_s3 + $0x4f8] sm:$0xff]  }
 0x194   : > { %7883 = vmatpush3.bf16.msra.mxu0 %v8651_v34 }
 0x195   : > { %7884 = vmatprep.subr.bf16.mxu0 %v8656_v58  ;;  %v2201_v45 = vrot.slane %v2199_v43, 2  ;;  %v2204_v34 = vrot.slane %v2202_v46, 3  ;;  %v1470_v58 = vshll.u32 %v10157_v63, 16  ;;  %v1509_v16 = vshll.u32 %v7089_v54, 16 }
 0x196   : > { %7935 = vmatpush3.bf16.msra.mxu1 %v8660_v12  ;;  %v1422_v12 = vshll.u32 %v7085_v10, 16  ;;  %v1417_v10 = vsel %vm1389_vm7, %v1412_v22, %v1416_v25  ;;  %v1468_v43 = vor.u32 %v9985_v5, %v1464_v61  ;;  %v1421_v46 = vrot.slane %v1419_v42, 3 }
 0x197   : > { %4363 = vmatmul.mubr.bf16.gmra.mxu0 %v1413_v13  ;;  %7936 = vmatprep.subr.bf16.mxu1 %v8665_v20  ;;  %v8669_v13 = vld [vmem:[%s11937_s3 + $0x380] sm:$0xff]   ;;  %v1506_v20 = vshrl.u32 %v7089_v54, 16  ;;  %v1511_v0 = vrot.slane %v1509_v16, 2  ;;  %v1484_v42 = vrot.slane %v9606_v3, 1  ;;  %v8680_v3 = vld [vmem:[%s11937_s3 + $0x4b8] sm:$0xff]   ;;  %v8675_v16 = vld [vmem:[%s11937_s3 + $0x468] sm:$0xff]  }
 0x198   : > { %4370 = vmatprep.mubr.bf16.mxu0 %v9515_v32  ;;  %7885 = vmatpush3.bf16.msra.mxu0 %v8658_v27  ;;  %v10176_v27 = vor.u32 %v2204_v34, %v2201_v45  ;;  %v8891_v45 = vld [vmem:[#allocation2 + $0x14] sm:$0xf] }
 0x199   : > { %7886 = vmatprep.subr.bf16.mxu0 %v8662_v18  ;;  %4444 = vmatmul.mubr.bf16.gmra.mxu1 %v9692_v41  ;;  %v1472_v18 = vrot.slane %v1470_v58, 1  ;;  %v1508_v21 = vrot.slane %v1506_v20, 1 }
 0x19a   : > { %4451 = vmatprep.mubr.bf16.mxu1 %v1465_v24  ;;  %7937 = vmatpush3.bf16.msra.mxu1 %v8666_v53  ;;  %v10187_v48 = vsel %vm1294_vm5, %v10097_v1, %v10176_v27  ;;  %v1424_v53 = vrot.slane %v1422_v12, 4  ;;  %v1056_v12 = vld [vmem:[#allocation2 + $0xc] sm:$0xc] }
 0x19b   : > { %7938 = vmatprep.subr.bf16.mxu1 %v8668_v17  ;;  %12016 = vst [vmem:[#allocation25_spill] sm:$0xff] %v10187_v48  ;;  %v1473_v1 = vsel %vm1107_vm0, %v1468_v43, %v1472_v18  ;;  %v1512_v61 = vor.u32 %v1511_v0, %v1508_v21  ;;  %v8683_v43 = vld [vmem:[%s11937_s3 + $0x4b0] sm:$0xff]   ;;  %v8687_v21 = vld [vmem:[%s11937_s3 + $0x4a8] sm:$0xff]  }
 0x19c   : > { %7887 = vmatpush3.bf16.msra.mxu0 %v8664_v47  ;;  %v1057_v47 = vld [vmem:[#allocation2 + $0x10] sm:$0xc]  ;;  %v1425_v17 = vor.u32 %v1424_v53, %v1421_v46  ;;  %v8677_v46 = vld [vmem:[%s11937_s3 + $0x460] sm:$0xff]   ;;  %v12018_v0 = vld [vmem:[#allocation21_spill] sm:$0xff] }
 0x19d   : > { %7976 = vmatprep.subr.bf16.mxu0 %v8670_v52  ;;  %v10194_v22 = vcombine.low %v1057_v47, %v8891_v45  ;;  %v1516_v58 = vsel %vm1192_vm2, %v1512_v61, %v9808_v33  ;;  %v8673_v33 = vld [vmem:[%s11937_s3 + $0x470] sm:$0xff]   ;;  %v8678_v47 = vld [vmem:[%s11937_s3 + $0x420] sm:$0xff]  }
 0x19e   : > { %7939 = vmatpush3.bf16.msra.mxu1 %v8669_v13  ;;  %v1426_v34 = vsel %vm1389_vm7, %v1416_v25, %v1425_v17  ;;  %v7091_v13 = vcombine.low %v1056_v12, %v8890_v28  ;;  %v8671_v25 = vld [vmem:[%s11937_s3 + $0x438] sm:$0xff]   ;;  %v8681_v28 = vld [vmem:[%s11937_s3 + $0x4f0] sm:$0xff]   ;;  %v8690_v17 = vld [vmem:[%s11937_s3 + $0x4e0] sm:$0xff]   ;;  %v1530_v12 = vrot.slane %v9982_v37, 2 }
 0x19f   : > { %4371 = vmatmul.mubr.bf16.gmra.mxu0 %v1417_v10  ;;  %8028 = vmatprep.subr.bf16.mxu1 %v8679_v4  ;;  %v1569_v52 = vrot.slane %v10194_v22, 2  ;;  %v1483_v4 = vrot.slane %v7089_v54, 1  ;;  %v1486_v10 = vrot.slane %v9644_v51, 1  ;;  %v8685_v51 = vld [vmem:[%s11937_s3 + $0x4e8] sm:$0xff]   ;;  %v12019_v45 = vld [vmem:[#allocation13_spill] sm:$0xff] }
 0x1a0   : > { %4378 = vmatprep.mubr.bf16.mxu0 %v9869_v9  ;;  %v1551_v20 = vrot.slane %v7091_v13, 2  ;;  %v1590_v61 = vshll.u32 %v12019_v45, 16 }
 0x1a1   : > { %4452 = vmatmul.mubr.bf16.gmra.mxu1 %v9765_v26  ;;  %v1570_v24 = vsel %vm1239_vm3, %v1569_v52, %v9717_v40  ;;  %v1485_v18 = vsel %vm1169_vm1, %v1483_v4, %v1484_v42  ;;  %v8674_v40 = vld [vmem:[%s11937_s3 + $0x430] sm:$0xff]   ;;  %v1487_v53 = vsel %vm1169_vm1, %v1484_v42, %v1486_v10  ;;  %v1488_v52 = vrot.slane %v9692_v41, 1 }
 0x1a2   : > { %4459 = vmatprep.mubr.bf16.mxu1 %v1473_v1  ;;  %v1552_v54 = vsel %vm1239_vm3, %v1551_v20, %v9618_v19  ;;  %v8676_v19 = vld [vmem:[%s11937_s3 + $0x428] sm:$0xff]   ;;  %v10250_v1 = vcombine.low %v9933_v36, %v10092_v57  ;;  %v8691_v36 = vld [vmem:[%s11937_s3 + $0x4a0] sm:$0xff]   ;;  %v8684_v57 = vld [vmem:[%s11937_s3 + $0x418] sm:$0xff]   ;;  %v1529_v42 = vrot.slane %v9985_v5, 1  ;;  %v1592_v41 = vrot.slane %v1590_v61, 1 }
 0x1a3   : > { %v8688_v4 = vld [vmem:[%s11937_s3 + $0x450] sm:$0xff]   ;;  %v1489_v5 = vsel %vm1169_vm1, %v1486_v10, %v1488_v52  ;;  %v1588_v20 = vshrl.u32 %v12019_v45, 16 }
 0x1a4   : > { %v10273_v13 = vshll.u32 %v10250_v1, 16  ;;  %v10295_v10 = vor.u32 %v1530_v12, %v1529_v42 }
 0x1a7   : > { %4379 = vmatmul.mubr.bf16.gmra.mxu0 %v1426_v34  ;;  %v8682_v34 = vld [vmem:[%s11937_s3 + $0x458] sm:$0xff]  }
 0x1a8   : > { %4500 = vmatprep.mubr.bf16.mxu0 %v1516_v58  ;;  %v12020_v58 = vld [vmem:[#allocation14_spill] sm:$0xff] }
 0x1a9   : > { %4460 = vmatmul.mubr.bf16.gmra.mxu1 %v9959_v29 }
 0x1aa   : > { %4581 = vmatprep.mubr.bf16.mxu1 %v1570_v24  ;;  %v10261_v24 = vld [vmem:[#allocation2 + $0x3c] ss:$0 sps:$4 sm:$0x33]  }
 0x1ab   : > { %v1534_v37 = vshrl.u32 %v10261_v24, 16 }
 0x1ad   : > { %v1536_v45 = vrot.slane %v1534_v37, 1  ;;  %v8700_v37 = vld [vmem:[%s11937_s3 + $0x440] sm:$0xff]  }
 0x1af   : > { %4501 = vmatmul.mubr.bf16.vlgmr.msra.gmra.mxu0 %v1485_v18  ;;  %v1537_v18 = vshll.u32 %v10261_v24, 16 }
 0x1b0   : > { %7977 = vmatpush3.bf16.msra.mxu0 %v8671_v25  ;;  %4508 = vmatprep.mubr.bf16.mxu0 %v9865_v44  ;;  %v12017_v44 = vld [vmem:[#allocation17_spill] sm:$0xff] }
 0x1b1   : > { %7978 = vmatprep.subr.bf16.mxu0 %v8673_v33  ;;  %4582 = vmatmul.mubr.bf16.vlgmr.msra.gmra.mxu1 %v1552_v54  ;;  %12021 = vst [vmem:[#allocation17_spill] sm:$0xff] %v10273_v13  ;;  %v8693_v25 = vld [vmem:[%s11937_s3 + $0x4d8] sm:$0xff]   ;;  %v8694_v33 = vld [vmem:[#allocation2 + $0x40] ss:$0 sps:$4 sm:$0x33]   ;;  %v1539_v61 = vrot.slane %v1537_v18, 2 }
 0x1b2   : > { %4589 = vmatprep.mubr.bf16.mxu1 %v12017_v44  ;;  %8029 = vmatpush3.bf16.msra.mxu1 %v8680_v3  ;;  %v1490_v3 = vrot.slane %v9765_v26, 1  ;;  %v8696_v54 = vld [vmem:[%s11937_s3 + $0x498] sm:$0xff]   ;;  %v8698_v26 = vld [vmem:[%s11937_s3 + $0x4d0] sm:$0xff]   ;;  %v1593_v44 = vor.u32 %v1592_v41, %v1588_v20 }
 0x1b3   : > { %8030 = vmatprep.subr.bf16.mxu1 %v8681_v28  ;;  %v11969_v28 = vrot.slane %v9959_v29, 1  ;;  %v8699_v41 = vld [vmem:[%s11937_s3 + $0x490] sm:$0xff]  }
 0x1b4   : > { %7979 = vmatpush3.bf16.msra.mxu0 %v8674_v40  ;;  %v8689_v40 = vld [vmem:[%s11937_s3 + $0x410] sm:$0xff]   ;;  %v1491_v42 = vsel %vm1169_vm1, %v1488_v52, %v1490_v3  ;;  %v12035_v52 = vld [vmem:[#allocation11_spill] sm:$0xff] }
 0x1b5   : > { %7980 = vmatprep.subr.bf16.mxu0 %v8675_v16  ;;  %v12022_v16 = vld [vmem:[#allocation22_spill] sm:$0xff]  ;;  %v10325_v12 = vsel %vm1169_vm1, %v1490_v3, %v11969_v28  ;;  %v8702_v3 = vld [vmem:[%s11937_s3 + $0x4c8] sm:$0xff]  }
 0x1b6   : > { %8031 = vmatpush3.bf16.msra.mxu1 %v8683_v43  ;;  %v10301_v43 = vshrl.u32 %v9869_v9, 16 }
 0x1b7   : > { %4509 = vmatmul.mubr.bf16.gmra.mxu0 %v1487_v53  ;;  %8032 = vmatprep.subr.bf16.mxu1 %v8685_v51  ;;  %v1573_v53 = vrot.slane %v10250_v1, 2 }
 0x1b8   : > { %4516 = vmatprep.mubr.bf16.mxu0 %v12018_v0  ;;  %7981 = vmatpush3.bf16.msra.mxu0 %v8676_v19  ;;  %v1606_v19 = vrot.slane %v10273_v13, 1  ;;  %v1575_v0 = vrot.slane %v8694_v33, 2 }
 0x1b9   : > { %7982 = vmatprep.subr.bf16.mxu0 %v8677_v46  ;;  %4590 = vmatmul.mubr.bf16.gmra.mxu1 %v12020_v58  ;;  %v10304_v46 = vld [vmem:[#allocation2 + $0x40] ss:$0 sps:$4 sm:$0x77]  }
 0x1ba   : > { %4597 = vmatprep.mubr.bf16.mxu1 %v9905_v60  ;;  %8033 = vmatpush3.bf16.msra.mxu1 %v8687_v21  ;;  %v1571_v60 = vrot.slane %v9869_v9, 2  ;;  %v11968_v21 = vrot.slane %v9959_v29, 2  ;;  %v11967_v33 = vshll.u32 %v10304_v46, 16  ;;  %v12036_v15 = vshrl.u32 %v10304_v46, 16 }
 0x1bb   : > { %8034 = vmatprep.subr.bf16.mxu1 %v8690_v17  ;;  %v12023_v17 = vld [vmem:[#allocation15_spill] sm:$0xff] }
 0x1bc   : > { %7983 = vmatpush3.bf16.msra.mxu0 %v8678_v47  ;;  %v1572_v51 = vsel %vm1239_vm3, %v9877_v7, %v1571_v60  ;;  %v8695_v47 = vld [vmem:[%s11937_s3 + $0x448] sm:$0xff]   ;;  %v1602_v7 = vor.u32 %v10301_v43, %v1598_v38 }
 0x1bd   : > { %7984 = vmatprep.subr.bf16.mxu0 %v8682_v34  ;;  %v12024_v34 = vld [vmem:[#allocation8_spill] sm:$0xff] }
 0x1be   : > { %8035 = vmatpush3.bf16.msra.mxu1 %v8691_v36  ;;  %v1594_v58 = vsel %vm1107_vm0, %v1593_v44, %v12024_v34  ;;  %v1801_v36 = vshrl.u32 %v10194_v22, 16  ;;  %v10357_v44 = vshrl.u32 %v10250_v1, 16 }
 0x1bf   : > { %4517 = vmatmul.mubr.bf16.gmra.mxu0 %v1489_v5  ;;  %8036 = vmatprep.subr.bf16.mxu1 %v8693_v25  ;;  %v1607_v25 = vsel %vm1107_vm0, %v1602_v7, %v1606_v19  ;;  %v1574_v5 = vsel %vm1239_vm3, %v1571_v60, %v1573_v53  ;;  %v1813_v18 = vshrl.u32 %v1594_v58, 16  ;;  %v1816_v20 = vshll.u32 %v1594_v58, 16  ;;  %v12029_v58 = vld [vmem:[#allocation6_spill] sm:$0xff] }
 0x1c0   : > { %4524 = vmatprep.mubr.bf16.mxu0 %v12022_v16  ;;  %7985 = vmatpush3.bf16.msra.mxu0 %v8684_v57  ;;  %v1804_v57 = vshll.u32 %v10194_v22, 16  ;;  %v8697_v22 = vld [vmem:[%s11937_s3 + $0x408] sm:$0xff]   ;;  %v10354_v60 = vsel %vm1239_vm3, %v1573_v53, %v1575_v0  ;;  %12027 = vst [vmem:[#allocation21_spill] sm:$0xff] %v10357_v44  ;;  %v2105_v34 = vshrl.u32 %v1607_v25, 16  ;;  %v8701_v53 = vld [vmem:[%s11937_s3 + $0x400] sm:$0xff]   ;;  %v1809_v7 = vrot.slane %v12029_v58, 3 }
 0x1c1   : > { %7986 = vmatprep.subr.bf16.mxu0 %v8688_v4  ;;  %4598 = vmatmul.mubr.bf16.gmra.mxu1 %v12023_v17  ;;  %v12025_v4 = vld [vmem:[#allocation20_spill] sm:$0xff]  ;;  %v8704_v0 = vld [vmem:[%s11937_s3 + $0x4c0] sm:$0xff]  }
 0x1c2   : > { %4605 = vmatprep.mubr.bf16.mxu1 %v1572_v51  ;;  %8037 = vmatpush3.bf16.msra.mxu1 %v8696_v54  ;;  %v1532_v38 = vsel %vm1192_vm2, %v12025_v4, %v10295_v10  ;;  %v1540_v54 = vor.u32 %v1539_v61, %v1536_v45  ;;  %v12026_v16 = vld [vmem:[#allocation16_spill] sm:$0xff]  ;;  %v10364_v17 = vrot.slane %v1804_v57, 3  ;;  %v12028_v45 = vld [vmem:[#allocation7_spill] sm:$0xff]  ;;  %v1614_v57 = vrot.slane %v11967_v33, 1 }
 0x1c3   : > { %8038 = vmatprep.subr.bf16.mxu1 %v8698_v26  ;;  %v10351_v26 = vsel %vm1239_vm3, %v12026_v16, %v11968_v21  ;;  %v8703_v51 = vld [vmem:[%s11937_s3 + $0x488] sm:$0xff]   ;;  %v1808_v61 = vrot.slane %v12028_v45, 2  ;;  %v1818_v4 = vrot.slane %v1816_v20, 3  ;;  %v1555_v33 = vrot.slane %v10261_v24, 2  ;;  %v12033_v20 = vld [vmem:[#allocation9_spill] sm:$0xff] }
 0x1c4   : > { %7987 = vmatpush3.bf16.msra.mxu0 %v8689_v40  ;;  %v11970_v40 = vrot.slane %v10250_v1, 1  ;;  %v7097_v21 = vcombine.low %v10081_v35, %v10081_v35  ;;  %v1541_v28 = vsel %vm1192_vm2, %v10295_v10, %v1540_v54  ;;  %v2025_v24 = vrot.slane %v12035_v52, 3  ;;  %v8714_v35 = vld [vmem:[%s11937_s3 + $0x5f8] sm:$0xff]  }
 0x1c5   : > { %7988 = vmatprep.subr.bf16.mxu0 %v8695_v47  ;;  %v10362_v47 = vrot.slane %v1801_v36, 2  ;;  %v1610_v36 = vor.u32 %v10357_v44, %v1606_v19  ;;  %v12031_v19 = vld [vmem:[#allocation18_spill] sm:$0xff] }
 0x1c6   : > { %8039 = vmatpush3.bf16.msra.mxu1 %v8699_v41  ;;  %v1815_v41 = vrot.slane %v1813_v18, 2  ;;  %v10409_v52 = vrot.slane %v7097_v21, 1  ;;  %v12038_v21 = vrot.slane %v9959_v29, 1 }
 0x1c7   : > { %4525 = vmatmul.mubr.bf16.gmra.mxu0 %v1491_v42  ;;  %v2108_v42 = vshll.u32 %v1607_v25, 16  ;;  %8040 = vmatprep.subr.bf16.mxu1 %v8702_v3  ;;  %v1949_v3 = vrot.slane %v12033_v20, 3  ;;  %v2107_v25 = vrot.slane %v2105_v34, 2  ;;  %v1807_v31 = vor.u32 %v10364_v17, %v10362_v47 }
 0x1c8   : > { %4532 = vmatprep.mubr.bf16.mxu0 %v1532_v38  ;;  %7989 = vmatpush3.bf16.msra.mxu0 %v8697_v22  ;;  %v8706_v38 = vld [vmem:[%s11937_s3 + $0x578] sm:$0xff]   ;;  %v12030_v22 = vrot.slane %v9869_v9, 1  ;;  %v1810_v9 = vor.u32 %v1809_v7, %v1808_v61  ;;  %v1618_v34 = vor.u32 %v12036_v15, %v1614_v57  ;;  %v2177_v47 = vrot.slane %v10273_v13, 3 }
 0x1c9   : > { %7990 = vmatprep.subr.bf16.mxu0 %v8700_v37  ;;  %4606 = vmatmul.mubr.bf16.gmra.mxu1 %v12031_v19  ;;  %v12032_v37 = vld [vmem:[#allocation10_spill] sm:$0xff]  ;;  %v2110_v48 = vrot.slane %v2108_v42, 3  ;;  %v2101_v42 = vrot.slane %v9968_v8, 3 }
 0x1ca   : > { %v1627_v16 = vsel %vm1169_vm1, %v12030_v22, %v11970_v40  ;;  %v1948_v18 = vrot.slane %v12032_v37, 2  ;;  %4613 = vmatprep.mubr.bf16.mxu1 %v1574_v5  ;;  %8041 = vmatpush3.bf16.msra.mxu1 %v8703_v51  ;;  %v8705_v22 = vld [vmem:[%s11937_s3 + $0x480] sm:$0xff]   ;;  %v12034_v40 = vld [vmem:[#allocation12_spill] sm:$0xff]  ;;  %v1615_v5 = vsel %vm1107_vm0, %v1610_v36, %v1614_v57  ;;  %v1819_v51 = vor.u32 %v1818_v4, %v1815_v41 }
 0x1cb   : > { %v2024_v19 = vrot.slane %v12034_v40, 2  ;;  %8042 = vmatprep.subr.bf16.mxu1 %v8704_v0  ;;  %v2114_v10 = vshrl.u32 %v1627_v16, 16  ;;  %v2117_v54 = vshll.u32 %v1627_v16, 16  ;;  %v2100_v0 = vrot.slane %v10301_v43, 2 }
 0x1cc   : > { %7991 = vmatpush3.bf16.msra.mxu0 %v8701_v53  ;;  %v1950_v53 = vor.u32 %v1949_v3, %v1948_v18  ;;  %v2181_v36 = vshrl.u32 %v1615_v5, 16  ;;  %v2184_v41 = vshll.u32 %v1615_v5, 16  ;;  %v2176_v4 = vrot.slane %v10357_v44, 2 }
 0x1cd   : > { %8080 = vmatprep.subr.bf16.mxu0 %v8706_v38  ;;  %v2026_v17 = vor.u32 %v2025_v24, %v2024_v19  ;;  %v10414_v15 = vor.u32 %v2110_v48, %v2107_v25  ;;  %v2116_v61 = vrot.slane %v2114_v10, 2  ;;  %v2119_v7 = vrot.slane %v2117_v54, 3 }
 0x1ce   : > { %8043 = vmatpush3.bf16.msra.mxu1 %v8705_v22  ;;  %v12037_v57 = vrot.slane %v10157_v63, 1  ;;  %v12039_v38 = vrot.slane %v9959_v29, 2  ;;  %v2257_v18 = vshrl.u32 %v1618_v34, 16  ;;  %v2260_v3 = vshll.u32 %v1618_v34, 16 }
 0x1cf   : > { %4533 = vmatmul.mubr.bf16.gmra.mxu0 %v10325_v12  ;;  %8132 = vmatprep.subr.bf16.mxu1 %v8714_v35  ;;  %v1828_v48 = vsel %vm1294_vm5, %v1819_v51, %v9941_v62  ;;  %v2102_v25 = vor.u32 %v2101_v42, %v2100_v0  ;;  %v12040_v63 = vrot.slane %v10250_v1, 1  ;;  %v10434_v29 = vsel %vm1294_vm5, %v1810_v9, %v1950_v53  ;;  %v1065_v0 = vld [vmem:[#allocation2 + $0x18] sm:$0xe] }
 0x1d0   : > { %4540 = vmatprep.mubr.bf16.mxu0 %v1541_v28  ;;  %v1495_v12 = vsel %vm1169_vm1, %v12038_v21, %v12037_v57  ;;  %v1556_v16 = vsel %vm1239_vm3, %v12039_v38, %v1555_v33  ;;  %v1811_v28 = vsel %vm1294_vm5, %v1807_v31, %v1810_v9  ;;  %v2183_v33 = vrot.slane %v2181_v36, 2 }
 0x1d1   : > { %4614 = vmatmul.mubr.bf16.gmra.mxu1 %v10351_v26  ;;  %v1629_v22 = vsel %vm1169_vm1, %v12040_v63, %v10409_v52  ;;  %v2186_v19 = vrot.slane %v2184_v41, 3  ;;  %v2178_v24 = vor.u32 %v2177_v47, %v2176_v4  ;;  %v10437_v26 = vsel %vm1294_vm5, %v1950_v53, %v2026_v17 }
 0x1d2   : > { %4621 = vmatprep.mubr.bf16.mxu1 %v10354_v60  ;;  %v10442_v62 = vsel %vm1294_vm5, %v10040_v56, %v10414_v15  ;;  %v10444_v31 = vor.u32 %v2119_v7, %v2116_v61  ;;  %v1696_v35 = vrot.slane %v9456_v39, 6  ;;  %v2259_v5 = vrot.slane %v2257_v18, 2 }
 0x1d3   : > { %v2262_v60 = vrot.slane %v2260_v3, 3  ;;  %v2190_v10 = vshrl.u32 %v1629_v22, 16  ;;  %v2275_v9 = vshrl.u32 %v10137_v30, 16  ;;  %v10449_v54 = vsel %vm1294_vm5, %v2026_v17, %v2102_v25 }
 0x1d4   : > { %v2193_v51 = vshll.u32 %v1629_v22, 16  ;;  %v2278_v34 = vshll.u32 %v10137_v30, 16  ;;  %v1695_v53 = vrot.slane %v9393_v55, 6  ;;  %v2187_v56 = vor.u32 %v2186_v19, %v2183_v33  ;;  %v8707_v22 = vld [vmem:[%s11937_s3 + $0x538] sm:$0xff]  }
 0x1d5   : > { %v10454_v42 = vsel %vm1294_vm5, %v2102_v25, %v2178_v24  ;;  %v12041_v36 = vshrl.u32 %v10304_v46, 16  ;;  %v12042_v4 = vshll.u32 %v10304_v46, 16  ;;  %v10463_v17 = vsel %vm1294_vm5, %v10070_v23, %v10444_v31 }
 0x1d6   : > { %v1697_v55 = vsel %vm1694_vm8, %v1695_v53, %v1696_v35  ;;  %v2266_v30 = vshrl.u32 %v10409_v52, 16  ;;  %v2269_v61 = vshll.u32 %v10409_v52, 16  ;;  %v2263_v7 = vor.u32 %v2262_v60, %v2259_v5  ;;  %v8708_v60 = vld [vmem:[%s11937_s3 + $0x570] sm:$0xff]  }
 0x1d7   : > { %4541 = vmatmul.mubr.bf16.gmra.mxu0 %v1495_v12  ;;  %v2252_v41 = vrot.slane %v12041_v36, 2  ;;  %v2253_v47 = vrot.slane %v12042_v4, 3  ;;  %v2192_v57 = vrot.slane %v2190_v10, 2  ;;  %v2277_v21 = vrot.slane %v2275_v9, 2  ;;  %v10470_v12 = vld [vmem:[#allocation2 + $0x1c] sm:$0xf] }
 0x1d8   : > { %4662 = vmatprep.mubr.bf16.mxu0 %v1828_v48  ;;  %v10473_v46 = vcombine.low %v1065_v0, %v10470_v12  ;;  %v2195_v38 = vrot.slane %v2193_v51, 3  ;;  %v2280_v23 = vrot.slane %v2278_v34, 3  ;;  %v1881_v18 = vshrl.u32 %v1695_v53, 16 }
 0x1d9   : > { %4622 = vmatmul.mubr.bf16.gmra.mxu1 %v1556_v16  ;;  %v1884_v3 = vshll.u32 %v1695_v53, 16  ;;  %v2254_v48 = vor.u32 %v2253_v47, %v2252_v41  ;;  %v1889_v25 = vshrl.u32 %v1697_v55, 16  ;;  %v1666_v63 = vrot.slane %v12032_v37, 5  ;;  %v8715_v41 = vld [vmem:[%s11937_s3 + $0x5b8] sm:$0xff]  }
 0x1da   : > { %4743 = vmatprep.mubr.bf16.mxu1 %v10002_v2  ;;  %v1667_v52 = vrot.slane %v12033_v20, 6  ;;  %v1892_v33 = vshll.u32 %v1697_v55, 16  ;;  %v2268_v19 = vrot.slane %v2266_v30, 2  ;;  %v2271_v5 = vrot.slane %v2269_v61, 3  ;;  %v8709_v30 = vld [vmem:[%s11937_s3 + $0x530] sm:$0xff]  }
 0x1db   : > { %v11974_v16 = vrot.slane %v9456_v39, 7  ;;  %v1753_v2 = vrot.slane %v10473_v46, 7  ;;  %v1663_v10 = vrot.slane %v12028_v45, 5  ;;  %v1664_v9 = vrot.slane %v12029_v58, 6 }
 0x1dc   : > { %v2196_v34 = vor.u32 %v2195_v38, %v2192_v57  ;;  %v2281_v53 = vor.u32 %v2280_v23, %v2277_v21  ;;  %v10488_v0 = vrot.slane %v1881_v18, 2  ;;  %v10490_v36 = vrot.slane %v1884_v3, 3 }
 0x1dd   : > { %v10497_v4 = vsel %vm1294_vm5, %v10414_v15, %v2187_v56  ;;  %v10500_v45 = vsel %vm1294_vm5, %v2187_v56, %v2263_v7  ;;  %v10503_v58 = vsel %vm1294_vm5, %v2178_v24, %v2254_v48  ;;  %v10505_v47 = vor.u32 %v1667_v52, %v1666_v63  ;;  %v8716_v15 = vld [vmem:[%s11937_s3 + $0x5f0] sm:$0xff]  }
 0x1de   : > { %v1891_v56 = vrot.slane %v1889_v25, 2  ;;  %v1894_v61 = vrot.slane %v1892_v33, 3  ;;  %v2272_v7 = vor.u32 %v2271_v5, %v2268_v19  ;;  %v10517_v24 = vsel %vm1752_vm9, %v1753_v2, %v11974_v16 }
 0x1df   : > { %v7576_v51 = vpop.f32.mrf.mxu0  ;;  %4663 = vmatmul.mubr.bf16.vlgmr.msra.gmra.mxu0 %v1811_v28  ;;  %v1915_v21 = vshrl.u32 %v1753_v2, 16  ;;  %v10522_v38 = vor.u32 %v1664_v9, %v1663_v10  ;;  %v11973_v23 = vrot.slane %v9515_v32, 6  ;;  %v10528_v48 = vsel %vm1294_vm5, %v10444_v31, %v2196_v34 }
 0x1e0   : > { %8081 = vmatpush3.bf16.msra.mxu0 %v8707_v22  ;;  %4670 = vmatprep.mubr.bf16.mxu0 %v9953_v50  ;;  %v8710_v50 = vld [vmem:[%s11937_s3 + $0x568] sm:$0xff]   ;;  %v10532_v25 = vsel %vm1294_vm5, %v10176_v27, %v2281_v53  ;;  %v1918_v52 = vshll.u32 %v1753_v2, 16  ;;  %v1713_v33 = vshrl.u32 %v10473_v46, 16  ;;  %v1716_v31 = vshll.u32 %v10473_v46, 16  ;;  %v8712_v53 = vld [vmem:[%s11937_s3 + $0x560] sm:$0xff]  }
 0x1e1   : > { %v7577_v28 = vpop.f32.mrf.mxu0  ;;  %v7628_v55 = vpop.f32.mrf.mxu1  ;;  %8082 = vmatprep.subr.bf16.mxu0 %v8708_v60  ;;  %4744 = vmatmul.mubr.bf16.vlgmr.msra.gmra.mxu1 %v9962_v49  ;;  %v8718_v49 = vld [vmem:[%s11937_s3 + $0x5b0] sm:$0xff]   ;;  %v1669_v27 = vsel %vm1631_vm6, %v10522_v38, %v10505_v47  ;;  %v10548_v60 = vor.u32 %v1894_v61, %v1891_v56  ;;  %v10551_v2 = vsel %vm1294_vm5, %v2196_v34, %v2272_v7  ;;  %v1923_v10 = vshrl.u32 %v10517_v24, 16 }
 0x1e2   : > { %v7578_v57 = vadd.f32 %v7577_v28, %v7576_v51  ;;  %4751 = vmatprep.mubr.bf16.mxu1 %v10043_v59  ;;  %8133 = vmatpush3.bf16.msra.mxu1 %v8715_v41  ;;  %v8711_v59 = vld [vmem:[%s11937_s3 + $0x528] sm:$0xff]   ;;  %v1926_v46 = vshll.u32 %v10517_v24, 16  ;;  %v10563_v28 = vrot.slane %v1915_v21, 2  ;;  %v1699_v34 = vsel %vm1694_vm8, %v1696_v35, %v11973_v23 }
 0x1e3   : > { %v7579_v18 = vpop.f32.mrf.mxu0  ;;  %v7629_v3 = vpop.f32.mrf.mxu1  ;;  %8134 = vmatprep.subr.bf16.mxu1 %v8716_v15  ;;  %v8721_v41 = vld [vmem:[%s11937_s3 + $0x5e8] sm:$0xff]   ;;  %v10570_v15 = vrot.slane %v1918_v52, 3  ;;  %v1864_v56 = vshrl.u32 %v10522_v38, 16  ;;  %v1867_v61 = vshll.u32 %v10522_v38, 16  ;;  %v1872_v7 = vshrl.u32 %v1669_v27, 16  ;;  %v8713_v38 = vld [vmem:[%s11937_s3 + $0x520] sm:$0xff]  }
 0x1e4   : > { %v7630_v22 = vadd.f32 %v7629_v3, %v7628_v55  ;;  %8083 = vmatpush3.bf16.msra.mxu0 %v8709_v30  ;;  %v1720_v35 = vrot.slane %v12032_v37, 6  ;;  %v1721_v21 = vrot.slane %v12033_v20, 7  ;;  %v1989_v52 = vshrl.u32 %v1699_v34, 16 }
 0x1e5   : > { %v7580_v19 = vpop.f32.mrf.mxu0  ;;  %v7631_v5 = vpop.f32.mrf.mxu1  ;;  %8084 = vmatprep.subr.bf16.mxu0 %v8710_v50  ;;  %v1875_v50 = vshll.u32 %v1669_v27, 16  ;;  %v1718_v27 = vrot.slane %v1716_v31, 7  ;;  %v1928_v16 = vrot.slane %v1926_v46, 3  ;;  %v8719_v46 = vld [vmem:[%s11937_s3 + $0x518] sm:$0xff]   ;;  %vm8959_vm0 = vmmov 0  }
 0x1e6   : > { %v10555_v9 = vadd.f32 %v7630_v22, %v7578_v57  ;;  %v7581_v51 = vadd.f32 %v7580_v19, %v7579_v18  ;;  %8135 = vmatpush3.bf16.msra.mxu1 %v8718_v49  ;;  %v8723_v57 = vld [vmem:[%s11937_s3 + $0x5a8] sm:$0xff]   ;;  %v1992_v22 = vshll.u32 %v1699_v34, 16  ;;  %v1715_v49 = vrot.slane %v1713_v33, 6 }
 0x1e7   : > { %v7582_v55 = vpop.f32.mrf.mxu0  ;;  %v7632_v30 = vpop.f32.mrf.mxu1  ;;  %4671 = vmatmul.mubr.bf16.gmra.mxu0 %v10434_v29  ;;  %v8726_v29 = vld [vmem:[%s11937_s3 + $0x5e0] sm:$0xff]   ;;  %8136 = vmatprep.subr.bf16.mxu1 %v8721_v41  ;;  %v10594_v34 = vrot.slane %v1864_v56, 2  ;;  %v10596_v33 = vrot.slane %v1867_v61, 3  ;;  %v10602_v41 = vor.u32 %v1721_v21, %v1720_v35  ;;  %v1991_v56 = vrot.slane %v1989_v52, 2 }
 0x1e8   : > { %v7633_v24 = vadd.f32 %v7632_v30, %v7631_v5  ;;  %4678 = vmatprep.mubr.bf16.mxu0 %v10053_v6  ;;  %8085 = vmatpush3.bf16.msra.mxu0 %v8711_v59  ;;  %v8717_v6 = vld [vmem:[%s11937_s3 + $0x558] sm:$0xff]   ;;  %v1925_v59 = vrot.slane %v1923_v10, 2  ;;  %v1756_v30 = vrot.slane %v9515_v32, 7  ;;  %v8727_v10 = vld [vmem:[%s11937_s3 + $0x5a0] sm:$0xff]   ;;  %v1670_v61 = vrot.slane %v12034_v40, 5 }
 0x1e9   : > { %v7583_v18 = vpop.f32.mrf.mxu0  ;;  %v7634_v3 = vpop.f32.mrf.mxu1  ;;  %8086 = vmatprep.subr.bf16.mxu0 %v8712_v53  ;;  %4752 = vmatmul.mubr.bf16.gmra.mxu1 %v9975_v14  ;;  %v1877_v53 = vrot.slane %v1875_v50, 3  ;;  %v8729_v50 = vld [vmem:[%s11937_s3 + $0x5d8] sm:$0xff]   ;;  %v12043_v35 = vrot.slane %v9456_v39, 7  ;;  %v1870_v39 = vor.u32 %v10596_v33, %v10594_v34  ;;  %vm6871_vm1 = vcmask 523264  }
 0x1ea   : > { %v10587_v19 = vadd.f32 %v7633_v24, %v7581_v51  ;;  %v7584_v5 = vadd.f32 %v7583_v18, %v7582_v55  ;;  %4759 = vmatprep.mubr.bf16.mxu1 %v10079_v11  ;;  %8137 = vmatpush3.bf16.msra.mxu1 %v8723_v57  ;;  %v1874_v51 = vrot.slane %v1872_v7, 2  ;;  %v1994_v11 = vrot.slane %v1992_v22, 3  ;;  %v8724_v57 = vld [vmem:[%s11937_s3 + $0x550] sm:$0xff]   ;;  %v12044_v18 = vld [vmem:[#allocation11_spill] sm:$0xff] }
 0x1eb   : > { %v7585_v23 = vpop.f32.mrf.mxu0  ;;  %v7635_v63 = vpop.f32.mrf.mxu1  ;;  %8138 = vmatprep.subr.bf16.mxu1 %v8726_v29  ;;  %v1757_v21 = vsel %vm1752_vm9, %v12043_v35, %v1756_v30  ;;  %v1921_v22 = vor.u32 %v10570_v15, %v10563_v28 }
 0x1ec   : > { %v7636_v31 = vadd.f32 %v7635_v63, %v7634_v3  ;;  %8087 = vmatpush3.bf16.msra.mxu0 %v8713_v38  ;;  %v10607_v63 = vor.u32 %v1718_v27, %v1715_v49  ;;  %v1671_v3 = vrot.slane %v12044_v18, 6  ;;  %v10633_v49 = vor.u32 %v1928_v16, %v1925_v59 }
 0x1ed   : > { %v7586_v14 = vpop.f32.mrf.mxu0  ;;  %v7637_v55 = vpop.f32.mrf.mxu1  ;;  %8088 = vmatprep.subr.bf16.mxu0 %v8717_v6  ;;  %v1725_v16 = vrot.slane %v12044_v18, 7  ;;  %v8733_v6 = vld [vmem:[%s11937_s3 + $0x5d0] sm:$0xff]   ;;  %v10653_v59 = vor.u32 %v1877_v53, %v1874_v51  ;;  %v10655_v34 = vor.u32 %v1994_v11, %v1991_v56  ;;  %v2007_v33 = vshrl.u32 %v1757_v21, 16  ;;  %v12047_v11 = vld [vmem:[#allocation19_spill] sm:$0xff] }
 0x1ee   : > { %v10610_v24 = vadd.f32 %v7636_v31, %v7584_v5  ;;  %v7587_v7 = vadd.f32 %v7586_v14, %v7585_v23  ;;  %v12045_v23 = vor.u32 %v10490_v36, %v10488_v0  ;;  %8139 = vmatpush3.bf16.msra.mxu1 %v8727_v10  ;;  %v8731_v5 = vld [vmem:[%s11937_s3 + $0x598] sm:$0xff]   ;;  %v1723_v0 = vsel %vm1711_vm10, %v10607_v63, %v10602_v41  ;;  %v8730_v14 = vld [vmem:[%s11937_s3 + $0x548] sm:$0xff]  }
 0x1ef   : > { %v7588_v38 = vpop.f32.mrf.mxu0  ;;  %v7638_v29 = vpop.f32.mrf.mxu1  ;;  %4679 = vmatmul.mubr.bf16.gmra.mxu0 %v10437_v26  ;;  %v1724_v36 = vrot.slane %v12034_v40, 6  ;;  %v8725_v26 = vld [vmem:[%s11937_s3 + $0x510] sm:$0xff]   ;;  %v2010_v31 = vshll.u32 %v1757_v21, 16  ;;  %8140 = vmatprep.subr.bf16.mxu1 %v8729_v50  ;;  %v1906_v53 = vshrl.u32 %v1723_v0, 16  ;;  %v1909_v56 = vshll.u32 %v1723_v0, 16  ;;  %v8732_v0 = vld [vmem:[%s11937_s3 + $0x508] sm:$0xff]  }
 0x1f0   : > { %v10629_v52 = vsel %vm1294_vm5, %v12045_v23, %v10548_v60  ;;  %v7639_v27 = vadd.f32 %v7638_v29, %v7637_v55  ;;  %4686 = vmatprep.mubr.bf16.mxu0 %v10442_v62  ;;  %8089 = vmatpush3.bf16.msra.mxu0 %v8719_v46  ;;  %v10662_v55 = vor.u32 %v1671_v3, %v1670_v61  ;;  %v12046_v46 = vld [vmem:[#allocation23_spill] sm:$0xff]  ;;  %v11976_v29 = vrot.slane %v12047_v11, 6  ;;  %v12048_v21 = vld [vmem:[#allocation24_spill] sm:$0xff] }
 0x1f1   : > { %v7589_v28 = vpop.f32.mrf.mxu0  ;;  %v7640_v15 = vpop.f32.mrf.mxu1  ;;  %8090 = vmatprep.subr.bf16.mxu0 %v8724_v57  ;;  %4760 = vmatmul.mubr.bf16.gmra.mxu1 %v12046_v46  ;;  %v8734_v50 = vld [vmem:[%s11937_s3 + $0x590] sm:$0xff]   ;;  %v10673_v61 = vsel %vm1294_vm5, %v1921_v22, %v10633_v49  ;;  %v1898_v3 = vshrl.u32 %v10607_v63, 16  ;;  %v2009_v22 = vrot.slane %v2007_v33, 2 }
 0x1f2   : > { %v10657_v10 = vadd.f32 %v7639_v27, %v7587_v7  ;;  %v7590_v62 = vadd.f32 %v7589_v28, %v7588_v38  ;;  %v11975_v7 = vrot.slane %v12047_v11, 7  ;;  %4767 = vmatprep.mubr.bf16.mxu1 %v12048_v21  ;;  %8141 = vmatpush3.bf16.msra.mxu1 %v8731_v5  ;;  %v10676_v38 = vor.u32 %v1725_v16, %v1724_v36  ;;  %v8735_v16 = vld [vmem:[%s11937_s3 + $0x540] sm:$0xff]  }
 0x1f3   : > { %v7591_v35 = vpop.f32.mrf.mxu0  ;;  %v7641_v51 = vpop.f32.mrf.mxu1  ;;  %8142 = vmatprep.subr.bf16.mxu1 %v8733_v6  ;;  %v10683_v5 = vsel %vm1294_vm5, %v1870_v39, %v10653_v59  ;;  %v1901_v28 = vshll.u32 %v10607_v63, 16  ;;  %v10697_v39 = vsel %vm1294_vm5, %v10548_v60, %v10655_v34  ;;  %v1673_v63 = vsel %vm1631_vm6, %v10505_v47, %v10662_v55  ;;  %v8738_v47 = vld [vmem:[%s11937_s3 + $0x588] sm:$0xff]  }
 0x1f4   : > { %v7642_v57 = vadd.f32 %v7641_v51, %v7640_v15  ;;  %8091 = vmatpush3.bf16.msra.mxu0 %v8725_v26  ;;  %v2012_v15 = vrot.slane %v2010_v31, 3  ;;  %v8737_v26 = vld [vmem:[%s11937_s3 + $0x5c8] sm:$0xff]   ;;  %v1908_v31 = vrot.slane %v1906_v53, 2  ;;  %v1759_v60 = vsel %vm1752_vm9, %v1756_v30, %v11975_v7 }
 0x1f5   : > { %v7592_v23 = vpop.f32.mrf.mxu0  ;;  %v7643_v27 = vpop.f32.mrf.mxu1  ;;  %8092 = vmatprep.subr.bf16.mxu0 %v8730_v14  ;;  %v12049_v14 = vrot.slane %v9515_v32, 6  ;;  %v1727_v53 = vsel %vm1711_vm10, %v10602_v41, %v10676_v38  ;;  %v1675_v21 = vrot.slane %v9968_v8, 6 }
 0x1f6   : > { %v10686_v46 = vadd.f32 %v7642_v57, %v7590_v62  ;;  %v7593_v36 = vadd.f32 %v7592_v23, %v7591_v35  ;;  %v1911_v62 = vrot.slane %v1909_v56, 3  ;;  %8143 = vmatpush3.bf16.msra.mxu1 %v8734_v50  ;;  %v1674_v56 = vrot.slane %v10301_v43, 5  ;;  %v8740_v57 = vld [vmem:[%s11937_s3 + $0x5c0] sm:$0xff]  }
 0x1f7   : > { %v7594_v6 = vpop.f32.mrf.mxu0  ;;  %v7644_v33 = vpop.f32.mrf.mxu1  ;;  %v1701_v35 = vsel %vm1694_vm8, %v12049_v14, %v11976_v29  ;;  %4687 = vmatmul.mubr.bf16.gmra.mxu0 %v10449_v54  ;;  %v8736_v54 = vld [vmem:[%s11937_s3 + $0x500] sm:$0xff]   ;;  %v1900_v50 = vrot.slane %v1898_v3, 2  ;;  %v1903_v23 = vrot.slane %v1901_v28, 3  ;;  %v10728_v41 = vor.u32 %v2012_v15, %v2009_v22  ;;  %8144 = vmatprep.subr.bf16.mxu1 %v8737_v26 }
 0x1f8   : > { %v7645_v51 = vadd.f32 %v7644_v33, %v7643_v27  ;;  %4694 = vmatprep.mubr.bf16.mxu0 %v10497_v4  ;;  %8093 = vmatpush3.bf16.msra.mxu0 %v8732_v0  ;;  %v1980_v27 = vshrl.u32 %v1673_v63, 16  ;;  %v10735_v4 = vld [vmem:[%s11937_s3 + $0x638] sm:$0xff]   ;;  %v1983_v0 = vshll.u32 %v1673_v63, 16  ;;  %v2065_v7 = vshrl.u32 %v1701_v35, 16  ;;  %v8741_v26 = vld [vmem:[%s11937_s3 + $0x580] sm:$0xff]  }
 0x1f9   : > { %v7595_v32 = vpop.f32.mrf.mxu0  ;;  %v7646_v30 = vpop.f32.mrf.mxu1  ;;  %8094 = vmatprep.subr.bf16.mxu0 %v8735_v16  ;;  %4768 = vmatmul.mubr.bf16.gmra.mxu1 %v10463_v17  ;;  %v10738_v28 = vor.u32 %v1911_v62, %v1908_v31  ;;  %v2068_v22 = vshll.u32 %v1701_v35, 16  ;;  %v1998_v15 = vshrl.u32 %v1727_v53, 16  ;;  %v2086_v63 = vshll.u32 %v1759_v60, 16 }
 0x1fa   : > { %v10730_v33 = vadd.f32 %v7645_v51, %v7593_v36  ;;  %v7596_v14 = vadd.f32 %v7595_v32, %v7594_v6  ;;  %v2083_v36 = vshrl.u32 %v1759_v60, 16  ;;  %v12050_v51 = vld [vmem:[#allocation25_spill] sm:$0xff]  ;;  %8145 = vmatpush3.bf16.msra.mxu1 %v8738_v47  ;;  %v2001_v6 = vshll.u32 %v1727_v53, 16 }
 0x1fb   : > { %v7597_v29 = vpop.f32.mrf.mxu0  ;;  %v7647_v3 = vpop.f32.mrf.mxu1  ;;  %4775 = vmatprep.mubr.bf16.mxu1 %v12050_v51  ;;  %v10744_v32 = vor.u32 %v1675_v21, %v1674_v56  ;;  %8146 = vmatprep.subr.bf16.mxu1 %v8740_v57  ;;  %v1904_v31 = vor.u32 %v1903_v23, %v1900_v50  ;;  %v10749_v62 = vsel %vm1294_vm5, %v10633_v49, %v10728_v41  ;;  %v1982_v35 = vrot.slane %v1980_v27, 2 }
 0x1fc   : > { %v7648_v16 = vadd.f32 %v7647_v3, %v7646_v30  ;;  %8095 = vmatpush3.bf16.msra.mxu0 %v8736_v54  ;;  %v11978_v47 = vrot.slane %v10250_v1, 6  ;;  %v1985_v60 = vrot.slane %v1983_v0, 3  ;;  %v2067_v53 = vrot.slane %v2065_v7, 2  ;;  %v1063_v7 = vld [vmem:[#allocation2 + $0x44] sm:$0xf] }
 0x1fd   : > { %v7598_v17 = vpop.f32.mrf.mxu0  ;;  %v7649_v18 = vpop.f32.mrf.mxu1  ;;  %8379 = vmatprep.subr.bf16.mxu0 %v10735_v4  ;;  %v10757_v54 = vsel %vm1294_vm5, %v1904_v31, %v10738_v28  ;;  %v2070_v57 = vrot.slane %v2068_v22, 3  ;;  %v2000_v50 = vrot.slane %v1998_v15, 2  ;;  %v2085_v49 = vrot.slane %v2083_v36, 2 }
 0x1fe   : > { %v10752_v30 = vadd.f32 %v7648_v16, %v7596_v14  ;;  %v7599_v3 = vadd.f32 %v7598_v17, %v7597_v29  ;;  %8147 = vmatpush3.bf16.msra.mxu1 %v8741_v26  ;;  %v2003_v27 = vrot.slane %v2001_v6, 3  ;;  %v2088_v14 = vrot.slane %v2086_v63, 3 }
 0x1ff   : > { %v7600_v56 = vpop.f32.mrf.mxu0  ;;  %v7650_v21 = vpop.f32.mrf.mxu1  ;;  %4695 = vmatmul.mubr.bf16.gmra.mxu0 %v10454_v42  ;;  %v1677_v29 = vsel %vm1631_vm6, %v10662_v55, %v10744_v32  ;;  %v12051_v22 = vrot.slane %v12047_v11, 6  ;;  %v1729_v42 = vrot.slane %v9968_v8, 7  ;;  %v1678_v55 = vrot.slane %v10357_v44, 5 }
 0x200   : > { %v7651_v23 = vadd.f32 %v7650_v21, %v7649_v18  ;;  %4702 = vmatprep.mubr.bf16.mxu0 %v10500_v45  ;;  %v1728_v18 = vrot.slane %v10301_v43, 6  ;;  %v1679_v45 = vrot.slane %v10273_v13, 6  ;;  %v10777_v63 = vor.u32 %v1985_v60, %v1982_v35  ;;  %v8893_v21 = vld [vmem:[#allocation2 + $0x40] sm:$0xf] }
 0x201   : > { %v7601_v0 = vpop.f32.mrf.mxu0  ;;  %v1703_v15 = vsel %vm1694_vm8, %v12051_v22, %v11978_v47  ;;  %v7652_v26 = vpop.f32.mrf.mxu1  ;;  %4776 = vmatmul.mubr.bf16.gmra.mxu1 %v10528_v48  ;;  %v2056_v17 = vshrl.u32 %v1677_v29, 16  ;;  %v2059_v31 = vshll.u32 %v1677_v29, 16  ;;  %v10779_v22 = vcombine.low %v8893_v21, %v1063_v7 }
 0x202   : > { %v10772_v51 = vadd.f32 %v7651_v23, %v7599_v3  ;;  %v7602_v16 = vadd.f32 %v7601_v0, %v7600_v56  ;;  %4783 = vmatprep.mubr.bf16.mxu1 %v10532_v25  ;;  %v10782_v3 = vor.u32 %v2070_v57, %v2067_v53  ;;  %v10784_v56 = vor.u32 %v2003_v27, %v2000_v50 }
 0x203   : > { %v7603_v6 = vpop.f32.mrf.mxu0  ;;  %v1732_v23 = vrot.slane %v10357_v44, 6  ;;  %v1733_v0 = vrot.slane %v10273_v13, 7  ;;  %v7653_v47 = vpop.f32.mrf.mxu1  ;;  %v10788_v36 = vor.u32 %v2088_v14, %v2085_v49  ;;  %v2141_v35 = vshrl.u32 %v1703_v15, 16 }
 0x204   : > { %12052 = vst [vmem:[#allocation13_spill] sm:$0xff] %v10772_v51  ;;  %v2144_v60 = vshll.u32 %v1703_v15, 16  ;;  %v1730_v29 = vor.u32 %v1729_v42, %v1728_v18  ;;  %v7654_v51 = vadd.f32 %v7653_v47, %v7652_v26  ;;  %v12053_v21 = vrot.slane %v10250_v1, 7 }
 0x205   : > { %v7604_v48 = vpop.f32.mrf.mxu0  ;;  %v12054_v25 = vrot.slane %v12047_v11, 7  ;;  %v10795_v57 = vor.u32 %v1679_v45, %v1678_v55  ;;  %v7655_v50 = vpop.f32.mrf.mxu1  ;;  %v10800_v27 = vsel %vm1294_vm5, %v10653_v59, %v10777_v63  ;;  %v2058_v49 = vrot.slane %v2056_v17, 2 }
 0x206   : > { %v7605_v7 = vadd.f32 %v7604_v48, %v7603_v6  ;;  %v2061_v14 = vrot.slane %v2059_v31, 3  ;;  %v11980_v15 = vrot.slane %v10779_v22, 6  ;;  %v10803_v47 = vadd.f32 %v7654_v51, %v7602_v16 }
 0x207   : > { %v1761_v53 = vsel %vm1752_vm9, %v12054_v25, %v12053_v21  ;;  %v7606_v18 = vpop.f32.mrf.mxu0  ;;  %4703 = vmatmul.mubr.bf16.gmra.mxu0 %v10503_v58  ;;  %v10809_v11 = vsel %vm1294_vm5, %v10655_v34, %v10782_v3  ;;  %v10814_v42 = vsel %vm1294_vm5, %v10738_v28, %v10784_v56  ;;  %v10816_v59 = vor.u32 %v1733_v0, %v1732_v23  ;;  %v7656_v55 = vpop.f32.mrf.mxu1 }
 0x208   : > { %12055 = vst [vmem:[#allocation14_spill] sm:$0xff] %v10803_v47  ;;  %4824 = vmatprep.mubr.bf16.mxu0 %v10629_v52  ;;  %v10822_v51 = vsel %vm1294_vm5, %v10728_v41, %v10788_v36  ;;  %v1731_v58 = vsel %vm1711_vm10, %v10676_v38, %v1730_v29  ;;  %v2159_v34 = vshrl.u32 %v1761_v53, 16  ;;  %v11979_v16 = vrot.slane %v10779_v22, 7 }
 0x209   : > { %v7657_v45 = vadd.f32 %v7656_v55, %v7655_v50  ;;  %v7607_v26 = vpop.f32.mrf.mxu0  ;;  %v10827_v28 = vrot.slane %v2141_v35, 2  ;;  %v10829_v6 = vrot.slane %v2144_v60, 3  ;;  %v1681_v52 = vsel %vm1631_vm6, %v10744_v32, %v10795_v57  ;;  %v7658_v31 = vpop.f32.mrf.mxu1  ;;  %4784 = vmatmul.mubr.bf16.gmra.mxu1 %v10551_v2 }
 0x20a   : > { %v7608_v17 = vadd.f32 %v7607_v26, %v7606_v18  ;;  %v10835_v41 = vor.u32 %v2061_v14, %v2058_v49  ;;  %v2162_v38 = vshll.u32 %v1761_v53, 16  ;;  %v12056_v23 = vrot.slane %v10250_v1, 6  ;;  %4905 = vmatprep.mubr.bf16.mxu1 %v10673_v61  ;;  %v8743_v61 = vld [vmem:[%s11937_s3 + $0x630] sm:$0xff]  }
 0x20b   : > { %v10842_v48 = vadd.f32 %v7657_v45, %v7605_v7  ;;  %v7609_v35 = vpop.f32.mrf.mxu0  ;;  %v2074_v60 = vshrl.u32 %v1731_v58, 16  ;;  %v2077_v32 = vshll.u32 %v1731_v58, 16  ;;  %v1735_v21 = vsel %vm1711_vm10, %v1730_v29, %v10816_v59  ;;  %v7659_v2 = vpop.f32.mrf.mxu1 }
 0x20c   : > { %v1705_v0 = vsel %vm1694_vm8, %v12056_v23, %v11980_v15  ;;  %v2161_v25 = vrot.slane %v2159_v34, 2  ;;  %v2132_v50 = vshrl.u32 %v1681_v52, 16  ;;  %v2135_v53 = vshll.u32 %v1681_v52, 16  ;;  %v10861_v23 = vld [vmem:[#allocation2 + $0x48] ss:$0 sps:$4 sm:$0x11]  }
 0x20d   : > { %12057 = vst [vmem:[#allocation22_spill] sm:$0xff] %v10842_v48  ;;  %v12058_v49 = vrot.slane %v10250_v1, 7  ;;  %v7660_v7 = vadd.f32 %v7659_v2, %v7658_v31  ;;  %v7610_v18 = vpop.f32.mrf.mxu0  ;;  %v2217_v55 = vshrl.u32 %v1705_v0, 16  ;;  %v10856_v58 = vshrl.u32 %v10779_v22, 16  ;;  %v7661_v45 = vpop.f32.mrf.mxu1 }
 0x20e   : > { %v10859_v29 = vshll.u32 %v10779_v22, 16  ;;  %v7611_v34 = vadd.f32 %v7610_v18, %v7609_v35  ;;  %v2164_v26 = vrot.slane %v2162_v38, 3  ;;  %v2220_v52 = vshll.u32 %v1705_v0, 16 }
 0x20f   : > { %v1763_v14 = vsel %vm1752_vm9, %v12058_v49, %v11979_v16  ;;  %v2150_v1 = vshrl.u32 %v1735_v21, 16  ;;  %v10863_v31 = vadd.f32 %v7660_v7, %v7608_v17  ;;  %v7680_v2 = vpop.f32.mrf.mxu0  ;;  %4825 = vmatmul.mubr.bf16.vlgmr.msra.gmra.mxu0 %v10683_v5  ;;  %v2153_v49 = vshll.u32 %v1735_v21, 16  ;;  %v7662_v48 = vpop.f32.mrf.mxu1  ;;  %v8744_v17 = vld [vmem:[%s11937_s3 + $0x628] sm:$0xff]  }
 0x210   : > { %v2235_v16 = vshrl.u32 %v1763_v14, 16  ;;  %v2238_v15 = vshll.u32 %v1763_v14, 16  ;;  %8380 = vmatpush3.bf16.msra.mxu0 %v10735_v4  ;;  %4832 = vmatprep.mubr.bf16.mxu0 %v10697_v39  ;;  %v2076_v35 = vrot.slane %v2074_v60, 2  ;;  %v2079_v18 = vrot.slane %v2077_v32, 3 }
 0x211   : > { %12059 = vst [vmem:[#allocation15_spill] sm:$0xff] %v10863_v31  ;;  %v2134_v38 = vrot.slane %v2132_v50, 2  ;;  %v2137_v0 = vrot.slane %v2135_v53, 3  ;;  %v7663_v47 = vadd.f32 %v7662_v48, %v7661_v45  ;;  %v7681_v13 = vpop.f32.mrf.mxu0  ;;  %8381 = vmatprep.subr.bf16.mxu0 %v8743_v61  ;;  %v2219_v5 = vrot.slane %v2217_v55, 2  ;;  %v7732_v4 = vpop.f32.mrf.mxu1  ;;  %4906 = vmatmul.mubr.bf16.vlgmr.msra.gmra.mxu1 %v10757_v54 }
 0x212   : > { %v1685_v21 = vrot.slane %v10856_v58, 5  ;;  %v1688_v14 = vrot.slane %v10859_v29, 6  ;;  %v7682_v7 = vadd.f32 %v7681_v13, %v7680_v2  ;;  %v2222_v39 = vrot.slane %v2220_v52, 3  ;;  %4913 = vmatprep.mubr.bf16.mxu1 %v10749_v62  ;;  %v8745_v62 = vld [vmem:[%s11937_s3 + $0x620] sm:$0xff]  }
 0x213   : > { %v2152_v60 = vrot.slane %v2150_v1, 2  ;;  %v1706_v32 = vrot.slane %v10861_v23, 6  ;;  %v10875_v48 = vadd.f32 %v7663_v47, %v7611_v34  ;;  %v7683_v50 = vpop.f32.mrf.mxu0  ;;  %v2155_v53 = vrot.slane %v2153_v49, 3  ;;  %v7733_v44 = vpop.f32.mrf.mxu1 }
 0x214   : > { %v2237_v45 = vrot.slane %v2235_v16, 2  ;;  %v2240_v55 = vrot.slane %v2238_v15, 3  ;;  %v4179_v31 = vadd.f32 %v7682_v7, %v10555_v9  ;;  %8382 = vmatpush3.bf16.msra.mxu0 %v8743_v61  ;;  %v10882_v13 = vsel %vm1294_vm5, %v10777_v63, %v10835_v41 }
 0x215   : > { %v2147_v54 = vor.u32 %v10829_v6, %v10827_v28  ;;  %v2165_v47 = vor.u32 %v2164_v26, %v2161_v25  ;;  %v7734_v34 = vadd.f32 %v7733_v44, %v7732_v4  ;;  %v7684_v52 = vpop.f32.mrf.mxu0  ;;  %8383 = vmatprep.subr.bf16.mxu0 %v8744_v17  ;;  %v2080_v15 = vor.u32 %v2079_v18, %v2076_v35  ;;  %v7735_v1 = vpop.f32.mrf.mxu1  ;;  %v10898_v6 = vld [vmem:[#allocation2 + $0x48] ss:$0 sps:$4 sm:$0x33]  }
 0x216   : > { %v10889_v9 = vor.u32 %v2137_v0, %v2134_v38  ;;  %v10891_v16 = vor.u32 %v1688_v14, %v1685_v21  ;;  %v7685_v61 = vadd.f32 %v7684_v52, %v7683_v50  ;;  %v12060_v63 = vrot.slane %v10779_v22, 6 }
 0x217   : > { %v1736_v28 = vrot.slane %v10856_v58, 6  ;;  %v1737_v44 = vrot.slane %v10859_v29, 7  ;;  %v10900_v25 = vadd.f32 %v7734_v34, %v4179_v31  ;;  %v7686_v26 = vpop.f32.mrf.mxu0  ;;  %4833 = vmatmul.mubr.bf16.gmra.mxu0 %v10800_v27  ;;  %v10903_v49 = vor.u32 %v2222_v39, %v2219_v5  ;;  %v7736_v0 = vpop.f32.mrf.mxu1 }
 0x218   : > { %v1707_v2 = vsel %vm1694_vm8, %v12060_v63, %v1706_v32  ;;  %v10905_v35 = vor.u32 %v2155_v53, %v2152_v60  ;;  %v10907_v18 = vor.u32 %v2240_v55, %v2237_v45  ;;  %v4182_v38 = vadd.f32 %v7685_v61, %v10587_v19  ;;  %4840 = vmatprep.mubr.bf16.mxu0 %v10809_v11  ;;  %v8746_v19 = vld [vmem:[%s11937_s3 + $0x618] sm:$0xff]  }
 0x219   : > { %8384 = vmatpush3.bf16.msra.mxu0 %v8744_v17  ;;  %v2148_v21 = vsel %vm1294_vm5, %v10782_v3, %v2147_v54  ;;  %v10915_v31 = vsel %vm1294_vm5, %v10788_v36, %v2165_v47  ;;  %v1764_v27 = vrot.slane %v10898_v6, 7  ;;  %v7737_v5 = vadd.f32 %v7736_v0, %v7735_v1  ;;  %v7687_v14 = vpop.f32.mrf.mxu0  ;;  %v1067_v3 = vld [vmem:[#allocation2 + $0x18] sm:$0xc]  ;;  %v7738_v39 = vpop.f32.mrf.mxu1  ;;  %4914 = vmatmul.mubr.bf16.gmra.mxu1 %v10814_v42 }
 0x21a   : > { %8385 = vmatprep.subr.bf16.mxu0 %v8745_v62  ;;  %v1690_v11 = vsel %vm1631_vm6, %v10795_v57, %v10891_v16  ;;  %v2293_v17 = vshrl.u32 %v1707_v2, 16  ;;  %v2296_v7 = vshll.u32 %v1707_v2, 16  ;;  %v7688_v4 = vadd.f32 %v7687_v14, %v7686_v26  ;;  %4921 = vmatprep.mubr.bf16.mxu1 %v10822_v51 }
 0x21b   : > { %v2081_v36 = vsel %vm1294_vm5, %v10784_v56, %v2080_v15  ;;  %v10930_v60 = vsel %vm1294_vm5, %v10835_v41, %v10889_v9  ;;  %v10932_v32 = vor.u32 %v1737_v44, %v1736_v28  ;;  %v10934_v50 = vadd.f32 %v7737_v5, %v4182_v38  ;;  %v7689_v57 = vpop.f32.mrf.mxu0  ;;  %v7739_v45 = vpop.f32.mrf.mxu1 }
 0x21c   : > { %v10939_v53 = vsel %vm1294_vm5, %v2147_v54, %v10903_v49  ;;  %v10943_v42 = vsel %vm1294_vm5, %v2080_v15, %v10905_v35  ;;  %v10947_v56 = vsel %vm1294_vm5, %v2165_v47, %v10907_v18  ;;  %v4187_v41 = vadd.f32 %v7688_v4, %v10610_v24  ;;  %v8748_v47 = vld [vmem:[%s11937_s3 + $0x610] sm:$0xff]   ;;  %v8751_v4 = vld [vmem:[%s11937_s3 + $0x608] sm:$0xff]  }
 0x21d   : > { %8386 = vmatpush3.bf16.msra.mxu0 %v8745_v62  ;;  %v2208_v55 = vshrl.u32 %v1690_v11, 16  ;;  %v12061_v51 = vrot.slane %v10779_v22, 7  ;;  %v10954_v54 = vcombine.low %v1067_v3, %v10470_v12  ;;  %v7740_v52 = vadd.f32 %v7739_v45, %v7738_v39  ;;  %v7690_v61 = vpop.f32.mrf.mxu0  ;;  %v7741_v63 = vpop.f32.mrf.mxu1 }
 0x21e   : > { %8387 = vmatprep.subr.bf16.mxu0 %v8746_v19  ;;  %v2211_v15 = vshll.u32 %v1690_v11, 16  ;;  %v10959_v1 = vrot.slane %v2293_v17, 2  ;;  %v10961_v24 = vrot.slane %v2296_v7, 3  ;;  %v7691_v62 = vadd.f32 %v7690_v61, %v7689_v57 }
 0x21f   : > { %v1765_v34 = vsel %vm1752_vm9, %v12061_v51, %v1764_v27  ;;  %v1739_v22 = vsel %vm1711_vm10, %v10816_v59, %v10932_v32  ;;  %v1741_v12 = vshrl.u32 %v10861_v23, 16  ;;  %v1744_v2 = vshll.u32 %v10861_v23, 16  ;;  %v7692_v44 = vpop.f32.mrf.mxu0  ;;  %4841 = vmatmul.mubr.bf16.gmra.mxu0 %v10882_v13  ;;  %v7742_v5 = vpop.f32.mrf.mxu1 }
 0x220   : > { %v10968_v28 = vadd.f32 %v7740_v52, %v4187_v41  ;;  %v2311_v26 = vshrl.u32 %v1765_v34, 16  ;;  %v2314_v38 = vshll.u32 %v1765_v34, 16  ;;  %v1777_v0 = vrot.slane %v12032_v37, 7  ;;  %4848 = vmatprep.mubr.bf16.mxu0 %v2148_v21 }
 0x221   : > { %v4190_v27 = vadd.f32 %v7691_v62, %v10657_v10  ;;  %8388 = vmatpush3.bf16.msra.mxu0 %v8746_v19  ;;  %v2210_v14 = vrot.slane %v2208_v55, 2  ;;  %v2284_v59 = vshrl.u32 %v10891_v16, 16  ;;  %v1771_v11 = vshrl.u32 %v10954_v54, 16  ;;  %v7693_v17 = vpop.f32.mrf.mxu0  ;;  %v7744_v10 = vpop.f32.mrf.mxu1  ;;  %4922 = vmatmul.mubr.bf16.gmra.mxu1 %v2081_v36 }
 0x222   : > { %v7743_v23 = vadd.f32 %v7742_v5, %v7741_v63  ;;  %8389 = vmatprep.subr.bf16.mxu0 %v8748_v47  ;;  %v2213_v7 = vrot.slane %v2211_v15, 3  ;;  %v2226_v3 = vshrl.u32 %v1739_v22, 16  ;;  %v2229_v13 = vshll.u32 %v1739_v22, 16  ;;  %4929 = vmatprep.mubr.bf16.mxu1 %v10915_v31  ;;  %v8752_v22 = vld [vmem:[%s11937_s3 + $0x600] sm:$0xff]  }
 0x223   : > { %v7694_v39 = vadd.f32 %v7693_v17, %v7692_v44  ;;  %v2299_v21 = vor.u32 %v10961_v24, %v10959_v1  ;;  %v1743_v19 = vrot.slane %v1741_v12, 6  ;;  %v1746_v57 = vrot.slane %v1744_v2, 7  ;;  %v7695_v45 = vpop.f32.mrf.mxu0  ;;  %v7745_v61 = vpop.f32.mrf.mxu1 }
 0x224   : > { %v10980_v41 = vadd.f32 %v7743_v23, %v4190_v27  ;;  %v2313_v55 = vrot.slane %v2311_v26, 2  ;;  %v2316_v51 = vrot.slane %v2314_v38, 3  ;;  %v1778_v34 = vor.u32 %v1777_v0, %v12033_v20  ;;  %v12062_v23 = vld [vmem:[#allocation11_spill] sm:$0xff] }
 0x225   : > { %v4195_v52 = vadd.f32 %v7694_v39, %v10686_v46  ;;  %8390 = vmatpush3.bf16.msra.mxu0 %v8748_v47  ;;  %v1773_v36 = vrot.slane %v1771_v11, 7  ;;  %v1780_v15 = vrot.slane %v12034_v40, 7  ;;  %v7746_v1 = vadd.f32 %v7745_v61, %v7744_v10  ;;  %v7696_v24 = vpop.f32.mrf.mxu0  ;;  %v7747_v12 = vpop.f32.mrf.mxu1 }
 0x226   : > { %v2228_v62 = vrot.slane %v2226_v3, 2  ;;  %v2231_v63 = vrot.slane %v2229_v13, 3  ;;  %8391 = vmatprep.subr.bf16.mxu0 %v8751_v4  ;;  %v2287_v31 = vshll.u32 %v10891_v16, 16  ;;  %v7697_v20 = vadd.f32 %v7696_v24, %v7695_v45 }
 0x227   : > { %v10992_v46 = vor.u32 %v2213_v7, %v2210_v14  ;;  %v1774_v47 = vshll.u32 %v10954_v54, 16  ;;  %v1747_v2 = vor.u32 %v1746_v57, %v1743_v19  ;;  %v10995_v44 = vadd.f32 %v7746_v1, %v4195_v52  ;;  %v7698_v26 = vpop.f32.mrf.mxu0  ;;  %4849 = vmatmul.mubr.bf16.gmra.mxu0 %v10930_v60  ;;  %v7748_v11 = vpop.f32.mrf.mxu1 }
 0x228   : > { %v2317_v38 = vor.u32 %v2316_v51, %v2313_v55  ;;  %v1779_v27 = vsel %vm1769_vm11, %v1773_v36, %v1778_v34  ;;  %v1783_v16 = vrot.slane %v10301_v43, 7  ;;  %v4198_v5 = vadd.f32 %v7697_v20, %v10730_v33  ;;  %4856 = vmatprep.mubr.bf16.mxu0 %v10939_v53  ;;  %v12064_v20 = vld [vmem:[#allocation13_spill] sm:$0xff] }
 0x229   : > { %8392 = vmatpush3.bf16.msra.mxu0 %v8751_v4  ;;  %v11002_v14 = vrot.slane %v2284_v59, 2  ;;  %v1776_v54 = vor.u32 %v1774_v47, %v1773_v36  ;;  %v1781_v17 = vor.u32 %v1780_v15, %v12062_v23  ;;  %v7749_v7 = vadd.f32 %v7748_v11, %v7747_v12  ;;  %v7699_v60 = vpop.f32.mrf.mxu0  ;;  %v7750_v10 = vpop.f32.mrf.mxu1  ;;  %4930 = vmatmul.mubr.bf16.gmra.mxu1 %v10943_v42 }
 0x22a   : > { %v2300_v3 = vsel %vm1294_vm5, %v10903_v49, %v2299_v21  ;;  %v11009_v13 = vor.u32 %v2231_v63, %v2228_v62  ;;  %v2289_v39 = vrot.slane %v2287_v31, 3  ;;  %8393 = vmatprep.subr.bf16.mxu0 %v8752_v22  ;;  %v7700_v33 = vadd.f32 %v7699_v60, %v7698_v26  ;;  %4937 = vmatprep.mubr.bf16.mxu1 %v10947_v56  ;;  %v12063_v31 = vld [vmem:[#allocation21_spill] sm:$0xff] }
 0x22b   : > { %v1940_v53 = vshrl.u32 %v1779_v27, 16  ;;  %v1943_v59 = vshll.u32 %v1779_v27, 16  ;;  %v1748_v4 = vsel %vm1711_vm10, %v10932_v32, %v1747_v2  ;;  %v11014_v19 = vadd.f32 %v7749_v7, %v4198_v5  ;;  %v7701_v57 = vpop.f32.mrf.mxu0  ;;  %v7751_v55 = vpop.f32.mrf.mxu1 }
 0x22c   : > { %v2215_v49 = vsel %vm1294_vm5, %v10889_v9, %v10992_v46  ;;  %v2318_v21 = vsel %vm1294_vm5, %v10907_v18, %v2317_v38  ;;  %v1784_v42 = vor.u32 %v1783_v16, %v9968_v8  ;;  %v4203_v45 = vadd.f32 %v7700_v33, %v10752_v30 }
 0x22d   : > { %v1932_v32 = vshrl.u32 %v1776_v54, 16  ;;  %v1935_v51 = vshll.u32 %v1776_v54, 16  ;;  %8394 = vmatpush3.bf16.msra.mxu0 %v8752_v22  ;;  %v1782_v56 = vsel %vm1769_vm11, %v1777_v0, %v1781_v17  ;;  %v7752_v34 = vadd.f32 %v7751_v55, %v7750_v10  ;;  %v7702_v52 = vpop.f32.mrf.mxu0  ;;  %v7753_v1 = vpop.f32.mrf.mxu1  ;;  %v12066_v10 = vld [vmem:[#allocation14_spill] sm:$0xff] }
 0x22e   : > { %v2290_v9 = vor.u32 %v2289_v39, %v11002_v14  ;;  %v2302_v61 = vshrl.u32 %v1748_v4, 16  ;;  %v2305_v18 = vshll.u32 %v1748_v4, 16  ;;  %v7703_v36 = vadd.f32 %v7702_v52, %v7701_v57 }
 0x22f   : > { %v2233_v8 = vsel %vm1294_vm5, %v10905_v35, %v11009_v13  ;;  %v1942_v30 = vrot.slane %v1940_v53, 2  ;;  %v1945_v24 = vrot.slane %v1943_v59, 3  ;;  %v11033_v62 = vadd.f32 %v7752_v34, %v4203_v45  ;;  %v7704_v63 = vpop.f32.mrf.mxu0  ;;  %4857 = vmatmul.mubr.bf16.gmra.mxu0 %v2215_v49  ;;  %v7754_v47 = vpop.f32.mrf.mxu1 }
 0x230   : > { %v2016_v37 = vshrl.u32 %v1782_v56, 16  ;;  %v1785_v0 = vsel %vm1769_vm11, %v1780_v15, %v1784_v42  ;;  %v1786_v22 = vrot.slane %v12063_v31, 7  ;;  %v4206_v12 = vadd.f32 %v7703_v36, %v12064_v20  ;;  %4864 = vmatprep.mubr.bf16.mxu0 %v2300_v3  ;;  %v12065_v3 = vld [vmem:[#allocation17_spill] sm:$0xff] }
 0x231   : > { %v1934_v2 = vrot.slane %v1932_v32, 2  ;;  %v1937_v26 = vrot.slane %v1935_v51, 3  ;;  %v1789_v35 = vrot.slane %v10856_v58, 7  ;;  %v7755_v38 = vadd.f32 %v7754_v47, %v7753_v1  ;;  %v7705_v27 = vpop.f32.mrf.mxu0  ;;  %v7756_v23 = vpop.f32.mrf.mxu1  ;;  %4938 = vmatmul.mubr.bf16.gmra.mxu1 %v2233_v8  ;;  %v12067_v1 = vld [vmem:[#allocation22_spill] sm:$0xff] }
 0x232   : > { %v2304_v5 = vrot.slane %v2302_v61, 2  ;;  %v2307_v11 = vrot.slane %v2305_v18, 3  ;;  %v2019_v14 = vshll.u32 %v1782_v56, 16  ;;  %v7706_v54 = vadd.f32 %v7705_v27, %v7704_v63  ;;  %4945 = vmatprep.mubr.bf16.mxu1 %v2318_v21 }
 0x233   : > { %v1946_v40 = vor.u32 %v1945_v24, %v1942_v30  ;;  %v2092_v15 = vshrl.u32 %v1785_v0, 16  ;;  %v2095_v17 = vshll.u32 %v1785_v0, 16  ;;  %v11041_v7 = vadd.f32 %v7755_v38, %v4206_v12  ;;  %v7707_v60 = vpop.f32.mrf.mxu0  ;;  %v7757_v59 = vpop.f32.mrf.mxu1 }
 0x234   : > { %v1787_v39 = vor.u32 %v1786_v22, %v12065_v3  ;;  %v1793_v33 = vshrl.u32 %v10898_v6, 16  ;;  %v4211_v53 = vadd.f32 %v7706_v54, %v12066_v10  ;;  %v2291_v4 = vsel %vm1294_vm5, %v10992_v46, %v2290_v9 }
 0x235   : > { %v1938_v57 = vor.u32 %v1937_v26, %v1934_v2  ;;  %v1790_v49 = vor.u32 %v1789_v35, %v10859_v29  ;;  %v7758_v42 = vadd.f32 %v7757_v59, %v7756_v23  ;;  %v7708_v45 = vpop.f32.mrf.mxu0  ;;  %v2308_v55 = vor.u32 %v2307_v11, %v2304_v5  ;;  %v7759_v56 = vpop.f32.mrf.mxu1  ;;  %v12068_v5 = vld [vmem:[#allocation15_spill] sm:$0xff] }
 0x236   : > { %v2018_v21 = vrot.slane %v2016_v37, 2  ;;  %v2021_v32 = vrot.slane %v2019_v14, 3  ;;  %v7709_v51 = vadd.f32 %v7708_v45, %v7707_v60  ;;  %v2094_v52 = vrot.slane %v2092_v15, 2 }
 0x237   : > { %v1947_v34 = vsel %vm1294_vm5, %v1938_v57, %v1946_v40  ;;  %v2097_v61 = vrot.slane %v2095_v17, 3  ;;  %v11052_v18 = vadd.f32 %v7758_v42, %v4211_v53  ;;  %v7710_v36 = vpop.f32.mrf.mxu0  ;;  %4865 = vmatmul.mubr.bf16.gmra.mxu0 %v2291_v4  ;;  %v1788_v46 = vsel %vm1769_vm11, %v1783_v16, %v1787_v39  ;;  %v7760_v30 = vpop.f32.mrf.mxu1 }
 0x238   : > { %v1795_v29 = vrot.slane %v1793_v33, 7  ;;  %v1796_v9 = vshll.u32 %v10898_v6, 16  ;;  %v4214_v8 = vadd.f32 %v7709_v51, %v12067_v1  ;;  %8395 = vmatprep.mubr.bf16.mxu0 %v1947_v34  ;;  %v1791_v24 = vsel %vm1769_vm11, %v1786_v22, %v1790_v49 }
 0x239   : > { %v7761_v63 = vadd.f32 %v7760_v30, %v7759_v56  ;;  %v7711_v37 = vpop.f32.mrf.mxu0  ;;  %v2309_v0 = vsel %vm1294_vm5, %v11009_v13, %v2308_v55  ;;  %v2022_v31 = vor.u32 %v2021_v32, %v2018_v21  ;;  %v7762_v12 = vpop.f32.mrf.mxu1  ;;  %v2098_v43 = vor.u32 %v2097_v61, %v2094_v52 }
 0x23a   : > { %v7712_v20 = vadd.f32 %v7711_v37, %v7710_v36  ;;  %4946 = vmatmul.mubr.bf16.gmra.mxu1 %v2309_v0  ;;  %v2168_v16 = vshrl.u32 %v1788_v46, 16  ;;  %v2171_v47 = vshll.u32 %v1788_v46, 16  ;;  %v2244_v26 = vshrl.u32 %v1791_v24, 16 }
 0x23b   : > { %v11062_v2 = vadd.f32 %v7761_v63, %v4214_v8  ;;  %v7713_v6 = vpop.f32.mrf.mxu0  ;;  %v2247_v38 = vshll.u32 %v1791_v24, 16  ;;  %v1798_v27 = vor.u32 %v1796_v9, %v1795_v29  ;;  %v7763_v11 = vpop.f32.mrf.mxu1  ;;  %v2023_v13 = vsel %vm1294_vm5, %v1946_v40, %v2022_v31 }
 0x23c   : > { %v4219_v22 = vadd.f32 %v7712_v20, %v12068_v5  ;;  %v7764_v14 = vadd.f32 %v7763_v11, %v7762_v12  ;;  %v2099_v17 = vsel %vm1294_vm5, %v2022_v31, %v2098_v43  ;;  %v2170_v60 = vrot.slane %v2168_v16, 2 }
 0x23d   : > { %v7714_v54 = vpop.f32.mrf.mxu0  ;;  %v7765_v15 = vpop.f32.mrf.mxu1  ;;  %v2173_v3 = vrot.slane %v2171_v47, 3  ;;  %v2246_v10 = vrot.slane %v2244_v26, 2  ;;  %v2249_v53 = vrot.slane %v2247_v38, 3  ;;  %v1799_v59 = vsel %vm1769_vm11, %v1789_v35, %v1798_v27 }
 0x23e   : > { %v7715_v23 = vadd.f32 %v7714_v54, %v7713_v6  ;;  %v11067_v39 = vadd.f32 %v7764_v14, %v4219_v22  ;;  %v2320_v21 = vshrl.u32 %v1799_v59, 16  ;;  %v2323_v32 = vshll.u32 %v1799_v59, 16 }
 0x23f   : > { %v7784_v33 = vpop.f32.mrf.mxu0  ;;  %8396 = vmatmul.mubr.bf16.vlgmr.msra.gmra.mxu0 %v2023_v13  ;;  %v7766_v57 = vpop.f32.mrf.mxu1  ;;  %v2174_v55 = vor.u32 %v2173_v3, %v2170_v60  ;;  %v2250_v34 = vor.u32 %v2249_v53, %v2246_v10 }
 0x240   : > { %v4222_v4 = vadd.f32 %v7715_v23, %v10875_v48  ;;  %8399 = vmatprep.mubr.bf16.mxu0 %v2099_v17  ;;  %v7767_v40 = vadd.f32 %v7766_v57, %v7765_v15  ;;  %v2322_v29 = vrot.slane %v2320_v21, 2  ;;  %v2325_v9 = vrot.slane %v2323_v32, 3 }
 0x241   : > { %v7785_v49 = vpop.f32.mrf.mxu0  ;;  %v7836_v45 = vpop.f32.mrf.mxu1  ;;  %v2175_v46 = vsel %vm1294_vm5, %v2098_v43, %v2174_v55  ;;  %v2251_v30 = vsel %vm1294_vm5, %v2174_v55, %v2250_v34 }
 0x242   : > { %v7786_v42 = vadd.f32 %v7785_v49, %v7784_v33  ;;  %v11073_v51 = vadd.f32 %v7767_v40, %v4222_v4  ;;  %v2326_v20 = vor.u32 %v2325_v9, %v2322_v29 }
 0x243   : > { %v7787_v56 = vpop.f32.mrf.mxu0  ;;  %v7837_v58 = vpop.f32.mrf.mxu1 }
 0x244   : > { %v4341_v52 = vadd.f32 %v7786_v42, %v10900_v25  ;;  %v7838_v61 = vadd.f32 %v7837_v58, %v7836_v45  ;;  %v2327_v5 = vsel %vm1294_vm5, %v2250_v34, %v2326_v20 }
 0x245   : > { %v7788_v35 = vpop.f32.mrf.mxu0  ;;  %v7839_v48 = vpop.f32.mrf.mxu1 }
 0x246   : > { %v7789_v36 = vadd.f32 %v7788_v35, %v7787_v56  ;;  %v11077_v1 = vadd.f32 %v7838_v61, %v4341_v52 }
 0x247   : > { %v7790_v8 = vpop.f32.mrf.mxu0  ;;  %8400 = vmatmul.mubr.bf16.gmra.mxu0 %v2175_v46  ;;  %v7840_v63 = vpop.f32.mrf.mxu1 }
 0x248   : > { %v4344_v24 = vadd.f32 %v7789_v36, %v10934_v50  ;;  %8403 = vmatprep.mubr.bf16.mxu0 %v2251_v30  ;;  %v7841_v25 = vadd.f32 %v7840_v63, %v7839_v48 }
 0x249   : > { %v7791_v37 = vpop.f32.mrf.mxu0  ;;  %v7842_v31 = vpop.f32.mrf.mxu1 }
 0x24a   : > { %v7792_v0 = vadd.f32 %v7791_v37, %v7790_v8  ;;  %v11081_v12 = vadd.f32 %v7841_v25, %v4344_v24 }
 0x24b   : > { %v7793_v43 = vpop.f32.mrf.mxu0  ;;  %v7843_v47 = vpop.f32.mrf.mxu1 }
 0x24c   : > { %v4349_v16 = vadd.f32 %v7792_v0, %v10968_v28  ;;  %v7844_v6 = vadd.f32 %v7843_v47, %v7842_v31 }
 0x24d   : > { %v7794_v26 = vpop.f32.mrf.mxu0  ;;  %v7845_v27 = vpop.f32.mrf.mxu1 }
 0x24e   : > { %v7795_v38 = vadd.f32 %v7794_v26, %v7793_v43  ;;  %v11085_v50 = vadd.f32 %v7844_v6, %v4349_v16 }
 0x24f   : > { %v7796_v22 = vpop.f32.mrf.mxu0  ;;  %8404 = vmatmul.mubr.bf16.gmra.mxu0 %v2327_v5  ;;  %v7846_v14 = vpop.f32.mrf.mxu1 }
 0x250   : > { %v4352_v11 = vadd.f32 %v7795_v38, %v10980_v41  ;;  %v7847_v54 = vadd.f32 %v7846_v14, %v7845_v27 }
 0x251   : > { %v7797_v13 = vpop.f32.mrf.mxu0  ;;  %v7848_v15 = vpop.f32.mrf.mxu1 }
 0x252   : > { %v7798_v23 = vadd.f32 %v7797_v13, %v7796_v22  ;;  %v11088_v17 = vadd.f32 %v7847_v54, %v4352_v11 }
 0x253   : > { %v7799_v28 = vpop.f32.mrf.mxu0  ;;  %v7849_v3 = vpop.f32.mrf.mxu1 }
 0x254   : > { %v4357_v60 = vadd.f32 %v7798_v23, %v10995_v44  ;;  %v7850_v33 = vadd.f32 %v7849_v3, %v7848_v15 }
 0x255   : > { %v7800_v10 = vpop.f32.mrf.mxu0  ;;  %v7851_v59 = vpop.f32.mrf.mxu1 }
 0x256   : > { %v7801_v53 = vadd.f32 %v7800_v10, %v7799_v28  ;;  %v11091_v4 = vadd.f32 %v7850_v33, %v4357_v60 }
 0x257   : > { %v7802_v57 = vpop.f32.mrf.mxu0  ;;  %v7852_v40 = vpop.f32.mrf.mxu1 }
 0x258   : > { %v4360_v41 = vadd.f32 %v7801_v53, %v11014_v19  ;;  %v7853_v49 = vadd.f32 %v7852_v40, %v7851_v59 }
 0x259   : > { %v7803_v42 = vpop.f32.mrf.mxu0  ;;  %v7854_v55 = vpop.f32.mrf.mxu1 }
 0x25a   : > { %v7804_v45 = vadd.f32 %v7803_v42, %v7802_v57  ;;  %v11094_v21 = vadd.f32 %v7853_v49, %v4360_v41 }
 0x25b   : > { %v7805_v32 = vpop.f32.mrf.mxu0  ;;  %v7855_v56 = vpop.f32.mrf.mxu1 }
 0x25c   : > { %v4365_v44 = vadd.f32 %v7804_v45, %v11033_v62  ;;  %v7856_v34 = vadd.f32 %v7855_v56, %v7854_v55 }
 0x25d   : > { %v7806_v52 = vpop.f32.mrf.mxu0  ;;  %v7857_v61 = vpop.f32.mrf.mxu1 }
 0x25e   : > { %v7807_v58 = vadd.f32 %v7806_v52, %v7805_v32  ;;  %v11097_v35 = vadd.f32 %v7856_v34, %v4365_v44 }
 0x25f   : > { %v7808_v36 = vpop.f32.mrf.mxu0  ;;  %v7858_v48 = vpop.f32.mrf.mxu1 }
 0x260   : > { %v4368_v19 = vadd.f32 %v7807_v58, %v11041_v7  ;;  %v7859_v46 = vadd.f32 %v7858_v48, %v7857_v61 }
 0x261   : > { %v7809_v29 = vpop.f32.mrf.mxu0  ;;  %v7860_v8 = vpop.f32.mrf.mxu1 }
 0x262   : > { %v7810_v9 = vadd.f32 %v7809_v29, %v7808_v36  ;;  %v11100_v30 = vadd.f32 %v7859_v46, %v4368_v19  ;;  %v8754_v19 = vld [vmem:[%s11939_s5 + $0x78] sm:$0xff]  }
 0x263   : > { %v7811_v24 = vpop.f32.mrf.mxu0  ;;  %v7861_v63 = vpop.f32.mrf.mxu1  ;;  %8198 = vmatprep.subr.bf16.mxu1 %v8754_v19 }
 0x264   : > { %v4373_v62 = vadd.f32 %v7810_v9, %v11052_v18  ;;  %v7862_v25 = vadd.f32 %v7861_v63, %v7860_v8 }
 0x265   : > { %v7812_v37 = vpop.f32.mrf.mxu0  ;;  %v7863_v31 = vpop.f32.mrf.mxu1 }
 0x266   : > { %v7813_v0 = vadd.f32 %v7812_v37, %v7811_v24  ;;  %v11103_v20 = vadd.f32 %v7862_v25, %v4373_v62 }
 0x267   : > { %v7814_v43 = vpop.f32.mrf.mxu0  ;;  %v7864_v16 = vpop.f32.mrf.mxu1 }
 0x268   : > { %v4376_v7 = vadd.f32 %v7813_v0, %v11062_v2  ;;  %v7865_v47 = vadd.f32 %v7864_v16, %v7863_v31 }
 0x269   : > { %v7815_v6 = vpop.f32.mrf.mxu0  ;;  %v7866_v38 = vpop.f32.mrf.mxu1 }
 0x26a   : > { %v7816_v26 = vadd.f32 %v7815_v6, %v7814_v43  ;;  %v11106_v27 = vadd.f32 %v7865_v47, %v4376_v7 }
 0x26b   : > { %v7817_v5 = vpop.f32.mrf.mxu0  ;;  %v7867_v22 = vpop.f32.mrf.mxu1 }
 0x26c   : > { %v4381_v18 = vadd.f32 %v7816_v26, %v11067_v39  ;;  %v7868_v11 = vadd.f32 %v7867_v22, %v7866_v38 }
 0x26d   : > { %v7818_v14 = vpop.f32.mrf.mxu0  ;;  %v7869_v13 = vpop.f32.mrf.mxu1 }
 0x26e   : > { %v7819_v54 = vadd.f32 %v7818_v14, %v7817_v5  ;;  %v11109_v23 = vadd.f32 %v7868_v11, %v4381_v18  ;;  %v8756_v5 = vld [vmem:[%s11939_s5 + $0x70] sm:$0xff]  }
 0x26f   : > { %v7888_v15 = vpop.f32.mrf.mxu0  ;;  %v7870_v28 = vpop.f32.mrf.mxu1 }
 0x270   : > { %v4384_v2 = vadd.f32 %v7819_v54, %v11073_v51  ;;  %v7871_v60 = vadd.f32 %v7870_v28, %v7869_v13 }
 0x271   : > { %v7889_v3 = vpop.f32.mrf.mxu0  ;;  %v7940_v10 = vpop.f32.mrf.mxu1 }
 0x272   : > { %v7890_v33 = vadd.f32 %v7889_v3, %v7888_v15  ;;  %v11112_v53 = vadd.f32 %v7871_v60, %v4384_v2 }
 0x273   : > { %v7891_v59 = vpop.f32.mrf.mxu0  ;;  %v7941_v57 = vpop.f32.mrf.mxu1 }
 0x274   : > { %v4503_v39 = vadd.f32 %v7890_v33, %v11077_v1  ;;  %v7942_v41 = vadd.f32 %v7941_v57, %v7940_v10 }
 0x275   : > { %v7892_v40 = vpop.f32.mrf.mxu0  ;;  %v7943_v42 = vpop.f32.mrf.mxu1 }
 0x276   : > { %v7893_v49 = vadd.f32 %v7892_v40, %v7891_v59  ;;  %v11115_v45 = vadd.f32 %v7942_v41, %v4503_v39 }
 0x277   : > { %v7894_v55 = vpop.f32.mrf.mxu0  ;;  %v7944_v32 = vpop.f32.mrf.mxu1 }
 0x278   : > { %v4506_v51 = vadd.f32 %v7893_v49, %v11081_v12  ;;  %v7945_v44 = vadd.f32 %v7944_v32, %v7943_v42  ;;  %v8755_v12 = vld [vmem:[%s11939_s5 + $0x38] sm:$0xff]  }
 0x279   : > { %v7895_v56 = vpop.f32.mrf.mxu0  ;;  %v7946_v52 = vpop.f32.mrf.mxu1  ;;  %8199 = vmatpush3.bf16.msra.mxu1 %v8755_v12 }
 0x27a   : > { %v7896_v34 = vadd.f32 %v7895_v56, %v7894_v55  ;;  %v11118_v58 = vadd.f32 %v7945_v44, %v4506_v51  ;;  %8200 = vmatprep.subr.bf16.mxu1 %v8756_v5 }
 0x27b   : > { %v7897_v61 = vpop.f32.mrf.mxu0  ;;  %v7947_v36 = vpop.f32.mrf.mxu1 }
 0x27c   : > { %v4511_v1 = vadd.f32 %v7896_v34, %v11085_v50  ;;  %v7948_v48 = vadd.f32 %v7947_v36, %v7946_v52 }
 0x27d   : > { %v7898_v46 = vpop.f32.mrf.mxu0  ;;  %v7949_v9 = vpop.f32.mrf.mxu1 }
 0x27e   : > { %v7899_v29 = vadd.f32 %v7898_v46, %v7897_v61  ;;  %v11127_v8 = vadd.f32 %v7948_v48, %v4511_v1 }
 0x27f   : > { %v7900_v24 = vpop.f32.mrf.mxu0  ;;  %v7950_v62 = vpop.f32.mrf.mxu1 }
 0x280   : > { %v4514_v50 = vadd.f32 %v7899_v29, %v11088_v17  ;;  %v7951_v63 = vadd.f32 %v7950_v62, %v7949_v9 }
 0x281   : > { %v7901_v25 = vpop.f32.mrf.mxu0  ;;  %v7952_v0 = vpop.f32.mrf.mxu1 }
 0x282   : > { %v7902_v37 = vadd.f32 %v7901_v25, %v7900_v24  ;;  %v11130_v31 = vadd.f32 %v7951_v63, %v4514_v50 }
 0x283   : > { %v7903_v43 = vpop.f32.mrf.mxu0  ;;  %v7953_v16 = vpop.f32.mrf.mxu1 }
 0x284   : > { %v4519_v7 = vadd.f32 %v7902_v37, %v11091_v4  ;;  %v7954_v47 = vadd.f32 %v7953_v16, %v7952_v0 }
 0x285   : > { %v7904_v6 = vpop.f32.mrf.mxu0  ;;  %v7955_v38 = vpop.f32.mrf.mxu1 }
 0x286   : > { %v7905_v26 = vadd.f32 %v7904_v6, %v7903_v43  ;;  %v11136_v17 = vadd.f32 %v7954_v47, %v4519_v7 }
 0x287   : > { %v7906_v18 = vpop.f32.mrf.mxu0  ;;  %v7956_v11 = vpop.f32.mrf.mxu1 }
 0x288   : > { %v4522_v22 = vadd.f32 %v7905_v26, %v11094_v21  ;;  %v7957_v14 = vadd.f32 %v7956_v11, %v7955_v38 }
 0x289   : > { %v7907_v54 = vpop.f32.mrf.mxu0  ;;  %v7958_v4 = vpop.f32.mrf.mxu1 }
 0x28a   : > { %v7908_v13 = vadd.f32 %v7907_v54, %v7906_v18  ;;  %v11139_v15 = vadd.f32 %v7957_v14, %v4522_v22  ;;  %v8758_v18 = vld [vmem:[%s11939_s5 + $0x68] sm:$0xff]  }
 0x28b   : > { %v7909_v2 = vpop.f32.mrf.mxu0  ;;  %v7959_v60 = vpop.f32.mrf.mxu1  ;;  %v8759_v22 = vld [vmem:[%s11939_s5 + $0x28] sm:$0xff]  }
 0x28c   : > { %v4527_v28 = vadd.f32 %v7908_v13, %v11097_v35  ;;  %v7960_v3 = vadd.f32 %v7959_v60, %v7958_v4 }
 0x28d   : > { %v7910_v33 = vpop.f32.mrf.mxu0  ;;  %v7961_v59 = vpop.f32.mrf.mxu1 }
 0x28e   : > { %v7911_v10 = vadd.f32 %v7910_v33, %v7909_v2  ;;  %v11142_v39 = vadd.f32 %v7960_v3, %v4527_v28 }
 0x28f   : > { %v7912_v57 = vpop.f32.mrf.mxu0  ;;  %v7962_v41 = vpop.f32.mrf.mxu1 }
 0x290   : > { %v4530_v21 = vadd.f32 %v7911_v10, %v11100_v30  ;;  %v7963_v40 = vadd.f32 %v7962_v41, %v7961_v59  ;;  %v8761_v10 = vld [vmem:[%s11939_s5 + $0xb8] sm:$0xff]   ;;  %v8762_v59 = vld [vmem:[%s11939_s5 + $0x60] sm:$0xff]  }
 0x291   : > { %v7913_v49 = vpop.f32.mrf.mxu0  ;;  %v7964_v55 = vpop.f32.mrf.mxu1 }
 0x292   : > { %v7914_v42 = vadd.f32 %v7913_v49, %v7912_v57  ;;  %v11145_v51 = vadd.f32 %v7963_v40, %v4530_v21 }
 0x293   : > { %v7915_v32 = vpop.f32.mrf.mxu0  ;;  %v7965_v44 = vpop.f32.mrf.mxu1 }
 0x294   : > { %v4535_v35 = vadd.f32 %v7914_v42, %v11103_v20  ;;  %v7966_v56 = vadd.f32 %v7965_v44, %v7964_v55  ;;  %v8757_v20 = vld [vmem:[%s11939_s5 + $0x30] sm:$0xff]   ;;  %v8763_v55 = vld [vmem:[%s11939_s5 + $0x20] sm:$0xff]  }
 0x295   : > { %v7916_v34 = vpop.f32.mrf.mxu0  ;;  %v7967_v61 = vpop.f32.mrf.mxu1  ;;  %8201 = vmatpush3.bf16.msra.mxu1 %v8757_v20 }
 0x296   : > { %v7917_v52 = vadd.f32 %v7916_v34, %v7915_v32  ;;  %v11148_v1 = vadd.f32 %v7966_v56, %v4535_v35  ;;  %8202 = vmatprep.subr.bf16.mxu1 %v8758_v18  ;;  %v8764_v32 = vld [vmem:[%s11939_s5 + $0xf0] sm:$0xff]  }
 0x297   : > { %v7918_v36 = vpop.f32.mrf.mxu0  ;;  %v7968_v19 = vpop.f32.mrf.mxu1 }
 0x298   : > { %v4538_v30 = vadd.f32 %v7917_v52, %v11106_v27  ;;  %v7969_v48 = vadd.f32 %v7968_v19, %v7967_v61 }
 0x299   : > { %v7919_v46 = vpop.f32.mrf.mxu0  ;;  %v7970_v29 = vpop.f32.mrf.mxu1  ;;  %8203 = vmatpush3.bf16.msra.mxu1 %v8759_v22 }
 0x29a   : > { %v7920_v12 = vadd.f32 %v7919_v46, %v7918_v36  ;;  %v11151_v9 = vadd.f32 %v7969_v48, %v4538_v30  ;;  %8204 = vmatprep.subr.bf16.mxu1 %v8762_v59  ;;  %v8771_v59 = vld [vmem:[%s11939_s5 + $0xa0] sm:$0xff]  }
 0x29b   : > { %v7921_v24 = vpop.f32.mrf.mxu0  ;;  %v7971_v62 = vpop.f32.mrf.mxu1 }
 0x29c   : > { %v4543_v50 = vadd.f32 %v7920_v12, %v11109_v23  ;;  %v7972_v63 = vadd.f32 %v7971_v62, %v7970_v29 }
 0x29d   : > { %v7922_v25 = vpop.f32.mrf.mxu0  ;;  %v7973_v27 = vpop.f32.mrf.mxu1  ;;  %8205 = vmatpush3.bf16.msra.mxu1 %v8763_v55 }
 0x29e   : > { %v7923_v37 = vadd.f32 %v7922_v25, %v7921_v24  ;;  %v11157_v0 = vadd.f32 %v7972_v63, %v4543_v50 }
 0x29f   : > { %v7992_v43 = vpop.f32.mrf.mxu0  ;;  %v7974_v16 = vpop.f32.mrf.mxu1 }
 0x2a0   : > { %v4546_v7 = vadd.f32 %v7923_v37, %v11112_v53  ;;  %v7975_v47 = vadd.f32 %v7974_v16, %v7973_v27  ;;  %v8766_v27 = vld [vmem:[%s11939_s5 + $0x58] sm:$0xff]  }
 0x2a1   : > { %v7993_v6 = vpop.f32.mrf.mxu0  ;;  %v11160_v38 = vpop.f32.mrf.mxu1  ;;  %8206 = vmatprep.subr.bf16.mxu1 %v8766_v27 }
 0x2a2   : > { %v7994_v26 = vadd.f32 %v7993_v6, %v7992_v43  ;;  %v11162_v5 = vadd.f32 %v7975_v47, %v4546_v7  ;;  %v8768_v43 = vld [vmem:[%s11939_s5 + $0x18] sm:$0xff]  }
 0x2a3   : > { %v7995_v23 = vpop.f32.mrf.mxu0  ;;  %v11173_v53 = vpop.f32.mrf.mxu1  ;;  %8207 = vmatpush3.bf16.msra.mxu1 %v8768_v43  ;;  %v8786_v43 = vld [vmem:[%s11939_s5 + $0x178] sm:$0xff]  }
 0x2a4   : > { %v11171_v11 = vadd.f32 %v7994_v26, %v11115_v45  ;;  %v8760_v45 = vld [vmem:[%s11939_s5 + $0xf8] sm:$0xff]  }
 0x2a5   : > { %v7996_v14 = vpop.f32.mrf.mxu0  ;;  %v11175_v13 = vpop.f32.mrf.mxu1  ;;  %8220 = vmatprep.subr.bf16.mxu0 %v8760_v45 }
 0x2a6   : > { %v7997_v54 = vadd.f32 %v7996_v14, %v7995_v23  ;;  %8221 = vmatpush3.bf16.msra.mxu0 %v8761_v10 }
 0x2a7   : > { %v7998_v4 = vpop.f32.mrf.mxu0  ;;  %v11180_v28 = vpop.f32.mrf.mxu1  ;;  %8222 = vmatprep.subr.bf16.mxu0 %v8764_v32  ;;  %v8776_v32 = vld [vmem:[%s11939_s5 + $0x48] sm:$0xff]  }
 0x2a8   : > { %v11178_v2 = vadd.f32 %v7997_v54, %v11118_v58 }
 0x2a9   : > { %v7999_v60 = vpop.f32.mrf.mxu0  ;;  %v11182_v33 = vpop.f32.mrf.mxu1 }
 0x2aa   : > { %v8000_v3 = vadd.f32 %v7999_v60, %v7998_v4 }
 0x2ab   : > { %v8001_v58 = vpop.f32.mrf.mxu0  ;;  %v11196_v21 = vpop.f32.mrf.mxu1 }
 0x2ac   : > { %v11194_v57 = vadd.f32 %v8000_v3, %v11127_v8  ;;  %v8765_v8 = vld [vmem:[%s11939_s5 + $0xb0] sm:$0xff]  }
 0x2ad   : > { %v8002_v41 = vpop.f32.mrf.mxu0  ;;  %v11198_v49 = vpop.f32.mrf.mxu1  ;;  %8223 = vmatpush3.bf16.msra.mxu0 %v8765_v8 }
 0x2ae   : > { %v8003_v40 = vadd.f32 %v8002_v41, %v8001_v58  ;;  %v8772_v58 = vld [vmem:[%s11939_s5 + $0x50] sm:$0xff]  }
 0x2af   : > { %v8004_v42 = vpop.f32.mrf.mxu0  ;;  %v11212_v44 = vpop.f32.mrf.mxu1  ;;  %8208 = vmatprep.subr.bf16.mxu1 %v8772_v58 }
 0x2b0   : > { %v11210_v35 = vadd.f32 %v8003_v40, %v11130_v31  ;;  %v8774_v40 = vld [vmem:[%s11939_s5 + $0xd8] sm:$0xff]  }
 0x2b1   : > { %v8005_v56 = vpop.f32.mrf.mxu0  ;;  %v11214_v52 = vpop.f32.mrf.mxu1 }
 0x2b2   : > { %v8006_v34 = vadd.f32 %v8005_v56, %v8004_v42 }
 0x2b3   : > { %v8007_v61 = vpop.f32.mrf.mxu0  ;;  %v11219_v30 = vpop.f32.mrf.mxu1 }
 0x2b4   : > { %v11217_v36 = vadd.f32 %v8006_v34, %v11136_v17  ;;  %v8775_v34 = vld [vmem:[%s11939_s5 + $0x98] sm:$0xff]  }
 0x2b5   : > { %v8008_v19 = vpop.f32.mrf.mxu0  ;;  %v11221_v46 = vpop.f32.mrf.mxu1 }
 0x2b6   : > { %v8009_v48 = vadd.f32 %v8008_v19, %v8007_v61  ;;  %v8778_v61 = vld [vmem:[%s11939_s5 + $0x8] sm:$0xff]  }
 0x2b7   : > { %v8010_v31 = vpop.f32.mrf.mxu0  ;;  %v11226_v29 = vpop.f32.mrf.mxu1 }
 0x2b8   : > { %v11224_v12 = vadd.f32 %v8009_v48, %v11139_v15  ;;  %v8767_v15 = vld [vmem:[%s11939_s5 + $0xe8] sm:$0xff]   ;;  %v8777_v48 = vld [vmem:[%s11939_s5 + $0xd0] sm:$0xff]  }
 0x2b9   : > { %v8011_v24 = vpop.f32.mrf.mxu0  ;;  %v8062_v50 = vpop.f32.mrf.mxu1  ;;  %8224 = vmatprep.subr.bf16.mxu0 %v8767_v15 }
 0x2ba   : > { %v8012_v20 = vadd.f32 %v8011_v24, %v8010_v31  ;;  %v8782_v31 = vld [vmem:[%s11939_s5 + $0x40] sm:$0xff]  }
 0x2bb   : > { %v8013_v62 = vpop.f32.mrf.mxu0  ;;  %v8063_v17 = vpop.f32.mrf.mxu1 }
 0x2bc   : > { %v4689_v63 = vadd.f32 %v8012_v20, %v11142_v39  ;;  %v8064_v25 = vadd.f32 %v8063_v17, %v8062_v50  ;;  %v8769_v39 = vld [vmem:[%s11939_s5 + $0xa8] sm:$0xff]  }
 0x2bd   : > { %v8014_v37 = vpop.f32.mrf.mxu0  ;;  %v11238_v16 = vpop.f32.mrf.mxu1  ;;  %8225 = vmatpush3.bf16.msra.mxu0 %v8769_v39 }
 0x2be   : > { %v8015_v7 = vadd.f32 %v8014_v37, %v8013_v62  ;;  %v11243_v47 = vadd.f32 %v8064_v25, %v4689_v63  ;;  %v8779_v25 = vld [vmem:[%s11939_s5 + $0x90] sm:$0xff]   ;;  %v8783_v37 = vld [vmem:[%s11939_s5] sm:$0xff]  }
 0x2bf   : > { %v8016_v6 = vpop.f32.mrf.mxu0  ;;  %v11248_v23 = vpop.f32.mrf.mxu1 }
 0x2c0   : > { %12069 = vst [vmem:[#allocation8_spill] sm:$0xff] %v11243_v47  ;;  %v11246_v26 = vadd.f32 %v8015_v7, %v11145_v51  ;;  %v8770_v51 = vld [vmem:[%s11939_s5 + $0xe0] sm:$0xff]  }
 0x2c1   : > { %v8017_v18 = vpop.f32.mrf.mxu0  ;;  %v11250_v14 = vpop.f32.mrf.mxu1  ;;  %8226 = vmatprep.subr.bf16.mxu0 %v8770_v51 }
 0x2c2   : > { %v8018_v22 = vadd.f32 %v8017_v18, %v8016_v6  ;;  %8227 = vmatpush3.bf16.msra.mxu0 %v8771_v59 }
 0x2c3   : > { %v8019_v54 = vpop.f32.mrf.mxu0  ;;  %v11255_v60 = vpop.f32.mrf.mxu1  ;;  %8228 = vmatprep.subr.bf16.mxu0 %v8774_v40  ;;  %v8787_v40 = vld [vmem:[%s11939_s5 + $0x1f8] sm:$0xff]  }
 0x2c4   : > { %v11253_v4 = vadd.f32 %v8018_v22, %v11148_v1  ;;  %v8773_v1 = vld [vmem:[%s11939_s5 + $0x10] sm:$0xff]  }
 0x2c5   : > { %v8020_v3 = vpop.f32.mrf.mxu0  ;;  %v8071_v10 = vpop.f32.mrf.mxu1  ;;  %8209 = vmatpush3.bf16.msra.mxu1 %v8773_v1 }
 0x2c6   : > { %v8021_v45 = vadd.f32 %v8020_v3, %v8019_v54  ;;  %8210 = vmatprep.subr.bf16.mxu1 %v8776_v32  ;;  %8229 = vmatpush3.bf16.msra.mxu0 %v8775_v34  ;;  %v8781_v3 = vld [vmem:[%s11939_s5 + $0x88] sm:$0xff]  }
 0x2c7   : > { %v8022_v41 = vpop.f32.mrf.mxu0  ;;  %v8072_v55 = vpop.f32.mrf.mxu1  ;;  %8230 = vmatprep.subr.bf16.mxu0 %v8777_v48 }
 0x2c8   : > { %v4700_v42 = vadd.f32 %v8021_v45, %v11151_v9  ;;  %v8073_v8 = vadd.f32 %v8072_v55, %v8071_v10  ;;  %v8784_v10 = vld [vmem:[%s11939_s5 + $0xc0] sm:$0xff]  }
 0x2c9   : > { %v8023_v56 = vpop.f32.mrf.mxu0  ;;  %v8074_v19 = vpop.f32.mrf.mxu1  ;;  %8211 = vmatpush3.bf16.msra.mxu1 %v8778_v61 }
 0x2ca   : > { %v8024_v9 = vadd.f32 %v8023_v56, %v8022_v41  ;;  %v11288_v24 = vadd.f32 %v8073_v8, %v4700_v42  ;;  %8212 = vmatprep.subr.bf16.mxu1 %v8782_v31  ;;  %8231 = vmatpush3.bf16.msra.mxu0 %v8779_v25  ;;  %v8785_v41 = vld [vmem:[%s11939_s5 + $0x80] sm:$0xff]  }
 0x2cb   : > { %v8025_v20 = vpop.f32.mrf.mxu0  ;;  %v8075_v62 = vpop.f32.mrf.mxu1 }
 0x2cc   : > { %v4705_v50 = vadd.f32 %v8024_v9, %v11157_v0  ;;  %v8076_v63 = vadd.f32 %v8075_v62, %v8074_v19  ;;  %v8780_v0 = vld [vmem:[%s11939_s5 + $0xc8] sm:$0xff]  }
 0x2cd   : > { %v8026_v17 = vpop.f32.mrf.mxu0  ;;  %v8077_v15 = vpop.f32.mrf.mxu1  ;;  %8213 = vmatpush3.bf16.msra.mxu1 %v8783_v37  ;;  %8232 = vmatprep.subr.bf16.mxu0 %v8780_v0 }
 0x2ce   : > { %v8027_v27 = vadd.f32 %v8026_v17, %v8025_v20  ;;  %v11303_v7 = vadd.f32 %v8076_v63, %v4705_v50  ;;  %8242 = vmatprep.subr.bf16.mxu1 %v8786_v43  ;;  %8233 = vmatpush3.bf16.msra.mxu0 %v8781_v3  ;;  %v11983_v3 = vlaneseq }
 0x2cf   : > { %v8096_v39 = vpop.f32.mrf.mxu0  ;;  %v8078_v18 = vpop.f32.mrf.mxu1  ;;  %8234 = vmatprep.subr.bf16.mxu0 %v8784_v10 }
 0x2d0   : > { %v4708_v6 = vadd.f32 %v8027_v27, %v11162_v5  ;;  %v8079_v22 = vadd.f32 %v8078_v18, %v8077_v15  ;;  %v8957_v18 = vmov 1983009808  }
 0x2d1   : > { %v8097_v54 = vpop.f32.mrf.mxu0  ;;  %v11309_v45 = vpop.f32.mrf.mxu1 }
 0x2d2   : > { %v11314_v51 = vadd.f32 %v8079_v22, %v4708_v6  ;;  %8235 = vmatpush3.bf16.msra.mxu0 %v8785_v41  ;;  %v5049_v22 = vunpack.c.l.s4 %v8957_v18  ;;  %v8052_v18 = vadd.f32 %v11196_v21, %v11182_v33  ;;  %v8067_v33 = vadd.f32 %v11248_v23, %v11238_v16 }
 0x2d3   : > { %v11316_v5 = vpop.f32.mrf.mxu0  ;;  %v8149_v59 = vpop.f32.mrf.mxu1  ;;  %8264 = vmatprep.subr.bf16.mxu0 %v8787_v40 }
 0x2d4   : > { %12070 = vst [vmem:[#allocation20_spill] sm:$0xff] %v11314_v51  ;;  %v8046_v51 = vadd.f32 %v11173_v53, %v11160_v38 }
 0x2d5   : > { %v11318_v58 = vpop.f32.mrf.mxu0  ;;  %v11323_v1 = vpop.f32.mrf.mxu1 }
 0x2d6   : > { %v4746_v53 = vadd.f32 %v8046_v51, %v11171_v11 }
 0x2d7   : > { %v8102_v42 = vpop.f32.mrf.mxu0  ;;  %v11328_v55 = vpop.f32.mrf.mxu1 }
 0x2d9   : > { %v8103_v32 = vpop.f32.mrf.mxu0  ;;  %v8154_v8 = vpop.f32.mrf.mxu1 }
 0x2db   : > { %v8105_v56 = vpop.f32.mrf.mxu0  ;;  %v8155_v34 = vpop.f32.mrf.mxu1 }
 0x2dd   : > { %v8106_v61 = vpop.f32.mrf.mxu0  ;;  %v11330_v9 = vpop.f32.mrf.mxu1 }
 0x2de   : > { %v8107_v51 = vadd.f32 %v8106_v61, %v8105_v56 }
 0x2df   : > { %v8108_v19 = vpop.f32.mrf.mxu0  ;;  %v11332_v48 = vpop.f32.mrf.mxu1 }
 0x2e0   : > { %12071 = vst [vmem:[#allocation16_spill] sm:$0xff] %v11332_v48 }
 0x2e1   : > { %v8109_v31 = vpop.f32.mrf.mxu0  ;;  %v11334_v20 = vpop.f32.mrf.mxu1 }
 0x2e2   : > { %12072 = vst [vmem:[#allocation7_spill] sm:$0xff] %v11334_v20 }
 0x2e3   : > { %v8111_v50 = vpop.f32.mrf.mxu0  ;;  %v11336_v62 = vpop.f32.mrf.mxu1 }
 0x2e4   : > { %12073 = vst [vmem:[#allocation6_spill] sm:$0xff] %v11336_v62  ;;  %v8098_v62 = vadd.f32 %v8097_v54, %v8096_v39 }
 0x2e5   : > { %v8112_v63 = vpop.f32.mrf.mxu0  ;;  %v11338_v17 = vpop.f32.mrf.mxu1 }
 0x2e6   : > { %12074 = vst [vmem:[#allocation18_spill] sm:$0xff] %v11338_v17  ;;  %v5052_v17 = vshrl.u32 %v11983_v3, 7  ;;  %v4827_v11 = vadd.f32 %v8098_v62, %v4746_v53 }
 0x2e7   : > { %v8114_v25 = vpop.f32.mrf.mxu0  ;;  %v11340_v37 = vpop.f32.mrf.mxu1 }
 0x2e8   : > { %12075 = vst [vmem:[#allocation10_spill] sm:$0xff] %v11340_v37  ;;  %v5050_v37 = vunpack.c.0.s8 %v5049_v22  ;;  %v8104_v22 = vadd.f32 %v8103_v32, %v8102_v42  ;;  %v8110_v42 = vadd.f32 %v8109_v31, %v8108_v19 }
 0x2e9   : > { %v8115_v27 = vpop.f32.mrf.mxu0  ;;  %v11342_v15 = vpop.f32.mrf.mxu1 }
 0x2ea   : > { %12076 = vst [vmem:[#allocation9_spill] sm:$0xff] %v11342_v15  ;;  %v8049_v15 = vadd.f32 %v11180_v28, %v11175_v13  ;;  %v11362_v48 = vsub.s32 %v5050_v37, %v5052_v17  ;;  %v8061_v28 = vadd.f32 %v11226_v29, %v11221_v46  ;;  %v8101_v46 = vadd.f32 %v11318_v58, %v11316_v5 }
 0x2eb   : > { %v8117_v0 = vpop.f32.mrf.mxu0  ;;  %v11344_v43 = vpop.f32.mrf.mxu1  ;;  %v12082_v17 = vld [vmem:[#allocation6_spill] sm:$0xff] }
 0x2ec   : > { %12077 = vst [vmem:[#allocation12_spill] sm:$0xff] %v11344_v43  ;;  %v4749_v13 = vadd.f32 %v8049_v15, %v11178_v2 }
 0x2ed   : > { %v8118_v6 = vpop.f32.mrf.mxu0  ;;  %v11346_v10 = vpop.f32.mrf.mxu1 }
 0x2ee   : > { %12078 = vst [vmem:[#allocation23_spill] sm:$0xff] %v11346_v10  ;;  %v8055_v10 = vadd.f32 %v11212_v44, %v11198_v49  ;;  %v4754_v44 = vadd.f32 %v8052_v18, %v11194_v57  ;;  %v8156_v57 = vadd.f32 %v8155_v34, %v8154_v8  ;;  %v8119_v5 = vadd.f32 %v8118_v6, %v8117_v0 }
 0x2ef   : > { %v8120_v41 = vpop.f32.mrf.mxu0  ;;  %v11348_v40 = vpop.f32.mrf.mxu1  ;;  %v4830_v62 = vadd.f32 %v8101_v46, %v4749_v13  ;;  %v8153_v8 = vadd.f32 %v11328_v55, %v11323_v1  ;;  %v12084_v15 = vld [vmem:[#allocation10_spill] sm:$0xff] }
 0x2f0   : > { %12079 = vst [vmem:[#allocation19_spill] sm:$0xff] %v11348_v40  ;;  %v8058_v40 = vadd.f32 %v11219_v30, %v11214_v52  ;;  %v8070_v52 = vadd.f32 %v11255_v60, %v11250_v14  ;;  %v8150_v30 = vadd.f32 %v8149_v59, %v11309_v45  ;;  %v4757_v54 = vadd.f32 %v8055_v10, %v11210_v35 }
 0x2f1   : > { %v8121_v47 = vpop.f32.mrf.mxu0  ;;  %v8172_v43 = vpop.f32.mrf.mxu1  ;;  %v4835_v23 = vadd.f32 %v8104_v22, %v4754_v44  ;;  %v4765_v60 = vadd.f32 %v8061_v28, %v11224_v12  ;;  %v4773_v45 = vadd.f32 %v8067_v33, %v11246_v26  ;;  %v8113_v59 = vadd.f32 %v8112_v63, %v8111_v50  ;;  %v12080_v26 = vld [vmem:[#allocation16_spill] sm:$0xff] }
 0x2f2   : > { %v4762_v2 = vadd.f32 %v8058_v40, %v11217_v36  ;;  %v4778_v36 = vadd.f32 %v8070_v52, %v11253_v4  ;;  %v8122_v56 = vadd.f32 %v8121_v47, %v8120_v41  ;;  %v4838_v12 = vadd.f32 %v8107_v51, %v4757_v54  ;;  %v12081_v4 = vld [vmem:[#allocation7_spill] sm:$0xff]  ;;  %v12085_v47 = vld [vmem:[#allocation8_spill] sm:$0xff] }
 0x2f3   : > { %v8123_v20 = vpop.f32.mrf.mxu0  ;;  %v8173_v38 = vpop.f32.mrf.mxu1  ;;  %v8159_v19 = vadd.f32 %v12080_v26, %v11330_v9  ;;  %v4916_v63 = vadd.f32 %v8156_v57, %v4835_v23  ;;  %v4846_v37 = vadd.f32 %v8113_v59, %v4765_v60  ;;  %v4854_v41 = vadd.f32 %v8119_v5, %v4773_v45  ;;  %v12090_v28 = vld [vmem:[#allocation20_spill] sm:$0xff] }
 0x2f4   : > { %v4843_v31 = vadd.f32 %v8110_v42, %v4762_v2  ;;  %v4859_v22 = vadd.f32 %v8122_v56, %v4778_v36  ;;  %v8174_v13 = vadd.f32 %v8173_v38, %v8172_v43  ;;  %v4911_v23 = vadd.f32 %v8153_v8, %v4830_v62 }
 0x2f5   : > { %v8124_v3 = vpop.f32.mrf.mxu0  ;;  %v8175_v49 = vpop.f32.mrf.mxu1  ;;  %v12088_v40 = vld [vmem:[#allocation23_spill] sm:$0xff]  ;;  %v4919_v46 = vadd.f32 %v8159_v19, %v4838_v12 }
 0x2f6   : > { %v8125_v21 = vadd.f32 %v8124_v3, %v8123_v20  ;;  %v8116_v20 = vadd.f32 %v8115_v27, %v8114_v25  ;;  %v8162_v25 = vadd.f32 %v12082_v17, %v12081_v4  ;;  %v12083_v27 = vld [vmem:[#allocation18_spill] sm:$0xff]  ;;  %v12087_v3 = vld [vmem:[#allocation12_spill] sm:$0xff]  ;;  %v11400_v59 = vadd.f32 %v8174_v13, %v4859_v22 }
 0x2f7   : > { %v8126_v39 = vpop.f32.mrf.mxu0  ;;  %v8176_v16 = vpop.f32.mrf.mxu1  ;;  %v8165_v0 = vadd.f32 %v12084_v15, %v12083_v27  ;;  %v12089_v9 = vld [vmem:[#allocation19_spill] sm:$0xff] }
 0x2f8   : > { %v11378_v29 = vadd.f32 %v8125_v21, %v11288_v24  ;;  %v4908_v24 = vadd.f32 %v8150_v30, %v4827_v11  ;;  %v4851_v55 = vadd.f32 %v8116_v20, %v12085_v47  ;;  %v8171_v18 = vadd.f32 %v12089_v9, %v12088_v40 }
 0x2f9   : > { %v8127_v14 = vpop.f32.mrf.mxu0  ;;  %v8177_v52 = vadd.f32 %v8176_v16, %v8175_v49  ;;  %v4924_v42 = vadd.f32 %v8162_v25, %v4843_v31  ;;  %v4927_v60 = vadd.f32 %v8165_v0, %v4846_v37 }
 0x2fa   : > { %v8128_v35 = vadd.f32 %v8127_v14, %v8126_v39  ;;  %v8178_v32 = vpop.f32.mrf.mxu1  ;;  %v4935_v14 = vadd.f32 %v8171_v18, %v4854_v41 }
 0x2fb   : > { %v8129_v58 = vpop.f32.mrf.mxu0  ;;  %v11407_v36 = vadd.f32 %v8177_v52, %v11378_v29 }
 0x2fc   : > { %v4867_v34 = vadd.f32 %v8128_v35, %v11303_v7  ;;  %v8179_v61 = vpop.f32.mrf.mxu1  ;;  %v12086_v7 = vld [vmem:[#allocation9_spill] sm:$0xff] }
 0x2fd   : > { %v8130_v50 = vpop.f32.mrf.mxu0  ;;  %v8168_v10 = vadd.f32 %v12087_v3, %v12086_v7  ;;  %v8180_v11 = vadd.f32 %v8179_v61, %v8178_v32 }
 0x2fe   : > { %v8131_v6 = vadd.f32 %v8130_v50, %v8129_v58  ;;  %v8181_v1 = vpop.f32.mrf.mxu1 }
 0x2ff   : > { %v8397_v53 = vpop.f32.mrf.mxu0  ;;  %v4932_v51 = vadd.f32 %v8168_v10, %v4851_v55  ;;  %v11402_v35 = vadd.f32 %v8180_v11, %v4867_v34 }
 0x300   : > { %v4870_v33 = vadd.f32 %v8131_v6, %v12090_v28  ;;  %v8182_v21 = vpop.f32.mrf.mxu1  ;;  %v4997_v44 = vadd.f32 %v8397_v53, %v4916_v63 }
 0x301   : > { %v8183_v30 = vadd.f32 %v8182_v21, %v8181_v1  ;;  %v4988_v39 = vpop.f32.mrf.mxu0 }
 0x302   : > { %v5079_v54 = vrot.slane %v4997_v44, %v11362_v48  ;;  %v4989_v2 = vadd.f32 %v4988_v39, %v4908_v24 }
 0x303   : > { %v8398_v57 = vpop.f32.mrf.mxu0  ;;  %v11404_v32 = vadd.f32 %v8183_v30, %v4870_v33 }
 0x304   : > { %v5080_v45 = vcombine.high %v5079_v54, %v5079_v54  ;;  %v5047_v43 = vcombine.high %v4989_v2, %v4989_v2  ;;  %v5054_v38 = vrot.slane %v4989_v2, %v11362_v48  ;;  %v5000_v49 = vadd.f32 %v8398_v57, %v4919_v46 }
 0x305   : > { %v4991_v16 = vpop.f32.mrf.mxu0  ;;  %v5235_v20 = vsel %vm1694_vm8, %v5079_v54, -inf }
 0x306   : > { %v5244_v5 = vsel %vm1694_vm8, %v5080_v45, -inf  ;;  %v5061_v58 = vrot.slane %v5047_v43, %v11362_v48  ;;  %v5062_v24 = vcombine.high %v5054_v38, %v5054_v38  ;;  %v5216_v62 = vsel %vm1694_vm8, %v5054_v38, -inf }
 0x307   : > { %v5081_v8 = vcombine.high %v5000_v49, %v5000_v49  ;;  %v5088_v56 = vrot.slane %v5000_v49, %v11362_v48  ;;  %v4992_v61 = vadd.f32 %v4991_v16, %v4911_v23  ;;  %v8401_v34 = vpop.f32.mrf.mxu0 }
 0x308   : > { %v5063_v12 = vcombine.high %v5061_v58, %v5061_v58  ;;  %v5225_v26 = vsel %vm1694_vm8, %v5062_v24, -inf  ;;  %v5234_v29 = vsel %vm1694_vm8, %v5061_v58, -inf  ;;  %v5013_v19 = vadd.f32 %v8401_v34, %v4932_v51 }
 0x309   : > { %v5236_v31 = vmax.f32 %v5234_v29, %v5235_v20  ;;  %v5095_v50 = vrot.slane %v5081_v8, %v11362_v48  ;;  %v5096_v63 = vcombine.high %v5088_v56, %v5088_v56  ;;  %v5252_v4 = vsel %vm1694_vm8, %v5088_v56, -inf  ;;  %v5004_v17 = vpop.f32.mrf.mxu0 }
 0x30a   : > { %v5243_v25 = vsel %vm1694_vm8, %v5063_v12, -inf  ;;  %v5064_v37 = vcombine.high %v4992_v61, %v4992_v61  ;;  %v5115_v27 = vcombine.high %v5013_v19, %v5013_v19  ;;  %v5122_v15 = vrot.slane %v5013_v19, %v11362_v48 }
 0x30b   : > { %v5237_v0 = vrot.slane %v5236_v31, 4  ;;  %v5245_v6 = vmax.f32 %v5243_v25, %v5244_v5  ;;  %v5097_v1 = vcombine.high %v5095_v50, %v5095_v50  ;;  %v5261_v47 = vsel %vm1694_vm8, %v5096_v63, -inf  ;;  %v8402_v55 = vpop.f32.mrf.mxu0 }
 0x30c   : > { %v5071_v7 = vrot.slane %v5064_v37, %v11362_v48  ;;  %v11423_v3 = vrot.slane %v5115_v27, %v11362_v48  ;;  %v5130_v10 = vcombine.high %v5122_v15, %v5122_v15  ;;  %v5288_v41 = vsel %vm1694_vm8, %v5122_v15, -inf }
 0x30d   : > { %v5238_v40 = vmax.f32 %v5236_v31, %v5237_v0  ;;  %v5246_v9 = vrot.slane %v5245_v6, 4  ;;  %v5005_v18 = vadd.f32 %v5004_v17, %v4924_v42  ;;  %v5016_v53 = vadd.f32 %v8402_v55, %v4935_v14  ;;  %v5007_v22 = vpop.f32.mrf.mxu0 }
 0x30e   : > { %v5072_v13 = vcombine.high %v5071_v7, %v5071_v7  ;;  %v5217_v28 = vsel %vm1694_vm8, %v5071_v7, -inf  ;;  %v5131_v33 = vcombine.high %v11423_v3, %v11423_v3  ;;  %v5297_v21 = vsel %vm1694_vm8, %v5130_v10, -inf }
 0x30f   : > { %v5239_v44 = vrot.slane %v5238_v40, 2  ;;  %v5247_v52 = vmax.f32 %v5245_v6, %v5246_v9  ;;  %v5218_v11 = vmax.f32 %v5216_v62, %v5217_v28  ;;  %v5098_v30 = vcombine.high %v5005_v18, %v5005_v18 }
 0x310   : > { %v5226_v39 = vsel %vm1694_vm8, %v5072_v13, -inf  ;;  %v5132_v54 = vcombine.high %v5016_v53, %v5016_v53  ;;  %v5008_v2 = vadd.f32 %v5007_v22, %v4927_v60  ;;  %v5270_v46 = vsel %vm1694_vm8, %v5095_v50, -inf  ;;  %v11439_v60 = vld [vmem:[%s11938_s4] ss:$0 sm:$0xff] }
 0x311   : > { %v5240_v23 = vmax.f32 %v5238_v40, %v5239_v44  ;;  %v5248_v57 = vrot.slane %v5247_v52, 2  ;;  %v5219_v51 = vrot.slane %v5218_v11, 4  ;;  %v5227_v42 = vmax.f32 %v5225_v26, %v5226_v39  ;;  %v8405_v39 = vpop.f32.mrf.mxu0 }
 0x312   : > { %v5105_v14 = vrot.slane %v5098_v30, %v11362_v48  ;;  %v5139_v45 = vrot.slane %v5132_v54, %v11362_v48  ;;  %v5113_v43 = vrot.slane %v5008_v2, %v11362_v48  ;;  %v5279_v38 = vsel %vm1694_vm8, %v5097_v1, -inf }
 0x313   : > { %v5241_v49 = vrot.slane %v5240_v23, 1  ;;  %v5249_v16 = vmax.f32 %v5247_v52, %v5248_v57  ;;  %v5220_v20 = vmax.f32 %v5218_v11, %v5219_v51  ;;  %v5228_v5 = vrot.slane %v5227_v42, 4 }
 0x314   : > { %v5106_v58 = vcombine.high %v5105_v14, %v5105_v14  ;;  %v5253_v24 = vsel %vm1694_vm8, %v5105_v14, -inf  ;;  %v5140_v62 = vcombine.high %v5139_v45, %v5139_v45  ;;  %v5289_v8 = vsel %vm1694_vm8, %v5139_v45, -inf }
 0x315   : > { %v5242_v56 = vmax.f32 %v5240_v23, %v5241_v49  ;;  %v5250_v61 = vrot.slane %v5249_v16, 1  ;;  %v5221_v34 = vrot.slane %v5220_v20, 2  ;;  %v5229_v12 = vmax.f32 %v5227_v42, %v5228_v5 }
 0x316   : > { %v5254_v26 = vmax.f32 %v5252_v4, %v5253_v24  ;;  %v5262_v29 = vsel %vm1694_vm8, %v5106_v58, -inf  ;;  %v5290_v19 = vmax.f32 %v5288_v41, %v5289_v8  ;;  %v5298_v31 = vsel %vm1694_vm8, %v5140_v62, -inf  ;;  %v5020_v62 = vpop.f32.mrf.mxu0 }
 0x317   : > { %v11445_v50 = vmax.f32 %v5249_v16, %v5250_v61  ;;  %v5369_v63 = vadd.f32 %v11439_v60, %v5242_v56  ;;  %v5222_v17 = vmax.f32 %v5220_v20, %v5221_v34  ;;  %v5230_v25 = vrot.slane %v5229_v12, 2 }
 0x318   : > { %v5255_v37 = vrot.slane %v5254_v26, 4  ;;  %v5263_v27 = vmax.f32 %v5261_v47, %v5262_v29  ;;  %v5291_v15 = vrot.slane %v5290_v19, 4  ;;  %v5299_v0 = vmax.f32 %v5297_v21, %v5298_v31 }
 0x319   : > { %v5385_v6 = vmax.f32 %v5369_v63, 0.0  ;;  %v5223_v1 = vrot.slane %v5222_v17, 1  ;;  %v5231_v55 = vmax.f32 %v5229_v12, %v5230_v25  ;;  %v5114_v7 = vcombine.high %v5113_v43, %v5113_v43 }
 0x31a   : > { %v5256_v4 = vmax.f32 %v5254_v26, %v5255_v37  ;;  %v5264_v10 = vrot.slane %v5263_v27, 4  ;;  %v5292_v40 = vmax.f32 %v5290_v19, %v5291_v15  ;;  %v5300_v41 = vrot.slane %v5299_v0, 4  ;;  %v8406_v15 = vpop.f32.mrf.mxu0 }
 0x31b   : > { %v11448_v9 = vrot.slane %v5385_v6, 6  ;;  %v5224_v18 = vmax.f32 %v5222_v17, %v5223_v1  ;;  %v5232_v53 = vrot.slane %v5231_v55, 1  ;;  %v5271_v22 = vsel %vm1694_vm8, %v5113_v43, -inf }
 0x31c   : > { %v5257_v13 = vrot.slane %v5256_v4, 2  ;;  %v5265_v28 = vmax.f32 %v5263_v27, %v5264_v10  ;;  %v5293_v44 = vrot.slane %v5292_v40, 2  ;;  %v5301_v47 = vmax.f32 %v5299_v0, %v5300_v41 }
 0x31d   : > { %v5233_v52 = vmax.f32 %v5231_v55, %v5232_v53  ;;  %v11452_v21 = vadd.f32 %v11439_v60, %v5224_v18  ;;  %v5272_v11 = vmax.f32 %v5270_v46, %v5271_v22  ;;  %v5280_v30 = vsel %vm1694_vm8, %v5114_v7, -inf }
 0x31e   : > { %v5258_v54 = vmax.f32 %v5256_v4, %v5257_v13  ;;  %v5266_v2 = vrot.slane %v5265_v28, 2  ;;  %v5294_v23 = vmax.f32 %v5292_v40, %v5293_v44  ;;  %v5302_v57 = vrot.slane %v5301_v47, 2 }
 0x31f   : > { %v5368_v51 = vadd.f32 %v11439_v60, %v5233_v52  ;;  %v5383_v42 = vmax.f32 %v11452_v21, 0.0  ;;  %v5273_v14 = vrot.slane %v5272_v11, 4  ;;  %v5281_v45 = vmax.f32 %v5279_v38, %v5280_v30 }
 0x320   : > { %v5259_v43 = vrot.slane %v5258_v54, 1  ;;  %v5267_v49 = vmax.f32 %v5265_v28, %v5266_v2  ;;  %v5295_v16 = vrot.slane %v5294_v23, 1  ;;  %v5303_v20 = vmax.f32 %v5301_v47, %v5302_v57  ;;  %v5023_v47 = vpop.f32.mrf.mxu0 }
 0x321   : > { %v5384_v5 = vmax.f32 %v5368_v51, 0.0  ;;  %v5274_v58 = vmax.f32 %v5272_v11, %v5273_v14  ;;  %v5282_v46 = vrot.slane %v5281_v45, 4  ;;  %v5029_v24 = vadd.f32 %v8405_v39, %v11402_v35 }
 0x322   : > { %v5260_v8 = vmax.f32 %v5258_v54, %v5259_v43  ;;  %v5268_v56 = vrot.slane %v5267_v49, 1  ;;  %v5296_v61 = vmax.f32 %v5294_v23, %v5295_v16  ;;  %v5304_v34 = vrot.slane %v5303_v20, 1 }
 0x323   : > { %v5415_v12 = vrot.slane %v5384_v5, 7  ;;  %v5275_v26 = vrot.slane %v5274_v58, 2  ;;  %v5283_v29 = vmax.f32 %v5281_v45, %v5282_v46  ;;  %v5166_v19 = vcombine.high %v5029_v24, %v5029_v24 }
 0x324   : > { %v5269_v38 = vmax.f32 %v5267_v49, %v5268_v56  ;;  %v11459_v31 = vadd.f32 %v11439_v60, %v5260_v8  ;;  %v5305_v63 = vmax.f32 %v5303_v20, %v5304_v34  ;;  %v11462_v17 = vadd.f32 %v11439_v60, %v5296_v61 }
 0x325   : > { %v5276_v25 = vmax.f32 %v5274_v58, %v5275_v26  ;;  %v5284_v35 = vrot.slane %v5283_v29, 2  ;;  %v5173_v37 = vrot.slane %v5166_v19, %v11362_v48  ;;  %v5021_v27 = vadd.f32 %v5020_v62, %v11400_v59 }
 0x326   : > { %v5372_v0 = vadd.f32 %v11439_v60, %v5269_v38  ;;  %v5387_v6 = vmax.f32 %v11459_v31, 0.0  ;;  %v5376_v1 = vadd.f32 %v11439_v60, %v5305_v63  ;;  %v5391_v55 = vmax.f32 %v11462_v17, 0.0 }
 0x327   : > { %v5277_v7 = vrot.slane %v5276_v25, 1  ;;  %v5285_v4 = vmax.f32 %v5283_v29, %v5284_v35  ;;  %v5174_v10 = vcombine.high %v5173_v37, %v5173_v37  ;;  %v5325_v40 = vsel %vm1694_vm8, %v5173_v37, -inf }
 0x328   : > { %v5388_v41 = vmax.f32 %v5372_v0, 0.0  ;;  %v5392_v18 = vmax.f32 %v5376_v1, 0.0  ;;  %v5147_v53 = vrot.slane %v5021_v27, %v11362_v48  ;;  %v5306_v59 = vsel %vm1694_vm8, %v11423_v3, -inf }
 0x329   : > { %v5278_v22 = vmax.f32 %v5276_v25, %v5277_v7  ;;  %v5286_v13 = vrot.slane %v5285_v4, 1  ;;  %v5334_v28 = vsel %vm1694_vm8, %v5174_v10, -inf  ;;  %v5315_v44 = vsel %vm1694_vm8, %v5131_v33, -inf }
 0x32a   : > { %v5424_v52 = vrot.slane %v5388_v41, 7  ;;  %v11479_v21 = vrot.slane %v5392_v18, 7  ;;  %v5148_v11 = vcombine.high %v5147_v53, %v5147_v53  ;;  %v5307_v30 = vsel %vm1694_vm8, %v5147_v53, -inf }
 0x32b   : > { %v5287_v39 = vmax.f32 %v5285_v4, %v5286_v13  ;;  %v5373_v54 = vadd.f32 %v11439_v60, %v5278_v22  ;;  %v5308_v2 = vmax.f32 %v5306_v59, %v5307_v30  ;;  %v5032_v23 = vadd.f32 %v8406_v15, %v11404_v32  ;;  %v8884_v30 = vld [vmem:[%s11941_s7 + $0x8] sm:$0xff]  }
 0x32c   : > { %v5316_v57 = vsel %vm1694_vm8, %v5148_v11, -inf  ;;  %v5024_v3 = vadd.f32 %v5023_v47, %v11407_v36  ;;  %v5370_v33 = vadd.f32 %v11439_v60, %v11445_v50  ;;  %v5417_v51 = vsel %vm5416_vm12, %v5415_v12, %v5383_v42 }
 0x32d   : > { %v11490_v14 = vadd.f32 %v11439_v60, %v5287_v39  ;;  %v5389_v45 = vmax.f32 %v5373_v54, 0.0  ;;  %v5309_v43 = vrot.slane %v5308_v2, 4  ;;  %v5317_v49 = vmax.f32 %v5315_v44, %v5316_v57 }
 0x32e   : > { %v5181_v16 = vrot.slane %v5032_v23, %v11362_v48  ;;  %v5149_v20 = vcombine.high %v5024_v3, %v5024_v3  ;;  %v5156_v32 = vrot.slane %v5024_v3, %v11362_v48  ;;  %v5386_v5 = vmax.f32 %v5370_v33, 0.0  ;;  %v8788_v3 = vld [vmem:[%s11939_s5 + $0x138] sm:$0xff]  }
 0x32f   : > { %v5390_v58 = vmax.f32 %v11490_v14, 0.0  ;;  %v11495_v36 = vrot.slane %v5389_v45, 6  ;;  %v5310_v46 = vmax.f32 %v5308_v2, %v5309_v43  ;;  %v5318_v50 = vrot.slane %v5317_v49, 4 }
 0x330   : > { %v5182_v24 = vcombine.high %v5181_v16, %v5181_v16  ;;  %v5343_v42 = vsel %vm1694_vm8, %v5181_v16, -inf  ;;  %v5163_v62 = vrot.slane %v5149_v20, %v11362_v48  ;;  %v5164_v8 = vcombine.high %v5156_v32, %v5156_v32 }
 0x331   : > { %v5311_v56 = vrot.slane %v5310_v46, 2  ;;  %v5319_v61 = vmax.f32 %v5317_v49, %v5318_v50  ;;  %v5324_v34 = vsel %vm1694_vm8, %v5156_v32, -inf  ;;  %v5420_v12 = vsel %vm5419_vm13, %v11448_v9, %v5417_v51  ;;  %v8790_v49 = vld [vmem:[%s11939_s5 + $0x170] sm:$0xff]  }
 0x332   : > { %v5352_v26 = vsel %vm1694_vm8, %v5182_v24, -inf  ;;  %v5165_v29 = vcombine.high %v5163_v62, %v5163_v62  ;;  %v5326_v19 = vmax.f32 %v5324_v34, %v5325_v40  ;;  %v5333_v38 = vsel %vm1694_vm8, %v5164_v8, -inf }
 0x333   : > { %v5312_v63 = vmax.f32 %v5310_v46, %v5311_v56  ;;  %v5320_v25 = vrot.slane %v5319_v61, 2  ;;  %v5335_v35 = vmax.f32 %v5333_v38, %v5334_v28  ;;  %v5342_v37 = vsel %vm1694_vm8, %v5163_v62, -inf  ;;  %v8791_v38 = vld [vmem:[%s11939_s5 + $0x1f0] sm:$0xff]  }
 0x334   : > { %v5327_v48 = vrot.slane %v5326_v19, 4  ;;  %v5344_v27 = vmax.f32 %v5342_v37, %v5343_v42  ;;  %v5351_v15 = vsel %vm1694_vm8, %v5165_v29, -inf  ;;  %v5421_v0 = vrot.slane %v5386_v5, 5 }
 0x335   : > { %v5313_v1 = vrot.slane %v5312_v63, 1  ;;  %v5321_v7 = vmax.f32 %v5319_v61, %v5320_v25  ;;  %v5336_v4 = vrot.slane %v5335_v35, 4  ;;  %v5353_v9 = vmax.f32 %v5351_v15, %v5352_v26  ;;  %v8789_v61 = vld [vmem:[%s11939_s5 + $0x1b8] sm:$0xff]  }
 0x336   : > { %v5328_v10 = vmax.f32 %v5326_v19, %v5327_v48  ;;  %v5345_v41 = vrot.slane %v5344_v27, 4  ;;  %v5423_v40 = vsel %vm5422_vm14, %v5421_v0, %v5420_v12  ;;  %v5425_v18 = vsel %vm5416_vm12, %v5424_v52, %v5387_v6  ;;  %v8792_v12 = vld [vmem:[%s11939_s5 + $0x130] sm:$0xff]  }
 0x337   : > { %v5314_v53 = vmax.f32 %v5312_v63, %v5313_v1  ;;  %v5322_v59 = vrot.slane %v5321_v7, 1  ;;  %v5337_v22 = vmax.f32 %v5335_v35, %v5336_v4  ;;  %v5354_v13 = vrot.slane %v5353_v9, 4  ;;  %v8794_v63 = vld [vmem:[%s11939_s5 + $0x168] sm:$0xff]  }
 0x338   : > { %v5329_v28 = vrot.slane %v5328_v10, 2  ;;  %v5346_v44 = vmax.f32 %v5344_v27, %v5345_v41  ;;  %v5448_v47 = vrot.slane %v5423_v40, 1  ;;  %v5450_v11 = vrot.slane %v5423_v40, 2  ;;  %v8793_v27 = vld [vmem:[%s11939_s5 + $0x1b0] sm:$0xff]   ;;  %v8795_v1 = vld [vmem:[%s11939_s5 + $0x1e8] sm:$0xff]  }
 0x339   : > { %v5323_v39 = vmax.f32 %v5321_v7, %v5322_v59  ;;  %v5377_v54 = vadd.f32 %v11439_v60, %v5314_v53  ;;  %v5338_v31 = vrot.slane %v5337_v22, 2  ;;  %v5355_v2 = vmax.f32 %v5353_v9, %v5354_v13  ;;  %v8798_v53 = vld [vmem:[%s11939_s5 + $0x160] sm:$0xff]  }
 0x33a   : > { %v5330_v6 = vmax.f32 %v5328_v10, %v5329_v28  ;;  %v5347_v52 = vrot.slane %v5346_v44, 2  ;;  %v7434_v23 = vpack.c.bf16 %v5448_v47, %v5448_v47  ;;  %v7437_v57 = vpack.c.bf16 %v5423_v40, %v5423_v40  ;;  %v8796_v10 = vld [vmem:[%s11939_s5 + $0x128] sm:$0xff]   ;;  %v8799_v28 = vld [vmem:[%s11939_s5 + $0x1e0] sm:$0xff]  }
 0x33b   : > { %v5378_v33 = vadd.f32 %v11439_v60, %v5323_v39  ;;  %v5393_v51 = vmax.f32 %v5377_v54, 0.0  ;;  %v5339_v45 = vmax.f32 %v5337_v22, %v5338_v31  ;;  %v5356_v43 = vrot.slane %v5355_v2, 2  ;;  %v8797_v22 = vld [vmem:[%s11939_s5 + $0x1a8] sm:$0xff]   ;;  %v8800_v47 = vld [vmem:[%s11939_s5 + $0x120] sm:$0xff]  }
 0x33c   : > { %v5331_v16 = vrot.slane %v5330_v6, 1  ;;  %v5348_v20 = vmax.f32 %v5346_v44, %v5347_v52  ;;  %7435 = vmatprep.mubr.msk.bf16.mxu1 %vm11512_vm15, %v7434_v23  ;;  %v7443_v32 = vpack.c.bf16 %v5450_v11, %v5450_v11  ;;  %v5452_v5 = vrot.slane %v5423_v40, 3  ;;  %v8801_v54 = vld [vmem:[%s11939_s5 + $0x1a0] sm:$0xff]   ;;  %v8806_v23 = vld [vmem:[%s11939_s5 + $0x150] sm:$0xff]  }
 0x33d   : > { %v5394_v46 = vmax.f32 %v5378_v33, 0.0  ;;  %v5432_v50 = vrot.slane %v5393_v51, 6  ;;  %v5340_v24 = vrot.slane %v5339_v45, 1  ;;  %v5357_v42 = vmax.f32 %v5355_v2, %v5356_v43  ;;  %7438 = vmatmul.mubr.msk.bf16.vlgmr.msra.gmra.mxu1 %vm11512_vm15, %v7437_v57  ;;  %v8803_v2 = vld [vmem:[%s11939_s5 + $0x1d8] sm:$0xff]   ;;  %v8808_v33 = vld [vmem:[%s11939_s5 + $0x110] sm:$0xff]   ;;  %v8810_v51 = vld [vmem:[%s11939_s5 + $0x148] sm:$0xff]  }
 0x33e   : > { %v5332_v62 = vmax.f32 %v5330_v6, %v5331_v16  ;;  %v5349_v8 = vrot.slane %v5348_v20, 1  ;;  %v7440_v56 = vpack.c.bf16 %v5452_v5, %v5452_v5  ;;  %8243 = vmatpush3.bf16.msra.mxu1 %v8788_v3  ;;  %v5427_v34 = vsel %vm5419_vm13, %v11495_v36, %v5425_v18  ;;  %v8804_v6 = vld [vmem:[%s11939_s5 + $0x118] sm:$0xff]   ;;  %v8807_v3 = vld [vmem:[%s11939_s5 + $0x1d0] sm:$0xff]   ;;  %v8811_v43 = vld [vmem:[%s11939_s5 + $0x1c8] sm:$0xff]  }
 0x33f   : > { %v5341_v26 = vmax.f32 %v5339_v45, %v5340_v24  ;;  %v5358_v29 = vrot.slane %v5357_v42, 1  ;;  %8244 = vmatprep.subr.bf16.mxu1 %v8790_v49  ;;  %v5428_v19 = vrot.slane %v5390_v58, 5  ;;  %v5431_v36 = vsel %vm5416_vm12, %v11479_v21, %v5391_v55  ;;  %v8805_v57 = vld [vmem:[%s11939_s5 + $0x198] sm:$0xff]   ;;  %v8809_v45 = vld [vmem:[%s11939_s5 + $0x190] sm:$0xff]   ;;  %v8812_v49 = vld [vmem:[%s11939_s5 + $0x108] sm:$0xff]  }
 0x340   : > { %v5350_v25 = vmax.f32 %v5348_v20, %v5349_v8  ;;  %v5379_v35 = vadd.f32 %v11439_v60, %v5332_v62  ;;  %7441 = vmatprep.mubr.msk.bf16.mxu0 %vm11512_vm15, %v7440_v56  ;;  %v5433_v14 = vsel %vm5419_vm13, %v5432_v50, %v5431_v36  ;;  %v5434_v58 = vrot.slane %v5394_v46, 5  ;;  %v8814_v16 = vld [vmem:[%s11939_s5 + $0x140] sm:$0xff]   ;;  %v8813_v20 = vld [vmem:[%s11939_s5 + $0x188] sm:$0xff]   ;;  %v8818_v46 = vld [vmem:[%s11939_s5 + $0x278] sm:$0xff]  }
 0x341   : > { %v5380_v37 = vadd.f32 %v11439_v60, %v5341_v26  ;;  %7444 = vmatmul.mubr.msk.bf16.vlgmr.msra.gmra.mxu0 %vm11512_vm15, %v7443_v32  ;;  %v11556_v48 = vsel %vm5422_vm14, %v5428_v19, %v5427_v34  ;;  %v5359_v17 = vmax.f32 %v5357_v42, %v5358_v29  ;;  %v8815_v32 = vld [vmem:[%s11939_s5 + $0x1c0] sm:$0xff]   ;;  %v8819_v62 = vld [vmem:[%s11939_s5 + $0x2f8] sm:$0xff]   ;;  %v8822_v34 = vld [vmem:[%s11939_s5 + $0x270] sm:$0xff]  }
 0x342   : > { %v5381_v55 = vadd.f32 %v11439_v60, %v5350_v25  ;;  %8265 = vmatpush3.bf16.msra.mxu0 %v8789_v61  ;;  %v5455_v21 = vrot.slane %v11556_v48, 1  ;;  %8245 = vmatpush3.bf16.msra.mxu1 %v8792_v12  ;;  %v5459_v0 = vrot.slane %v11556_v48, 3  ;;  %v11568_v7 = vsel %vm5422_vm14, %v5434_v58, %v5433_v14  ;;  %v8816_v5 = vld [vmem:[%s11939_s5 + $0x100] sm:$0xff]   ;;  %v8820_v8 = vld [vmem:[%s11939_s5 + $0x238] sm:$0xff]   ;;  %v8823_v19 = vld [vmem:[%s11939_s5 + $0x2f0] sm:$0xff]  }
 0x343   : > { %v5396_v15 = vmax.f32 %v5380_v37, 0.0  ;;  %8266 = vmatprep.subr.bf16.mxu0 %v8791_v38  ;;  %8246 = vmatprep.subr.bf16.mxu1 %v8794_v63  ;;  %v5395_v41 = vmax.f32 %v5379_v35, 0.0  ;;  %v5382_v13 = vadd.f32 %v11439_v60, %v5359_v17  ;;  %v8802_v60 = vld [vmem:[%s11939_s5 + $0x158] sm:$0xff]   ;;  %v8817_v50 = vld [vmem:[%s11939_s5 + $0x180] sm:$0xff]   ;;  %v5462_v24 = vrot.slane %v11568_v7, 1  ;;  %v8824_v63 = vld [vmem:[%s11939_s5 + $0x230] sm:$0xff]  }
 0x344   : > { %v5397_v4 = vmax.f32 %v5381_v55, 0.0  ;;  %v7446_v9 = vpack.c.bf16 %v5455_v21, %v5455_v21  ;;  %v7452_v18 = vpack.c.bf16 %v5459_v0, %v5459_v0  ;;  %v5457_v42 = vrot.slane %v11556_v48, 2  ;;  %v8821_v26 = vld [vmem:[%s11939_s5 + $0x2b8] sm:$0xff]   ;;  %v8826_v36 = vld [vmem:[%s11939_s5 + $0x268] sm:$0xff]   ;;  %v8825_v25 = vld [vmem:[%s11939_s5 + $0x2b0] sm:$0xff]  }
 0x345   : > { %v5436_v40 = vrot.slane %v5396_v15, 7  ;;  %v5398_v11 = vmax.f32 %v5382_v13, 0.0  ;;  %v5466_v56 = vrot.slane %v11568_v7, 3  ;;  %v7449_v61 = vpack.c.bf16 %v11556_v48, %v11556_v48  ;;  %v8827_v35 = vld [vmem:[%s11939_s5 + $0x2e8] sm:$0xff]   ;;  %v8830_v58 = vld [vmem:[%s11939_s5 + $0x260] sm:$0xff]   ;;  %v8834_v55 = vld [vmem:[%s11939_s5 + $0x258] sm:$0xff]  }
 0x346   : > { %v5438_v59 = vrot.slane %v5397_v4, 6  ;;  %7447 = vmatprep.mubr.msk.bf16.mxu1 %vm11512_vm15, %v7446_v9  ;;  %8267 = vmatpush3.bf16.msra.mxu0 %v8793_v27  ;;  %v7458_v12 = vpack.c.bf16 %v5462_v24, %v5462_v24  ;;  %v7455_v29 = vpack.c.bf16 %v5457_v42, %v5457_v42  ;;  %v8828_v14 = vld [vmem:[%s11939_s5 + $0x228] sm:$0xff]   ;;  %v8831_v48 = vld [vmem:[%s11939_s5 + $0x2e0] sm:$0xff]   ;;  %v8835_v27 = vld [vmem:[%s11939_s5 + $0x2d8] sm:$0xff]  }
 0x347   : > { %7453 = vmatprep.mubr.msk.bf16.mxu0 %vm11512_vm15, %v7452_v18  ;;  %8268 = vmatprep.subr.bf16.mxu0 %v8795_v1  ;;  %v5437_v44 = vsel %vm5416_vm12, %v5436_v40, %v5395_v41  ;;  %v5440_v31 = vrot.slane %v5398_v11, 5  ;;  %v7464_v38 = vpack.c.bf16 %v5466_v56, %v5466_v56  ;;  %v8829_v37 = vld [vmem:[%s11939_s5 + $0x2a8] sm:$0xff]   ;;  %v8832_v17 = vld [vmem:[%s11939_s5 + $0x220] sm:$0xff]   ;;  %v8836_v15 = vld [vmem:[%s11939_s5 + $0x218] sm:$0xff]   ;;  %v5464_v11 = vrot.slane %v11568_v7, 2 }
 0x348   : > { %8247 = vmatpush3.bf16.msra.mxu1 %v8796_v10  ;;  %v5439_v39 = vsel %vm5419_vm13, %v5438_v59, %v5437_v44  ;;  %v8833_v21 = vld [vmem:[%s11939_s5 + $0x2a0] sm:$0xff]   ;;  %v8838_v0 = vld [vmem:[%s11939_s5 + $0x250] sm:$0xff]   ;;  %v8837_v1 = vld [vmem:[%s11939_s5 + $0x298] sm:$0xff]  }
 0x349   : > { %8248 = vmatprep.subr.bf16.mxu1 %v8798_v53  ;;  %v11605_v52 = vsel %vm5422_vm14, %v5440_v31, %v5439_v39  ;;  %v8839_v4 = vld [vmem:[%s11939_s5 + $0x2d0] sm:$0xff]   ;;  %v8842_v10 = vld [vmem:[%s11939_s5 + $0x248] sm:$0xff]   ;;  %v8846_v53 = vld [vmem:[%s11939_s5 + $0x240] sm:$0xff]   ;;  %v7461_v31 = vpack.c.bf16 %v11568_v7, %v11568_v7 }
 0x34a   : > { %8269 = vmatpush3.bf16.msra.mxu0 %v8797_v22  ;;  %v8840_v9 = vld [vmem:[%s11939_s5 + $0x210] sm:$0xff]   ;;  %v8843_v40 = vld [vmem:[%s11939_s5 + $0x2c8] sm:$0xff]   ;;  %v8847_v22 = vld [vmem:[%s11939_s5 + $0x2c0] sm:$0xff]  }
 0x34b   : > { %8270 = vmatprep.subr.bf16.mxu0 %v8799_v28  ;;  %v8841_v41 = vld [vmem:[%s11939_s5 + $0x290] sm:$0xff]   ;;  %v8844_v18 = vld [vmem:[%s11939_s5 + $0x208] sm:$0xff]   ;;  %v8848_v13 = vld [vmem:[%s11939_s5 + $0x200] sm:$0xff]  }
 0x34c   : > { %8249 = vmatpush3.bf16.msra.mxu1 %v8800_v47  ;;  %v8845_v59 = vld [vmem:[%s11939_s5 + $0x288] sm:$0xff]   ;;  %v8850_v28 = vld [vmem:[%s11939_s5 + $0x378] sm:$0xff]   ;;  %v8849_v44 = vld [vmem:[%s11939_s5 + $0x280] sm:$0xff]   ;;  %v5469_v47 = vrot.slane %v11605_v52, 1 }
 0x34d   : > { %8250 = vmatprep.subr.bf16.mxu1 %v8802_v60  ;;  %v8851_v39 = vld [vmem:[%s11939_s5 + $0x3f8] sm:$0xff]   ;;  %v8855_v7 = vld [vmem:[%s11939_s5 + $0x3f0] sm:$0xff]  }
 0x34e   : > { %8271 = vmatpush3.bf16.msra.mxu0 %v8801_v54  ;;  %v8852_v60 = vld [vmem:[%s11939_s5 + $0x338] sm:$0xff]   ;;  %v5473_v54 = vrot.slane %v11605_v52, 3  ;;  %v8871_v56 = vld [vmem:[%s11939_s5 + $0x3d0] sm:$0xff]  }
 0x34f   : > { %8272 = vmatprep.subr.bf16.mxu0 %v8803_v2  ;;  %v8854_v2 = vld [vmem:[%s11939_s5 + $0x370] sm:$0xff]   ;;  %v8867_v24 = vld [vmem:[%s11939_s5 + $0x3d8] sm:$0xff]  }
 0x350   : > { %8251 = vmatpush3.bf16.msra.mxu1 %v8804_v6  ;;  %v7470_v6 = vpack.c.bf16 %v5469_v47, %v5469_v47  ;;  %v8868_v42 = vld [vmem:[%s11939_s5 + $0x318] sm:$0xff]  }
 0x351   : > { %8252 = vmatprep.subr.bf16.mxu1 %v8806_v23  ;;  %v8853_v23 = vld [vmem:[%s11939_s5 + $0x3b8] sm:$0xff]  }
 0x352   : > { %8273 = vmatpush3.bf16.msra.mxu0 %v8805_v57  ;;  %v7467_v57 = vpack.c.bf16 %v5464_v11, %v5464_v11 }
 0x353   : > { %8274 = vmatprep.subr.bf16.mxu0 %v8807_v3  ;;  %v7476_v3 = vpack.c.bf16 %v5473_v54, %v5473_v54 }
 0x354   : > { %8253 = vmatpush3.bf16.msra.mxu1 %v8808_v33  ;;  %v8856_v33 = vld [vmem:[%s11939_s5 + $0x330] sm:$0xff]  }
 0x355   : > { %8254 = vmatprep.subr.bf16.mxu1 %v8810_v51  ;;  %v8858_v51 = vld [vmem:[%s11939_s5 + $0x368] sm:$0xff]  }
 0x356   : > { %8275 = vmatpush3.bf16.msra.mxu0 %v8809_v45  ;;  %v8857_v45 = vld [vmem:[%s11939_s5 + $0x3b0] sm:$0xff]  }
 0x357   : > { %8276 = vmatprep.subr.bf16.mxu0 %v8811_v43  ;;  %v8859_v43 = vld [vmem:[%s11939_s5 + $0x3e8] sm:$0xff]  }
 0x358   : > { %8255 = vmatpush3.bf16.msra.mxu1 %v8812_v49  ;;  %v8860_v49 = vld [vmem:[%s11939_s5 + $0x328] sm:$0xff]  }
 0x359   : > { %8256 = vmatprep.subr.bf16.mxu1 %v8814_v16  ;;  %v8862_v16 = vld [vmem:[%s11939_s5 + $0x360] sm:$0xff]  }
 0x35a   : > { %8277 = vmatpush3.bf16.msra.mxu0 %v8813_v20  ;;  %v8861_v20 = vld [vmem:[%s11939_s5 + $0x3a8] sm:$0xff]  }
 0x35b   : > { %8278 = vmatprep.subr.bf16.mxu0 %v8815_v32  ;;  %v8863_v32 = vld [vmem:[%s11939_s5 + $0x3e0] sm:$0xff]  }
 0x35c   : > { %8257 = vmatpush3.bf16.msra.mxu1 %v8816_v5  ;;  %v8864_v5 = vld [vmem:[%s11939_s5 + $0x320] sm:$0xff]  }
 0x35d   : > { %8286 = vmatprep.subr.bf16.mxu1 %v8818_v46  ;;  %v8866_v46 = vld [vmem:[%s11939_s5 + $0x358] sm:$0xff]  }
 0x35e   : > { %8279 = vmatpush3.bf16.msra.mxu0 %v8817_v50  ;;  %v8865_v50 = vld [vmem:[%s11939_s5 + $0x3a0] sm:$0xff]  }
 0x35f   : > { %7450 = vmatmul.mubr.msk.bf16.vlgmr.msra.gmra.mxu1 %vm11512_vm15, %v7449_v61  ;;  %8308 = vmatprep.subr.bf16.mxu0 %v8819_v62  ;;  %v8870_v62 = vld [vmem:[%s11939_s5 + $0x350] sm:$0xff]  }
 0x360   : > { %8287 = vmatpush3.bf16.msra.mxu1 %v8820_v8  ;;  %7459 = vmatprep.mubr.msk.bf16.mxu1 %vm11512_vm15, %v7458_v12  ;;  %v8869_v8 = vld [vmem:[%s11939_s5 + $0x398] sm:$0xff]   ;;  %v8872_v61 = vld [vmem:[%s11939_s5 + $0x310] sm:$0xff]  }
 0x361   : > { %7456 = vmatmul.mubr.msk.bf16.vlgmr.msra.gmra.mxu0 %vm11512_vm15, %v7455_v29  ;;  %8288 = vmatprep.subr.bf16.mxu1 %v8822_v34  ;;  %v8874_v34 = vld [vmem:[%s11939_s5 + $0x348] sm:$0xff]   ;;  %v8873_v12 = vld [vmem:[%s11939_s5 + $0x390] sm:$0xff]  }
 0x362   : > { %8309 = vmatpush3.bf16.msra.mxu0 %v8821_v26  ;;  %7465 = vmatprep.mubr.msk.bf16.mxu0 %vm11512_vm15, %v7464_v38  ;;  %v8875_v26 = vld [vmem:[%s11939_s5 + $0x3c8] sm:$0xff]  }
 0x363   : > { %8310 = vmatprep.subr.bf16.mxu0 %v8823_v19  ;;  %v8876_v29 = vld [vmem:[%s11939_s5 + $0x308] sm:$0xff]   ;;  %v8878_v19 = vld [vmem:[%s11939_s5 + $0x340] sm:$0xff]  }
 0x364   : > { %8289 = vmatpush3.bf16.msra.mxu1 %v8824_v63  ;;  %v8877_v38 = vld [vmem:[%s11939_s5 + $0x388] sm:$0xff]   ;;  %v8879_v63 = vld [vmem:[%s11939_s5 + $0x3c0] sm:$0xff]  }
 0x365   : > { %8290 = vmatprep.subr.bf16.mxu1 %v8826_v36  ;;  %v8880_v36 = vld [vmem:[%s11939_s5 + $0x300] sm:$0xff]  }
 0x366   : > { %8311 = vmatpush3.bf16.msra.mxu0 %v8825_v25  ;;  %v8881_v25 = vld [vmem:[%s11939_s5 + $0x380] sm:$0xff]  }
 0x367   : > { %8312 = vmatprep.subr.bf16.mxu0 %v8827_v35  ;;  %v5471_v35 = vrot.slane %v11605_v52, 2 }
 0x368   : > { %8291 = vmatpush3.bf16.msra.mxu1 %v8828_v14  ;;  %v7473_v14 = vpack.c.bf16 %v11605_v52, %v11605_v52  ;;  %v8883_v52 = vld [vmem:[%s11941_s7 + $0x10] sm:$0xff]  }
 0x369   : > { %8292 = vmatprep.subr.bf16.mxu1 %v8830_v58  ;;  %v7479_v58 = vpack.c.bf16 %v5471_v35, %v5471_v35 }
 0x36a   : > { %8313 = vmatpush3.bf16.msra.mxu0 %v8829_v37  ;;  %v8882_v37 = vld [vmem:[%s11941_s7 + $0x18] sm:$0xff]  }
 0x36b   : > { %8314 = vmatprep.subr.bf16.mxu0 %v8831_v48  ;;  %v8958_v48 = vmov 0.0  }
 0x36c   : > { %8293 = vmatpush3.bf16.msra.mxu1 %v8832_v17  ;;  %v8885_v17 = vld [vmem:[%s11941_s7] sm:$0xff]  }
 0x36d   : > { %8294 = vmatprep.subr.bf16.mxu1 %v8834_v55 }
 0x36e   : > { %8315 = vmatpush3.bf16.msra.mxu0 %v8833_v21  ;;  %v5747_v21 = vld [vmem:[%s11940_s6] sm:$0x1] }
 0x36f   : > { %8316 = vmatprep.subr.bf16.mxu0 %v8835_v27 }
 0x370   : > { %8295 = vmatpush3.bf16.msra.mxu1 %v8836_v15 }
 0x371   : > { %8296 = vmatprep.subr.bf16.mxu1 %v8838_v0 }
 0x372   : > { %8317 = vmatpush3.bf16.msra.mxu0 %v8837_v1 }
 0x373   : > { %8318 = vmatprep.subr.bf16.mxu0 %v8839_v4 }
 0x374   : > { %8297 = vmatpush3.bf16.msra.mxu1 %v8840_v9 }
 0x375   : > { %8298 = vmatprep.subr.bf16.mxu1 %v8842_v10 }
 0x376   : > { %8319 = vmatpush3.bf16.msra.mxu0 %v8841_v41 }
 0x377   : > { %8320 = vmatprep.subr.bf16.mxu0 %v8843_v40 }
 0x378   : > { %8299 = vmatpush3.bf16.msra.mxu1 %v8844_v18 }
 0x379   : > { %8300 = vmatprep.subr.bf16.mxu1 %v8846_v53 }
 0x37a   : > { %8321 = vmatpush3.bf16.msra.mxu0 %v8845_v59 }
 0x37b   : > { %8322 = vmatprep.subr.bf16.mxu0 %v8847_v22 }
 0x37c   : > { %8301 = vmatpush3.bf16.msra.mxu1 %v8848_v13 }
 0x37d   : > { %8330 = vmatprep.subr.bf16.mxu1 %v8850_v28 }
 0x37e   : > { %8323 = vmatpush3.bf16.msra.mxu0 %v8849_v44 }
 0x37f   : > { %7462 = vmatmul.mubr.msk.bf16.vlgmr.msra.gmra.mxu1 %vm11512_vm15, %v7461_v31  ;;  %8352 = vmatprep.subr.bf16.mxu0 %v8851_v39 }
 0x380   : > { %8331 = vmatpush3.bf16.msra.mxu1 %v8852_v60  ;;  %7471 = vmatprep.mubr.msk.bf16.mxu1 %vm11512_vm15, %v7470_v6 }
 0x381   : > { %7468 = vmatmul.mubr.msk.bf16.vlgmr.msra.gmra.mxu0 %vm11512_vm15, %v7467_v57  ;;  %8332 = vmatprep.subr.bf16.mxu1 %v8854_v2 }
 0x382   : > { %8353 = vmatpush3.bf16.msra.mxu0 %v8853_v23  ;;  %7477 = vmatprep.mubr.msk.bf16.mxu0 %vm11512_vm15, %v7476_v3 }
 0x383   : > { %8354 = vmatprep.subr.bf16.mxu0 %v8855_v7 }
 0x384   : > { %8333 = vmatpush3.bf16.msra.mxu1 %v8856_v33 }
 0x385   : > { %8334 = vmatprep.subr.bf16.mxu1 %v8858_v51 }
 0x386   : > { %8355 = vmatpush3.bf16.msra.mxu0 %v8857_v45 }
 0x387   : > { %8356 = vmatprep.subr.bf16.mxu0 %v8859_v43 }
 0x388   : > { %8335 = vmatpush3.bf16.msra.mxu1 %v8860_v49 }
 0x389   : > { %8336 = vmatprep.subr.bf16.mxu1 %v8862_v16 }
 0x38a   : > { %8357 = vmatpush3.bf16.msra.mxu0 %v8861_v20 }
 0x38b   : > { %8358 = vmatprep.subr.bf16.mxu0 %v8863_v32 }
 0x38c   : > { %8337 = vmatpush3.bf16.msra.mxu1 %v8864_v5 }
 0x38d   : > { %8338 = vmatprep.subr.bf16.mxu1 %v8866_v46 }
 0x38e   : > { %8359 = vmatpush3.bf16.msra.mxu0 %v8865_v50 }
 0x38f   : > { %8360 = vmatprep.subr.bf16.mxu0 %v8867_v24 }
 0x390   : > { %8339 = vmatpush3.bf16.msra.mxu1 %v8868_v42 }
 0x391   : > { %8340 = vmatprep.subr.bf16.mxu1 %v8870_v62 }
 0x392   : > { %8361 = vmatpush3.bf16.msra.mxu0 %v8869_v8 }
 0x393   : > { %8362 = vmatprep.subr.bf16.mxu0 %v8871_v56 }
 0x394   : > { %8341 = vmatpush3.bf16.msra.mxu1 %v8872_v61 }
 0x395   : > { %8342 = vmatprep.subr.bf16.mxu1 %v8874_v34 }
 0x396   : > { %8363 = vmatpush3.bf16.msra.mxu0 %v8873_v12 }
 0x397   : > { %8364 = vmatprep.subr.bf16.mxu0 %v8875_v26 }
 0x398   : > { %8343 = vmatpush3.bf16.msra.mxu1 %v8876_v29 }
 0x399   : > { %8344 = vmatprep.subr.bf16.mxu1 %v8878_v19  ;;  %v12093_v19 = vlaneseq }
 0x39a   : > { %8365 = vmatpush3.bf16.msra.mxu0 %v8877_v38 }
 0x39b   : > { %8366 = vmatprep.subr.bf16.mxu0 %v8879_v63  ;;  %v6916_v38 = vand.u32 127, %v12093_v19  ;;  %v6846_v63 = vld [vmem:[%s11942_s8] sm:$0x1] }
 0x39c   : > { %8345 = vmatpush3.bf16.msra.mxu1 %v8880_v36 }
 0x39d   : > { %8407 = vmatprep.subr.bf16.mxu1 %v8958_v48  ;;  %vm6917_vm2 = vcmp.lt.s32.totalorder %v6916_v38, 10 }
 0x39e   : > { %8367 = vmatpush3.bf16.msra.mxu0 %v8881_v25 }
 0x39f   : > { %7474 = vmatmul.mubr.msk.bf16.vlgmr.msra.gmra.mxu1 %vm11512_vm15, %v7473_v14 }
 0x3a0   : > { %8408 = vmatpush3.bf16.msra.mxu1 %v8882_v37  ;;  %8415 = vmatprep.mubr.msk.bf16.mxu1 %vm8959_vm0, %v8958_v48 }
 0x3a1   : > { %7480 = vmatmul.mubr.msk.bf16.vlgmr.msra.gmra.mxu0 %vm11512_vm15, %v7479_v58  ;;  %8409 = vmatprep.subr.bf16.mxu1 %v8958_v48 }
 0x3a4   : > { %8410 = vmatpush3.bf16.msra.mxu1 %v8883_v52 }
 0x3a5   : > { %8411 = vmatprep.subr.bf16.mxu1 %v8958_v48 }
 0x3a8   : > { %8412 = vmatpush3.bf16.msra.mxu1 %v8884_v30 }
 0x3a9   : > { %8413 = vmatprep.subr.bf16.mxu1 %v8958_v48 }
 0x3ac   : > { %8414 = vmatpush3.bf16.msra.mxu1 %v8885_v17 }
 0x3fd   : > { %v8214_v55 = vpop.f32.mrf.mxu1 }
 0x3ff   : > { %v8215_v27 = vpop.f32.mrf.mxu1 }
 0x400   : > { %v8216_v15 = vadd.f32 %v8215_v27, %v8214_v55 }
 0x401   : > { %v8236_v0 = vpop.f32.mrf.mxu0  ;;  %v8217_v1 = vpop.f32.mrf.mxu1 }
 0x402   : > { %v6551_v4 = vadd.f32 %v8216_v15, %v5747_v21 }
 0x403   : > { %v8237_v9 = vpop.f32.mrf.mxu0  ;;  %v8218_v10 = vpop.f32.mrf.mxu1 }
 0x404   : > { %v8238_v41 = vadd.f32 %v8237_v9, %v8236_v0 }
 0x405   : > { %v8239_v40 = vpop.f32.mrf.mxu0 }
 0x406   : > { %v6591_v18 = vadd.f32 %v8238_v41, %v6551_v4 }
 0x407   : > { %v8240_v53 = vpop.f32.mrf.mxu0 }
 0x41f   : > { %v8258_v59 = vpop.f32.mrf.mxu1 }
 0x421   : > { %v8280_v22 = vpop.f32.mrf.mxu0  ;;  %v8259_v13 = vpop.f32.mrf.mxu1 }
 0x422   : > { %v8260_v3 = vadd.f32 %v8259_v13, %v8258_v59 }
 0x423   : > { %v8281_v28 = vpop.f32.mrf.mxu0  ;;  %v8261_v44 = vpop.f32.mrf.mxu1 }
 0x424   : > { %v6631_v33 = vadd.f32 %v8260_v3, %v6591_v18  ;;  %v8282_v51 = vadd.f32 %v8281_v28, %v8280_v22 }
 0x425   : > { %v8283_v47 = vpop.f32.mrf.mxu0  ;;  %v8262_v11 = vpop.f32.mrf.mxu1 }
 0x426   : > { %v6671_v43 = vadd.f32 %v8282_v51, %v6631_v33 }
 0x427   : > { %v8284_v39 = vpop.f32.mrf.mxu0 }
 0x43f   : > { %v8302_v60 = vpop.f32.mrf.mxu1 }
 0x441   : > { %v8324_v54 = vpop.f32.mrf.mxu0  ;;  %v8303_v31 = vpop.f32.mrf.mxu1 }
 0x442   : > { %v8304_v45 = vadd.f32 %v8303_v31, %v8302_v60 }
 0x443   : > { %v8325_v2 = vpop.f32.mrf.mxu0  ;;  %v8305_v6 = vpop.f32.mrf.mxu1 }
 0x444   : > { %v6711_v49 = vadd.f32 %v8304_v45, %v6671_v43  ;;  %v8326_v20 = vadd.f32 %v8325_v2, %v8324_v54 }
 0x445   : > { %v8327_v23 = vpop.f32.mrf.mxu0  ;;  %v8306_v57 = vpop.f32.mrf.mxu1 }
 0x446   : > { %v6751_v46 = vadd.f32 %v8326_v20, %v6711_v49 }
 0x447   : > { %v8328_v7 = vpop.f32.mrf.mxu0 }
 0x45f   : > { %v8346_v16 = vpop.f32.mrf.mxu1 }
 0x461   : > { %v8368_v32 = vpop.f32.mrf.mxu0  ;;  %v8347_v5 = vpop.f32.mrf.mxu1 }
 0x462   : > { %v8348_v50 = vadd.f32 %v8347_v5, %v8346_v16 }
 0x463   : > { %v8369_v24 = vpop.f32.mrf.mxu0  ;;  %v8349_v42 = vpop.f32.mrf.mxu1 }
 0x464   : > { %v6791_v62 = vadd.f32 %v8348_v50, %v6751_v46  ;;  %v8370_v8 = vadd.f32 %v8369_v24, %v8368_v32 }
 0x465   : > { %v8371_v56 = vpop.f32.mrf.mxu0  ;;  %v8350_v61 = vpop.f32.mrf.mxu1 }
 0x466   : > { %v6831_v34 = vadd.f32 %v8370_v8, %v6791_v62 }
 0x467   : > { %v8372_v12 = vpop.f32.mrf.mxu0 }
 0x468   : > { %v6836_v26 = vmax.f32 %v6831_v34, 0.0 }
 0x46a   : > { %v6837_v29 = vpack.c.bf16 %v6836_v26, %v6836_v26 }
 0x46c   : > { %8416 = vmatmul.mubr.msk.bf16.vlgmr.msra.gmra.mxu1 %vm6871_vm1, %v6837_v29 }
 0x52c   : > { %v6909_v36 = vpop.f32.mrf.mxu1 }
 0x52d   : > { %v6910_v25 = vadd.f32 %v6909_v36, %v6846_v63 }
 0x52e   : > { %v8417_v35 = vpop.f32.mrf.mxu1 }
 0x52f   : > { %v6918_v14 = vsel %vm6917_vm2, %v6910_v25, -inf }
 0x530   : > { %v6912_v58 = vpop.f32.mrf.mxu1  ;;  %v6919_v37 = vsel %vm1752_vm9, %v6918_v14, -inf }
 0x531   : > { %6920 = vmax.xlane.f32.xlu0 %v6919_v37 }
 0x532   : > { %v8418_v48 = vpop.f32.mrf.mxu1 }
 0x5ba   : > { %v6921_v52 = vpop.xlane.xlu0 %6920 }
 0x5bb   : > { %v6922_v30 = vsub.f32 %v6918_v14, %v6921_v52 }
 0x5bd   : > { %v6923_v17 = vmul.f32 1.442695, %v6922_v30 }
 0x5bf   : > { %8886 = vpow2.f32 %v6923_v17 }
 0x5cc   : > { %v8887_v55 = vpop.eup %8886 }
 0x5cd   : > { %v6925_v21 = vsel %vm1752_vm9, %v8887_v55, 0.0 }
 0x5ce   : > { %6926 = vadd.xlane.f32.xlu0 %v6925_v21 }
 0x657   : > { %v6927_v27 = vpop.xlane.xlu0 %6926 }
 0x658   : > { %8888 = vlog2.f32 %v6927_v27 }
 0x665   : > { %v8889_v15 = vpop.eup %8888 }
 0x666   : > { %v6929_v0 = vmul.f32 0.6931472, %v8889_v15 }
 0x668   : > { %v6930_v1 = vsub.f32 %v6922_v30, %v6929_v0 }
 0x66a   : > { %v6931_v4 = vsel %vm6917_vm2, %v6930_v1, 0.0 }
 0x66b   : > { %6932 = vst [vmem:[%s324_s24] sm:$0x1] %v6931_v4 }
 0x66c   : > { %8907 = shalt.err (!%p8904_p3)
}
 0x66d   : > { %s8908_s22 = scalar_lea.hbm %s11898_s26, 16  ;;  %s8912_s24 = scalar_lea.hbm %s11943_s9, 32 }
 0x66e   : > { %p8909_p4 = scmp.ne.s32.totalorder %s11898_s26, %s8908_s22  ;;  %p8913_p9 = scmp.lt.s32.totalorder %s11898_s26, %s11943_s9 }
 0x66f   : > { %p8914_p10 = scmp.lt.s32.totalorder %s8912_s24, %s8908_s22 }
 0x670   : > { %p8910_p7 = pnand %p8909_p4, %p9049_p5 }
 0x671   : > { %p8915_p11 = por %p8914_p10, %p8913_p9 }
 0x672   : > { %p8911_p8 = pneg %p8910_p7 }
 0x674   : > { %p8916_p12 = pnand %p8915_p11, %p8911_p8 }
 0x676   : > { %8919 = shalt.err (!%p8916_p12)
}
 0x677   : > { %8420 = dma.vmem_to_hbm [thread:$0]  (%p9049_p5), %s6947_s28, 16, %s11898_s26, %s6934_s29  }
 0x678 PF: > { %p8426_p13 = scmp.ge.s32.totalorder %s8954_s12, 2  ;;  %s6958_s14 = sand.u32 1, %s8942_s30  }
 0x679   : > { %s6959_s17 = scalar_lea.sflag [#allocation4], %s6958_s14 }
 0x67a   : > { %p8423_p0 = pnand %p8426_p13, %p9053_p6 }
 0x67c   : > { %p8424_p1 = pneg %p8423_p0 }
 0x67e   : > { %8937 = dma.done.wait (%p8424_p1), %s6959_s17, 16  }
 0x67f   : > { %8939 = vsyncadd (%p8424_p1), %s6959_s17, 4294967280  ;;  %p19_p2 = scmp.ge.s32.totalorder %s9036_s15, 4   ;;  %s12094_s30 = smov %s8946_s10 }
 0x680   : > { %s12095_s10 = smov %s8950_s11  ;;  %s12096_s11 = smov %s9047_s18 }
 0x681   : > { %s12097_s12 = smov %s9036_s15  ;;  %21 = sbr.rel (!%p19_p2) target bundleno = 3 (0x3), region = 91 }
 0x686   :  { %6963 = vsyncpa [#allocation4], 1 }
 0x687   :  { %6965 = vsyncpa [#allocation4 + $0x1], 1 }

</bundles_post_ra>
